<compile_context>
chip_gen: v5e
topology: v5e:2x2
jax: 0.10.0
libtpu: 0.0.40
codegen_flags: <defaults>
</compile_context>

<pallas_src>
import functools
import math

import jax
import jax.numpy as jnp
from jax.experimental import pallas as pl
from jax.experimental.pallas import tpu as pltpu


# ----------------------------- static layout helpers -----------------------------

def _align(n, m):
    return ((n + m - 1) // m) * m


def _a_segments(E, F, hid):
    # all matmul weights whose contraction (row) dim is E -> one lane-concatenated slab
    return [("w_ada1", 2 * E), ("w_qkv", 3 * E), ("w_o1", E), ("w_ada2", 2 * E),
            ("w_q2", E), ("w_o2", E), ("w_m1", hid), ("w_gate", E), ("w_lin", F)]


def _b_segments(E, F, hid):
    # all (1, n) row biases / LN affine params -> one row slab
    return [("b_ada1", 2 * E), ("b_qkv", 3 * E), ("b_o1", E), ("b_ada2", 2 * E),
            ("b_q2", E), ("b_kv2", 2 * E), ("b_o2", E), ("g_ln2", E), ("b_ln2", E),
            ("b_m1", hid), ("b_m2", E), ("b_loc", E), ("b_gate", E), ("b_lin", F)]


def _build_layout(segs):
    layout, off = {}, 0
    for name, w in segs:
        layout[name] = (off, w)
        off += _align(w, 128)            # 128-lane aligned segment starts
    return layout, off


def _side_offsets(E, F):
    o_tr = _align(E, 32)                 # trend segment start
    o_mn = o_tr + _align(F, 32)          # linear(mean) segment start
    ws = max(128, _align(o_mn + F, 128))
    return o_tr, o_mn, ws


def _poly_space_T(T):
    lin = jnp.arange(1, T + 1, dtype=jnp.float32) / (T + 1)
    poly = jnp.stack([lin ** (p + 1) for p in range(3)], axis=0)   # (3, T)
    return poly.T                                                  # (T, 3)


# ----------------------------- fused full-decoder kernel -----------------------------

def _decoder_kernel(x_ref, enc_ref, emb1_ref, emb2_ref,
                    wA_ref, bias_ref, w_kv2_ref, w_m2_ref, w_loc_ref,
                    w_t2_ref, wt1p_ref, w_pB_ref, misc_ref, c1_ref,
                    eshift_ref, pshift_ref,
                    x_out_ref, side_ref,
                    xp_scr,
                    *, n_head, a_layout, b_layout, side_offsets):
    f32 = jnp.float32
    T, E = x_ref.shape[1], x_ref.shape[2]
    F = w_t2_ref.shape[3]
    H = n_head
    hd = E // H
    o_tr, o_mn, ws = side_offsets
    m_off = _align(E, 128)               # trend-bias segment inside misc slab
    l = pl.program_id(1)

    # layer 0: seed the carried x (the x output block is the carry across layers)
    @pl.when(l == 0)
    def _init():
        x_out_ref[...] = x_ref[...]

    def getA(name):
        off, w = a_layout[name]
        return wA_ref[0, :, off:off + w]

    def getB(name):
        off, w = b_layout[name]
        return bias_ref[0, :, off:off + w]

    def layer_norm(z):
        mu = jnp.mean(z, axis=-1, keepdims=True)
        var = jnp.mean((z - mu) ** 2, axis=-1, keepdims=True)
        return (z - mu) * jax.lax.rsqrt(var + 1e-5)

    def gelu(z):
        # tanh-approximate GELU (EUP slot); ~1e-3 deviation from exact erf GELU.
        c = 0.7978845608028654
        return 0.5 * z * (1.0 + jnp.tanh(c * (z + 0.044715 * z * z * z)))

    def softmax(s):
        s = s - jnp.max(s, axis=-1, keepdims=True)
        p = jnp.exp(s)
        return p / jnp.sum(p, axis=-1, keepdims=True)   # exact denominator

    def ada_ln(z, emb, w, b):
        e2 = jnp.dot(emb, w, preferred_element_type=f32) + b        # (1, 2E)
        return layer_norm(z) * (1.0 + e2[:, :E]) + e2[:, E:]

    def attention(q, k, v, w_o, b_o):
        # per-head loop (H static, tiny); head outputs accumulated through
        # 8-aligned sublane slices of w_o -> no head lane-concat.
        scale = 1.0 / math.sqrt(hd)
        acc = jnp.zeros((q.shape[0], E), f32)
        for i in range(H):
            sl = slice(i * hd, (i + 1) * hd)
            s = jax.lax.dot_general(q[:, sl], k[:, sl],
                                    (((1,), (1,)), ((), ())),
                                    preferred_element_type=f32) * scale
            p = softmax(s)
            o = jnp.dot(p, v[:, sl], preferred_element_type=f32)
            acc = acc + jnp.dot(o, w_o[sl, :], preferred_element_type=f32)
        return acc + b_o

    x = x_out_ref[0].astype(f32)                 # (T, E) carried across layers
    enc = enc_ref[0].astype(f32)                 # (S, C)
    emb1 = emb1_ref[0].astype(f32)               # (1, E)
    emb2 = emb2_ref[0].astype(f32)               # (1, E)

    # ---- self attention: AdaLN -> fused QKV -> per-head attn -> proj + residual ----
    h = ada_ln(x, emb1, getA("w_ada1"), getB("b_ada1"))
    qkv = jnp.dot(h, getA("w_qkv"), preferred_element_type=f32) + getB("b_qkv")
    x = x + attention(qkv[:, :E], qkv[:, E:2 * E], qkv[:, 2 * E:],
                      getA("w_o1"), getB("b_o1"))

    # ---- cross attention (K/V from encoder output, fused (C, 2E) weight) ----
    h = ada_ln(x, emb2, getA("w_ada2"), getB("b_ada2"))
    q2 = jnp.dot(h, getA("w_q2"), preferred_element_type=f32) + getB("b_q2")
    kv = jnp.dot(enc, w_kv2_ref[0], preferred_element_type=f32) + getB("b_kv2")
    x = x + attention(q2, kv[:, :E], kv[:, E:], getA("w_o2"), getB("b_o2"))

    # ---- proj (k=1 conv) chunk B -> x2 for the Fourier/season path ----
    x2 = jnp.dot(w_pB_ref[0], x, preferred_element_type=f32) + misc_ref[0, :, 0:E]

    # ---- TrendBlock (proj chunk A + its bias folded into conv1 weights host-side) ----
    m0 = jnp.dot(wt1p_ref[0, 0], x, preferred_element_type=f32)       # (3, E)
    m1 = jnp.dot(wt1p_ref[0, 1], x, preferred_element_type=f32)
    m2 = jnp.dot(wt1p_ref[0, 2], x, preferred_element_type=f32)
    acc1 = (c1_ref[0].astype(f32) + m1
            + jnp.dot(m0, eshift_ref[0], preferred_element_type=f32)   # lane shift right
            + jnp.dot(m2, eshift_ref[1], preferred_element_type=f32))  # lane shift left
    g1 = gelu(acc1)                                                    # (3, E)
    trend = misc_ref[0, :, m_off:m_off + F].astype(f32)                # poly @ conv2-bias
    for dk in range(3):
        trend = trend + jnp.dot(
            pshift_ref[dk],
            jnp.dot(g1, w_t2_ref[0, dk], preferred_element_type=f32),
            preferred_element_type=f32)                                # (T, F)

    # ---- MLP: LN -> lin -> GELU -> lin (+ residual) ----
    hm = layer_norm(x) * getB("g_ln2") + getB("b_ln2")
    hm = gelu(jnp.dot(hm, getA("w_m1"), preferred_element_type=f32) + getB("b_m1"))
    x = x + jnp.dot(hm, w_m2_ref[0], preferred_element_type=f32) + getB("b_m2")

    # ---- GatedLocalCNN: Conv1d(E,E,5) * sigmoid(Conv1d(E,E,1)) (+ residual) ----
    # stage x in a zero-padded VMEM scratch; taps read shifted sublane slices.
    xp_scr[0:2, :] = jnp.zeros((2, E), f32)
    xp_scr[2:2 + T, :] = x
    xp_scr[2 + T:4 + T, :] = jnp.zeros((2, E), f32)
    loc = jnp.zeros((T, E), f32) + getB("b_loc")
    for dk in range(5):
        loc = loc + jnp.dot(xp_scr[dk:dk + T, :], w_loc_ref[0, dk],
                            preferred_element_type=f32)
    gate = jnp.dot(x, getA("w_gate"), preferred_element_type=f32) + getB("b_gate")
    gate = pl.reciprocal(1.0 + jnp.exp(-gate), approx=True)
    x = x + loc * gate

    # ---- head: de-mean along T, linear on the mean ----
    m = jnp.mean(x, axis=0, keepdims=True)                             # (1, E)
    x = x - m
    m_lin = jnp.dot(m, getA("w_lin"), preferred_element_type=f32) + getB("b_lin")

    x_out_ref[0] = x.astype(x_out_ref.dtype)                           # carry / final output

    # ---- lane-dense packed per-layer side slab: [x2 | trend | linear(mean) | pad] ----
    pieces = [x2]
    if o_tr > E:
        pieces.append(jnp.zeros((T, o_tr - E), f32))
    pieces.append(trend)
    gap = o_mn - (o_tr + F)
    if gap > 0:
        pieces.append(jnp.zeros((T, gap), f32))
    pieces.append(jnp.broadcast_to(m_lin, (T, F)))
    tail = ws - (o_mn + F)
    if tail > 0:
        pieces.append(jnp.zeros((T, tail), f32))
    side_ref[0, 0] = jnp.concatenate(pieces, axis=-1).astype(side_ref.dtype)


def _decoder_pallas(packed, x, enc, emb1, emb2, n_head):
    B, T, E = x.shape
    S, C = enc.shape[1], enc.shape[2]
    L, _, WA = packed["wA"].shape
    WB = packed["bias"].shape[-1]
    WM = packed["misc"].shape[-1]
    F = packed["w_t2"].shape[-1]
    hid = packed["w_m2"].shape[1]
    o_tr, o_mn, WS = _side_offsets(E, F)
    a_layout, _ = _build_layout(_a_segments(E, F, hid))
    b_layout, _ = _build_layout(_b_segments(E, F, hid))

    kernel = functools.partial(
        _decoder_kernel, n_head=n_head, a_layout=a_layout, b_layout=b_layout,
        side_offsets=(o_tr, o_mn, WS))

    in_specs = [
        pl.BlockSpec((1, T, E), lambda b, l: (b, 0, 0)),       # x
        pl.BlockSpec((1, S, C), lambda b, l: (b, 0, 0)),       # enc
        pl.BlockSpec((1, 1, E), lambda b, l: (b, 0, 0)),       # emb1
        pl.BlockSpec((1, 1, E), lambda b, l: (b, 0, 0)),       # emb2
        pl.BlockSpec((1, E, WA), lambda b, l: (l, 0, 0)),      # matmul-weight slab
        pl.BlockSpec((1, 1, WB), lambda b, l: (l, 0, 0)),      # row-bias slab
        pl.BlockSpec((1, C, 2 * E), lambda b, l: (l, 0, 0)),   # cross K|V weight
        pl.BlockSpec((1, hid, E), lambda b, l: (l, 0, 0)),     # MLP second weight
        pl.BlockSpec((1, 5, E, E), lambda b, l: (l, 0, 0, 0)),  # local conv taps
        pl.BlockSpec((1, 3, E, F), lambda b, l: (l, 0, 0, 0)),  # trend conv2 taps
        pl.BlockSpec((1, 3, 3, T), lambda b, l: (l, 0, 0, 0)),  # trend conv1 (proj folded)
        pl.BlockSpec((1, T, T), lambda b, l: (l, 0, 0)),       # proj chunk B
        pl.BlockSpec((1, T, WM), lambda b, l: (l, 0, 0)),      # misc (b_pB bcast, trend bias)
        pl.BlockSpec((1, 3, E), lambda b, l: (l, 0, 0)),       # conv1 additive const
        pl.BlockSpec((2, E, E), lambda b, l: (0, 0, 0)),       # lane shift matrices (shared)
        pl.BlockSpec((3, T, 3), lambda b, l: (0, 0, 0)),       # shifted poly (shared)
    ]
    out_specs = (
        pl.BlockSpec((1, T, E), lambda b, l: (b, 0, 0)),       # x (carry + final)
        pl.BlockSpec((1, 1, T, WS), lambda b, l: (b, l, 0, 0)),  # per-layer side slab
    )
    out_shape = (jax.ShapeDtypeStruct((B, T, E), jnp.float32),
                 jax.ShapeDtypeStruct((B, L, T, WS), jnp.float32))

    return pl.pallas_call(
        kernel,
        grid=(B, L),
        in_specs=in_specs,
        out_specs=out_specs,
        out_shape=out_shape,
        scratch_shapes=[pltpu.VMEM((T + 4, E), jnp.float32)],
        compiler_params=pltpu.CompilerParams(
            dimension_semantics=("parallel", "arbitrary"),
            vmem_limit_bytes=32 * 1024 * 1024),
    )(x, enc, emb1, emb2,
      packed["wA"], packed["bias"], packed["w_kv2"], packed["w_m2"],
      packed["w_loc"], packed["w_t2"], packed["wt1p"], packed["w_pB"],
      packed["misc"], packed["c1"], packed["eshift"], packed["pshift"])


# ----------------------------- plain-JAX pieces -----------------------------

def sinusoidal_emb(t, dim):
    half = dim // 2
    freqs = jnp.exp(jnp.arange(half, dtype=jnp.float32)
                    * (-math.log(10000.0) / (half - 1)))
    args = t.astype(jnp.float32)[:, None] * freqs[None, :]
    return jnp.concatenate([jnp.sin(args), jnp.cos(args)], axis=-1)


def fourier_layer(x, low_freq=1, factor=1):
    # TODO(synk): rfft / per-channel top-k / complex extrapolation have no Pallas
    # TPU equivalent; kept in plain JAX (matches FourierLayer semantics).
    b, t_len, d = x.shape
    x_freq = jnp.fft.rfft(x, axis=1)
    if t_len % 2 == 0:
        x_freq = x_freq[:, low_freq:-1]
        f = jnp.fft.rfftfreq(t_len)[low_freq:-1]
    else:
        x_freq = x_freq[:, low_freq:]
        f = jnp.fft.rfftfreq(t_len)[low_freq:]
    length = x_freq.shape[1]
    top_k = int(factor * math.log(length))
    mag_t = jnp.abs(x_freq).transpose(0, 2, 1)                  # (b, d, Fr)
    _, idx = jax.lax.top_k(mag_t, top_k)                        # (b, d, k)
    xf_sel = jnp.take_along_axis(x_freq.transpose(0, 2, 1), idx, axis=-1)
    xf_sel = xf_sel.transpose(0, 2, 1)                          # (b, k, d)
    f_sel = f.astype(jnp.float32)[idx].transpose(0, 2, 1)       # (b, k, d)
    xf = jnp.concatenate([xf_sel, jnp.conj(xf_sel)], axis=1)    # (b, 2k, d)
    ff = jnp.concatenate([f_sel, -f_sel], axis=1)[:, :, None, :]
    t_arr = jnp.arange(t_len, dtype=jnp.float32)[None, None, :, None]
    amp = jnp.abs(xf)[:, :, None, :]
    phase = jnp.angle(xf)[:, :, None, :]
    x_time = amp * jnp.cos(2.0 * math.pi * ff * t_arr + phase)
    return jnp.sum(x_time, axis=1)                              # (b, t, d)


def decoder_forward(packed, x, t, enc, n_head, label_emb=None):
    """Decoder.forward(x, t, enc) -> (x, mean, trend, season).  The attention
    mask is unused (as in the reference); dropouts are identity (inference)."""
    B, T, E = x.shape
    L = packed["wA"].shape[0]
    F = packed["w_t2"].shape[-1]
    assert E % n_head == 0

    emb_base = sinusoidal_emb(t, E)                             # (B, E)
    emb1 = jax.nn.silu(emb_base + label_emb) if label_emb is not None \
        else jax.nn.silu(emb_base)                              # AdaLayerNorm (ln1)
    emb2 = jax.nn.silu(emb_base)                                # AdaLayerNorm (ln1_1)
    emb1 = emb1.reshape(B, 1, E).astype(jnp.float32)
    emb2 = emb2.reshape(B, 1, E).astype(jnp.float32)

    x_out, side = _decoder_pallas(packed, x.astype(jnp.float32),
                                  enc.astype(jnp.float32), emb1, emb2, n_head)

    o_tr, o_mn, _ = _side_offsets(E, F)
    x2_all = side[:, :, :, 0:E]                                 # (B, L, T, E)
    trend = jnp.sum(side[:, :, :, o_tr:o_tr + F], axis=1)       # (B, T, F)
    mean = side[:, :, 0, o_mn:o_mn + F]                         # (B, L, F)
    season = fourier_layer(x2_all.reshape(B * L, T, E)).reshape(B, L, T, E).sum(axis=1)
    return x_out, mean, trend, season


# ----------------------------- parameter init & packing -----------------------------

def _init_block(key, T, E, F, cond_dim, hid):
    ks = iter(jax.random.split(key, 64))

    def nrm(shape, scale=0.02):
        return jax.random.normal(next(ks), shape, jnp.float32) * scale

    return {
        "w_ada1": nrm((E, 2 * E)), "b_ada1": nrm((1, 2 * E)),
        "w_qkv": nrm((E, 3 * E)), "b_qkv": nrm((1, 3 * E)),      # fused Q|K|V
        "w_o1": nrm((E, E)), "b_o1": nrm((1, E)),
        "w_ada2": nrm((E, 2 * E)), "b_ada2": nrm((1, 2 * E)),
        "w_q2": nrm((E, E)), "b_q2": nrm((1, E)),
        "w_kv2": nrm((cond_dim, 2 * E)), "b_kv2": nrm((1, 2 * E)),  # fused K|V
        "w_o2": nrm((E, E)), "b_o2": nrm((1, E)),
        "w_pA": nrm((T, T)), "b_pA": nrm((T, 1)),                # proj conv (k=1), chunk A
        "w_pB": nrm((T, T)), "b_pB": nrm((T, 1)),                # proj conv (k=1), chunk B
        "w_t1": nrm((3, 3, T)), "b_t1": nrm((3, 1)),             # trend conv1: (tap, out, in)
        "w_t2": nrm((3, E, F)), "b_t2": nrm((1, F)),             # trend conv2: (tap, in, out)
        "g_ln2": jnp.ones((1, E), jnp.float32),
        "b_ln2": jnp.zeros((1, E), jnp.float32),
        "w_m1": nrm((E, hid)), "b_m1": nrm((1, hid)),
        "w_m2": nrm((hid, E)), "b_m2": nrm((1, E)),
        "w_loc": nrm((5, E, E)), "b_loc": nrm((1, E)),           # local conv: (tap, in, out)
        "w_gate": nrm((E, E)), "b_gate": nrm((1, E)),
        "w_lin": nrm((E, F)), "b_lin": nrm((1, F)),
    }


def init_decoder_params(key, n_layer, T, E, F, cond_dim, mlp_hidden_times=4):
    hid = mlp_hidden_times * E
    keys = jax.random.split(key, n_layer)
    return {"blocks": [_init_block(k, T, E, F, cond_dim, hid) for k in keys]}


def pack_decoder_params(params, T, E, F):
    """Host-side folding + slab packing of natural per-block params."""
    blocks = params["blocks"]
    hid = blocks[0]["w_m1"].shape[1]
    a_segs, b_segs = _a_segments(E, F, hid), _b_segments(E, F, hid)
    a_layout, WA = _build_layout(a_segs)
    b_layout, WB = _build_layout(b_segs)
    m_off = _align(E, 128)
    WM = m_off + _align(F, 128)
    polyT = _poly_space_T(T)                                     # (T, 3)

    wA, bias, w_kv2, w_m2, w_loc, w_t2 = [], [], [], [], [], []
    wt1p, w_pB, misc, c1 = [], [], [], []
    for blk in blocks:
        a = jnp.zeros((E, WA), jnp.float32)
        for name, w in a_segs:
            off, _ = a_layout[name]
            a = a.at[:, off:off + w].set(blk[name])
        wA.append(a)

        bv = jnp.zeros((1, WB), jnp.float32)
        for name, w in b_segs:
            off, _ = b_layout[name]
            bv = bv.at[:, off:off + w].set(blk[name])
        bias.append(bv)

        w_kv2.append(blk["w_kv2"]); w_m2.append(blk["w_m2"])
        w_loc.append(blk["w_loc"]); w_t2.append(blk["w_t2"]); w_pB.append(blk["w_pB"])

        # fold the k=1 proj conv (chunk A) into the trend conv1 weights
        wt1p.append(jnp.stack([blk["w_t1"][dk] @ blk["w_pA"] for dk in range(3)], axis=0))

        # conv1 additive constant = b_t1 + conv1 applied to the proj-conv bias (b_pA)
        xb = jnp.concatenate([jnp.zeros((T, 1)), blk["b_pA"] @ jnp.ones((1, E)),
                              jnp.zeros((T, 1))], axis=1)        # (T, E+2)
        c = jnp.broadcast_to(blk["b_t1"], (3, E))
        for dk in range(3):
            c = c + blk["w_t1"][dk] @ xb[:, dk:dk + E]
        c1.append(c)

        mi = jnp.zeros((T, WM), jnp.float32)
        mi = mi.at[:, 0:E].set(blk["b_pB"] @ jnp.ones((1, E)))                # b_pB bcast
        mi = mi.at[:, m_off:m_off + F].set(polyT @ jnp.broadcast_to(blk["b_t2"], (3, F)))
        misc.append(mi)

    eshift = jnp.stack([jnp.eye(E, k=1, dtype=jnp.float32),      # lane shift right (tap 0)
                        jnp.eye(E, k=-1, dtype=jnp.float32)], axis=0)  # lane shift left (tap 2)
    pshift = jnp.stack([polyT @ jnp.eye(3, k=dk - 1, dtype=jnp.float32)
                        for dk in range(3)], axis=0)             # (3, T, 3)

    stack = lambda xs: jnp.stack(xs, axis=0).astype(jnp.float32)
    return {"wA": stack(wA), "bias": stack(bias), "w_kv2": stack(w_kv2),
            "w_m2": stack(w_m2), "w_loc": stack(w_loc), "w_t2": stack(w_t2),
            "wt1p": stack(wt1p), "w_pB": stack(w_pB), "misc": stack(misc),
            "c1": stack(c1), "eshift": eshift, "pshift": pshift}


# ----------------------------------- main -----------------------------------

if __name__ == "__main__":
    B, T, E, F_FEAT, H = 2, 16, 32, 23, 4    # batch, n_channel(seq), n_embd, n_feat, heads
    S, COND = 16, 64                         # encoder length / condition_dim
    N_LAYER = 2

    key = jax.random.PRNGKey(0)
    k_p, k_x, k_e = jax.random.split(key, 3)
    params = init_decoder_params(k_p, n_layer=N_LAYER, T=T, E=E, F=F_FEAT,
                                 cond_dim=COND, mlp_hidden_times=4)
    packed = pack_decoder_params(params, T=T, E=E, F=F_FEAT)

    x = jax.random.normal(k_x, (B, T, E), jnp.float32)       # (B, n_channel, n_embd)
    enc = jax.random.normal(k_e, (B, S, COND), jnp.float32)  # encoder output (condition)
    t = jnp.array([7.0, 123.0], jnp.float32)                 # diffusion timesteps, shape (B,)

    fwd = jax.jit(functools.partial(decoder_forward, n_head=H))
    x_out, mean, trend, season = fwd(packed, x, t, enc)
    jax.block_until_ready((x_out, mean, trend, season))

    assert x_out.shape == (B, T, E)
    assert mean.shape == (B, N_LAYER, F_FEAT)
    assert trend.shape == (B, T, F_FEAT)
    assert season.shape == (B, T, E)
    for arr in (x_out, mean, trend, season):
        assert bool(jnp.all(jnp.isfinite(arr)))
    print("KERNEL_OK")
</pallas_src>

<mosaic_0001>
module attributes {stable_mosaic.version = 11 : i64} {
  func.func @_decoder_kernel(%arg0: i32, %arg1: i32, %arg2: memref<1x16x32xf32, #tpu.memory_space<vmem>>, %arg3: memref<1x16x64xf32, #tpu.memory_space<vmem>>, %arg4: memref<1x1x32xf32, #tpu.memory_space<vmem>>, %arg5: memref<1x1x32xf32, #tpu.memory_space<vmem>>, %arg6: memref<1x32x1152xf32, #tpu.memory_space<vmem>>, %arg7: memref<1x1x1792xf32, #tpu.memory_space<vmem>>, %arg8: memref<1x64x64xf32, #tpu.memory_space<vmem>>, %arg9: memref<1x128x32xf32, #tpu.memory_space<vmem>>, %arg10: memref<1x5x32x32xf32, #tpu.memory_space<vmem>>, %arg11: memref<1x3x32x23xf32, #tpu.memory_space<vmem>>, %arg12: memref<1x3x3x16xf32, #tpu.memory_space<vmem>>, %arg13: memref<1x16x16xf32, #tpu.memory_space<vmem>>, %arg14: memref<1x16x256xf32, #tpu.memory_space<vmem>>, %arg15: memref<1x3x32xf32, #tpu.memory_space<vmem>>, %arg16: memref<2x32x32xf32, #tpu.memory_space<vmem>>, %arg17: memref<3x16x3xf32, #tpu.memory_space<vmem>>, %arg18: memref<1x16x32xf32, #tpu.memory_space<vmem>>, %arg19: memref<1x1x16x128xf32, #tpu.memory_space<vmem>>, %arg20: memref<20x32xf32, #tpu.memory_space<vmem>>) attributes {dimension_semantics = [#tpu.dimension_semantics<parallel>, #tpu.dimension_semantics<arbitrary>], iteration_bounds = array<i64: 2, 2>, scalar_prefetch = 0 : i64, scratch_operands = 1 : i64, tpu.core_type = #tpu.core_type<tc>, window_params = [{transform_indices = @transform_0, window_bounds = array<i64: 1, 16, 32>}, {transform_indices = @transform_1, window_bounds = array<i64: 1, 16, 64>}, {transform_indices = @transform_2, window_bounds = array<i64: 1, 1, 32>}, {transform_indices = @transform_3, window_bounds = array<i64: 1, 1, 32>}, {transform_indices = @transform_4, window_bounds = array<i64: 1, 32, 1152>}, {transform_indices = @transform_5, window_bounds = array<i64: 1, 1, 1792>}, {transform_indices = @transform_6, window_bounds = array<i64: 1, 64, 64>}, {transform_indices = @transform_7, window_bounds = array<i64: 1, 128, 32>}, {transform_indices = @transform_8, window_bounds = array<i64: 1, 5, 32, 32>}, {transform_indices = @transform_9, window_bounds = array<i64: 1, 3, 32, 23>}, {transform_indices = @transform_10, window_bounds = array<i64: 1, 3, 3, 16>}, {transform_indices = @transform_11, window_bounds = array<i64: 1, 16, 16>}, {transform_indices = @transform_12, window_bounds = array<i64: 1, 16, 256>}, {transform_indices = @transform_13, window_bounds = array<i64: 1, 3, 32>}, {pipeline_mode = #tpu.pipeline_mode<synchronous>, transform_indices = @transform_14, window_bounds = array<i64: 2, 32, 32>}, {pipeline_mode = #tpu.pipeline_mode<synchronous>, transform_indices = @transform_15, window_bounds = array<i64: 3, 16, 3>}, {transform_indices = @transform_16, window_bounds = array<i64: 1, 16, 32>}, {transform_indices = @transform_17, window_bounds = array<i64: 1, 1, 16, 128>}]} {
    %c0_i32 = arith.constant 0 : i32
    %0 = arith.cmpi eq, %arg1, %c0_i32 : i32
    %1 = arith.extui %0 : i1 to i32
    %c0_i32_0 = arith.constant 0 : i32
    %2 = arith.cmpi ne, %1, %c0_i32_0 : i32
    scf.if %2 {
      %c0_272 = arith.constant 0 : index
      %c0_273 = arith.constant 0 : index
      %c0_274 = arith.constant 0 : index
      %458 = vector.load %arg2[%c0_272, %c0_273, %c0_274] : memref<1x16x32xf32, #tpu.memory_space<vmem>>, vector<1x16x32xf32>
      %c0_275 = arith.constant 0 : index
      %c0_276 = arith.constant 0 : index
      %c0_277 = arith.constant 0 : index
      %459 = vector.load %arg18[%c0_275, %c0_276, %c0_277] : memref<1x16x32xf32, #tpu.memory_space<vmem>>, vector<1x16x32xf32>
      tpu.vector_store %arg18[%c0_275, %c0_276, %c0_277], %458 {strides = array<i32>} : memref<1x16x32xf32, #tpu.memory_space<vmem>>, vector<1x16x32xf32>,
    } else {
    }
    %c0 = arith.constant 0 : index
    %c0_1 = arith.constant 0 : index
    %c0_2 = arith.constant 0 : index
    %3 = vector.load %arg18[%c0, %c0_1, %c0_2] : memref<1x16x32xf32, #tpu.memory_space<vmem>>, vector<1x16x32xf32>
    %4 = vector.shape_cast %3 : vector<1x16x32xf32> to vector<16x32xf32>
    %c0_3 = arith.constant 0 : index
    %c0_4 = arith.constant 0 : index
    %c0_5 = arith.constant 0 : index
    %5 = vector.load %arg3[%c0_3, %c0_4, %c0_5] : memref<1x16x64xf32, #tpu.memory_space<vmem>>, vector<1x16x64xf32>
    %6 = vector.shape_cast %5 : vector<1x16x64xf32> to vector<16x64xf32>
    %c0_6 = arith.constant 0 : index
    %c0_7 = arith.constant 0 : index
    %c0_8 = arith.constant 0 : index
    %7 = vector.load %arg4[%c0_6, %c0_7, %c0_8] : memref<1x1x32xf32, #tpu.memory_space<vmem>>, vector<1x1x32xf32>
    %8 = vector.shape_cast %7 : vector<1x1x32xf32> to vector<1x32xf32>
    %c0_9 = arith.constant 0 : index
    %c0_10 = arith.constant 0 : index
    %c0_11 = arith.constant 0 : index
    %9 = vector.load %arg5[%c0_9, %c0_10, %c0_11] : memref<1x1x32xf32, #tpu.memory_space<vmem>>, vector<1x1x32xf32>
    %10 = vector.shape_cast %9 : vector<1x1x32xf32> to vector<1x32xf32>
    %c0_12 = arith.constant 0 : index
    %c0_13 = arith.constant 0 : index
    %c0_14 = arith.constant 0 : index
    %11 = vector.load %arg6[%c0_12, %c0_13, %c0_14] : memref<1x32x1152xf32, #tpu.memory_space<vmem>>, vector<1x32x64xf32>
    %12 = vector.shape_cast %11 : vector<1x32x64xf32> to vector<32x64xf32>
    %c0_15 = arith.constant 0 : index
    %c0_16 = arith.constant 0 : index
    %c0_17 = arith.constant 0 : index
    %13 = vector.load %arg7[%c0_15, %c0_16, %c0_17] : memref<1x1x1792xf32, #tpu.memory_space<vmem>>, vector<1x1x64xf32>
    %14 = vector.shape_cast %13 : vector<1x1x64xf32> to vector<1x64xf32>
    %cst = arith.constant dense<0.000000e+00> : vector<1x64xf32>
    %15 = tpu.matmul %8, %12, %cst {dimension_numbers = #tpu.dot_dimension_numbers<[1], [0], [0], [1], [0, 0, 1, 1], [], []>} : vector<1x32xf32>, vector<32x64xf32>, vector<1x64xf32> -> vector<1x64xf32>
    %16 = arith.addf %15, %14 : vector<1x64xf32>
    %cst_18 = arith.constant dense<0.000000e+00> : vector<16xf32>
    %17 = vector.multi_reduction <add>, %4, %cst_18 [1] : vector<16x32xf32> to vector<16xf32>
    %18 = vector.shape_cast %17 : vector<16xf32> to vector<16x1xf32>
    %cst_19 = arith.constant 3.200000e+01 : f32
    %19 = vector.broadcast %cst_19 : f32 to vector<16x1xf32>
    %20 = arith.divf %18, %19 : vector<16x1xf32>
    %21 = vector.broadcast %20 : vector<16x1xf32> to vector<16x32xf32>
    %22 = arith.subf %4, %21 : vector<16x32xf32>
    %23 = arith.mulf %22, %22 : vector<16x32xf32>
    %cst_20 = arith.constant dense<0.000000e+00> : vector<16xf32>
    %24 = vector.multi_reduction <add>, %23, %cst_20 [1] : vector<16x32xf32> to vector<16xf32>
    %25 = vector.shape_cast %24 : vector<16xf32> to vector<16x1xf32>
    %cst_21 = arith.constant 3.200000e+01 : f32
    %26 = vector.broadcast %cst_21 : f32 to vector<16x1xf32>
    %27 = arith.divf %25, %26 : vector<16x1xf32>
    %28 = vector.broadcast %20 : vector<16x1xf32> to vector<16x32xf32>
    %29 = arith.subf %4, %28 : vector<16x32xf32>
    %cst_22 = arith.constant 9.99999974E-6 : f32
    %30 = vector.broadcast %cst_22 : f32 to vector<16x1xf32>
    %31 = arith.addf %27, %30 : vector<16x1xf32>
    %32 = math.rsqrt %31 : vector<16x1xf32>
    %33 = vector.broadcast %32 : vector<16x1xf32> to vector<16x32xf32>
    %34 = arith.mulf %29, %33 : vector<16x32xf32>
    %35 = vector.extract_strided_slice %16 {offsets = [0, 0], sizes = [1, 32], strides = [1, 1]} : vector<1x64xf32> to vector<1x32xf32>
    %cst_23 = arith.constant 1.000000e+00 : f32
    %36 = vector.broadcast %cst_23 : f32 to vector<1x32xf32>
    %37 = arith.addf %36, %35 : vector<1x32xf32>
    %38 = vector.broadcast %37 : vector<1x32xf32> to vector<16x32xf32>
    %39 = arith.mulf %34, %38 : vector<16x32xf32>
    %40 = vector.extract_strided_slice %16 {offsets = [0, 32], sizes = [1, 32], strides = [1, 1]} : vector<1x64xf32> to vector<1x32xf32>
    %41 = vector.broadcast %40 : vector<1x32xf32> to vector<16x32xf32>
    %42 = arith.addf %39, %41 : vector<16x32xf32>
    %c0_24 = arith.constant 0 : index
    %c0_25 = arith.constant 0 : index
    %c128 = arith.constant 128 : index
    %43 = vector.load %arg6[%c0_24, %c0_25, %c128] : memref<1x32x1152xf32, #tpu.memory_space<vmem>>, vector<1x32x96xf32>
    %44 = vector.shape_cast %43 : vector<1x32x96xf32> to vector<32x96xf32>
    %cst_26 = arith.constant dense<0.000000e+00> : vector<16x96xf32>
    %45 = tpu.matmul %42, %44, %cst_26 {dimension_numbers = #tpu.dot_dimension_numbers<[1], [0], [0], [1], [0, 0, 1, 1], [], []>} : vector<16x32xf32>, vector<32x96xf32>, vector<16x96xf32> -> vector<16x96xf32>
    %c0_27 = arith.constant 0 : index
    %c0_28 = arith.constant 0 : index
    %c128_29 = arith.constant 128 : index
    %46 = vector.load %arg7[%c0_27, %c0_28, %c128_29] : memref<1x1x1792xf32, #tpu.memory_space<vmem>>, vector<1x1x96xf32>
    %47 = vector.shape_cast %46 : vector<1x1x96xf32> to vector<1x96xf32>
    %48 = vector.broadcast %47 : vector<1x96xf32> to vector<16x96xf32>
    %49 = arith.addf %45, %48 : vector<16x96xf32>
    %50 = vector.extract_strided_slice %49 {offsets = [0, 0], sizes = [16, 32], strides = [1, 1]} : vector<16x96xf32> to vector<16x32xf32>
    %51 = vector.extract_strided_slice %49 {offsets = [0, 32], sizes = [16, 32], strides = [1, 1]} : vector<16x96xf32> to vector<16x32xf32>
    %52 = vector.extract_strided_slice %49 {offsets = [0, 64], sizes = [16, 32], strides = [1, 1]} : vector<16x96xf32> to vector<16x32xf32>
    %c0_30 = arith.constant 0 : index
    %c0_31 = arith.constant 0 : index
    %c256 = arith.constant 256 : index
    %53 = vector.load %arg6[%c0_30, %c0_31, %c256] : memref<1x32x1152xf32, #tpu.memory_space<vmem>>, vector<1x32x32xf32>
    %54 = vector.shape_cast %53 : vector<1x32x32xf32> to vector<32x32xf32>
    %c0_32 = arith.constant 0 : index
    %c0_33 = arith.constant 0 : index
    %c256_34 = arith.constant 256 : index
    %55 = vector.load %arg7[%c0_32, %c0_33, %c256_34] : memref<1x1x1792xf32, #tpu.memory_space<vmem>>, vector<1x1x32xf32>
    %56 = vector.shape_cast %55 : vector<1x1x32xf32> to vector<1x32xf32>
    %cst_35 = arith.constant 0.000000e+00 : f32
    %57 = vector.broadcast %cst_35 : f32 to vector<16x32xf32>
    %58 = vector.extract_strided_slice %50 {offsets = [0, 0], sizes = [16, 8], strides = [1, 1]} : vector<16x32xf32> to vector<16x8xf32>
    %59 = vector.extract_strided_slice %51 {offsets = [0, 0], sizes = [16, 8], strides = [1, 1]} : vector<16x32xf32> to vector<16x8xf32>
    %cst_36 = arith.constant dense<0.000000e+00> : vector<16x16xf32>
    %60 = tpu.matmul %58, %59, %cst_36 {dimension_numbers = #tpu.dot_dimension_numbers<[1], [1], [0], [0], [0, 0, 1, 0], [], []>} : vector<16x8xf32>, vector<16x8xf32>, vector<16x16xf32> -> vector<16x16xf32>
    %cst_37 = arith.constant 0.353553385 : f32
    %61 = vector.broadcast %cst_37 : f32 to vector<16x16xf32>
    %62 = arith.mulf %60, %61 : vector<16x16xf32>
    %cst_38 = arith.constant dense<0xFF800000> : vector<16xf32>
    %63 = vector.multi_reduction <maximumf>, %62, %cst_38 [1] : vector<16x16xf32> to vector<16xf32>
    %64 = vector.shape_cast %63 : vector<16xf32> to vector<16x1xf32>
    %65 = vector.broadcast %64 : vector<16x1xf32> to vector<16x16xf32>
    %66 = arith.subf %62, %65 : vector<16x16xf32>
    %67 = math.exp %66 : vector<16x16xf32>
    %cst_39 = arith.constant dense<0.000000e+00> : vector<16xf32>
    %68 = vector.multi_reduction <add>, %67, %cst_39 [1] : vector<16x16xf32> to vector<16xf32>
    %69 = vector.shape_cast %68 : vector<16xf32> to vector<16x1xf32>
    %70 = vector.broadcast %69 : vector<16x1xf32> to vector<16x16xf32>
    %71 = arith.divf %67, %70 : vector<16x16xf32>
    %72 = vector.extract_strided_slice %52 {offsets = [0, 0], sizes = [16, 8], strides = [1, 1]} : vector<16x32xf32> to vector<16x8xf32>
    %cst_40 = arith.constant dense<0.000000e+00> : vector<16x8xf32>
    %73 = tpu.matmul %71, %72, %cst_40 {dimension_numbers = #tpu.dot_dimension_numbers<[1], [0], [0], [1], [0, 0, 1, 1], [], []>} : vector<16x16xf32>, vector<16x8xf32>, vector<16x8xf32> -> vector<16x8xf32>
    %74 = vector.extract_strided_slice %54 {offsets = [0, 0], sizes = [8, 32], strides = [1, 1]} : vector<32x32xf32> to vector<8x32xf32>
    %cst_41 = arith.constant dense<0.000000e+00> : vector<16x32xf32>
    %75 = tpu.matmul %73, %74, %cst_41 {dimension_numbers = #tpu.dot_dimension_numbers<[1], [0], [0], [1], [0, 0, 1, 1], [], []>} : vector<16x8xf32>, vector<8x32xf32>, vector<16x32xf32> -> vector<16x32xf32>
    %76 = arith.addf %57, %75 : vector<16x32xf32>
    %77 = vector.extract_strided_slice %50 {offsets = [0, 8], sizes = [16, 8], strides = [1, 1]} : vector<16x32xf32> to vector<16x8xf32>
    %78 = vector.extract_strided_slice %51 {offsets = [0, 8], sizes = [16, 8], strides = [1, 1]} : vector<16x32xf32> to vector<16x8xf32>
    %cst_42 = arith.constant dense<0.000000e+00> : vector<16x16xf32>
    %79 = tpu.matmul %77, %78, %cst_42 {dimension_numbers = #tpu.dot_dimension_numbers<[1], [1], [0], [0], [0, 0, 1, 0], [], []>} : vector<16x8xf32>, vector<16x8xf32>, vector<16x16xf32> -> vector<16x16xf32>
    %cst_43 = arith.constant 0.353553385 : f32
    %80 = vector.broadcast %cst_43 : f32 to vector<16x16xf32>
    %81 = arith.mulf %79, %80 : vector<16x16xf32>
    %cst_44 = arith.constant dense<0xFF800000> : vector<16xf32>
    %82 = vector.multi_reduction <maximumf>, %81, %cst_44 [1] : vector<16x16xf32> to vector<16xf32>
    %83 = vector.shape_cast %82 : vector<16xf32> to vector<16x1xf32>
    %84 = vector.broadcast %83 : vector<16x1xf32> to vector<16x16xf32>
    %85 = arith.subf %81, %84 : vector<16x16xf32>
    %86 = math.exp %85 : vector<16x16xf32>
    %cst_45 = arith.constant dense<0.000000e+00> : vector<16xf32>
    %87 = vector.multi_reduction <add>, %86, %cst_45 [1] : vector<16x16xf32> to vector<16xf32>
    %88 = vector.shape_cast %87 : vector<16xf32> to vector<16x1xf32>
    %89 = vector.broadcast %88 : vector<16x1xf32> to vector<16x16xf32>
    %90 = arith.divf %86, %89 : vector<16x16xf32>
    %91 = vector.extract_strided_slice %52 {offsets = [0, 8], sizes = [16, 8], strides = [1, 1]} : vector<16x32xf32> to vector<16x8xf32>
    %cst_46 = arith.constant dense<0.000000e+00> : vector<16x8xf32>
    %92 = tpu.matmul %90, %91, %cst_46 {dimension_numbers = #tpu.dot_dimension_numbers<[1], [0], [0], [1], [0, 0, 1, 1], [], []>} : vector<16x16xf32>, vector<16x8xf32>, vector<16x8xf32> -> vector<16x8xf32>
    %93 = vector.extract_strided_slice %54 {offsets = [8, 0], sizes = [8, 32], strides = [1, 1]} : vector<32x32xf32> to vector<8x32xf32>
    %cst_47 = arith.constant dense<0.000000e+00> : vector<16x32xf32>
    %94 = tpu.matmul %92, %93, %cst_47 {dimension_numbers = #tpu.dot_dimension_numbers<[1], [0], [0], [1], [0, 0, 1, 1], [], []>} : vector<16x8xf32>, vector<8x32xf32>, vector<16x32xf32> -> vector<16x32xf32>
    %95 = arith.addf %76, %94 : vector<16x32xf32>
    %96 = vector.extract_strided_slice %50 {offsets = [0, 16], sizes = [16, 8], strides = [1, 1]} : vector<16x32xf32> to vector<16x8xf32>
    %97 = vector.extract_strided_slice %51 {offsets = [0, 16], sizes = [16, 8], strides = [1, 1]} : vector<16x32xf32> to vector<16x8xf32>
    %cst_48 = arith.constant dense<0.000000e+00> : vector<16x16xf32>
    %98 = tpu.matmul %96, %97, %cst_48 {dimension_numbers = #tpu.dot_dimension_numbers<[1], [1], [0], [0], [0, 0, 1, 0], [], []>} : vector<16x8xf32>, vector<16x8xf32>, vector<16x16xf32> -> vector<16x16xf32>
    %cst_49 = arith.constant 0.353553385 : f32
    %99 = vector.broadcast %cst_49 : f32 to vector<16x16xf32>
    %100 = arith.mulf %98, %99 : vector<16x16xf32>
    %cst_50 = arith.constant dense<0xFF800000> : vector<16xf32>
    %101 = vector.multi_reduction <maximumf>, %100, %cst_50 [1] : vector<16x16xf32> to vector<16xf32>
    %102 = vector.shape_cast %101 : vector<16xf32> to vector<16x1xf32>
    %103 = vector.broadcast %102 : vector<16x1xf32> to vector<16x16xf32>
    %104 = arith.subf %100, %103 : vector<16x16xf32>
    %105 = math.exp %104 : vector<16x16xf32>
    %cst_51 = arith.constant dense<0.000000e+00> : vector<16xf32>
    %106 = vector.multi_reduction <add>, %105, %cst_51 [1] : vector<16x16xf32> to vector<16xf32>
    %107 = vector.shape_cast %106 : vector<16xf32> to vector<16x1xf32>
    %108 = vector.broadcast %107 : vector<16x1xf32> to vector<16x16xf32>
    %109 = arith.divf %105, %108 : vector<16x16xf32>
    %110 = vector.extract_strided_slice %52 {offsets = [0, 16], sizes = [16, 8], strides = [1, 1]} : vector<16x32xf32> to vector<16x8xf32>
    %cst_52 = arith.constant dense<0.000000e+00> : vector<16x8xf32>
    %111 = tpu.matmul %109, %110, %cst_52 {dimension_numbers = #tpu.dot_dimension_numbers<[1], [0], [0], [1], [0, 0, 1, 1], [], []>} : vector<16x16xf32>, vector<16x8xf32>, vector<16x8xf32> -> vector<16x8xf32>
    %112 = vector.extract_strided_slice %54 {offsets = [16, 0], sizes = [8, 32], strides = [1, 1]} : vector<32x32xf32> to vector<8x32xf32>
    %cst_53 = arith.constant dense<0.000000e+00> : vector<16x32xf32>
    %113 = tpu.matmul %111, %112, %cst_53 {dimension_numbers = #tpu.dot_dimension_numbers<[1], [0], [0], [1], [0, 0, 1, 1], [], []>} : vector<16x8xf32>, vector<8x32xf32>, vector<16x32xf32> -> vector<16x32xf32>
    %114 = arith.addf %95, %113 : vector<16x32xf32>
    %115 = vector.extract_strided_slice %50 {offsets = [0, 24], sizes = [16, 8], strides = [1, 1]} : vector<16x32xf32> to vector<16x8xf32>
    %116 = vector.extract_strided_slice %51 {offsets = [0, 24], sizes = [16, 8], strides = [1, 1]} : vector<16x32xf32> to vector<16x8xf32>
    %cst_54 = arith.constant dense<0.000000e+00> : vector<16x16xf32>
    %117 = tpu.matmul %115, %116, %cst_54 {dimension_numbers = #tpu.dot_dimension_numbers<[1], [1], [0], [0], [0, 0, 1, 0], [], []>} : vector<16x8xf32>, vector<16x8xf32>, vector<16x16xf32> -> vector<16x16xf32>
    %cst_55 = arith.constant 0.353553385 : f32
    %118 = vector.broadcast %cst_55 : f32 to vector<16x16xf32>
    %119 = arith.mulf %117, %118 : vector<16x16xf32>
    %cst_56 = arith.constant dense<0xFF800000> : vector<16xf32>
    %120 = vector.multi_reduction <maximumf>, %119, %cst_56 [1] : vector<16x16xf32> to vector<16xf32>
    %121 = vector.shape_cast %120 : vector<16xf32> to vector<16x1xf32>
    %122 = vector.broadcast %121 : vector<16x1xf32> to vector<16x16xf32>
    %123 = arith.subf %119, %122 : vector<16x16xf32>
    %124 = math.exp %123 : vector<16x16xf32>
    %cst_57 = arith.constant dense<0.000000e+00> : vector<16xf32>
    %125 = vector.multi_reduction <add>, %124, %cst_57 [1] : vector<16x16xf32> to vector<16xf32>
    %126 = vector.shape_cast %125 : vector<16xf32> to vector<16x1xf32>
    %127 = vector.broadcast %126 : vector<16x1xf32> to vector<16x16xf32>
    %128 = arith.divf %124, %127 : vector<16x16xf32>
    %129 = vector.extract_strided_slice %52 {offsets = [0, 24], sizes = [16, 8], strides = [1, 1]} : vector<16x32xf32> to vector<16x8xf32>
    %cst_58 = arith.constant dense<0.000000e+00> : vector<16x8xf32>
    %130 = tpu.matmul %128, %129, %cst_58 {dimension_numbers = #tpu.dot_dimension_numbers<[1], [0], [0], [1], [0, 0, 1, 1], [], []>} : vector<16x16xf32>, vector<16x8xf32>, vector<16x8xf32> -> vector<16x8xf32>
    %131 = vector.extract_strided_slice %54 {offsets = [24, 0], sizes = [8, 32], strides = [1, 1]} : vector<32x32xf32> to vector<8x32xf32>
    %cst_59 = arith.constant dense<0.000000e+00> : vector<16x32xf32>
    %132 = tpu.matmul %130, %131, %cst_59 {dimension_numbers = #tpu.dot_dimension_numbers<[1], [0], [0], [1], [0, 0, 1, 1], [], []>} : vector<16x8xf32>, vector<8x32xf32>, vector<16x32xf32> -> vector<16x32xf32>
    %133 = arith.addf %114, %132 : vector<16x32xf32>
    %134 = vector.broadcast %56 : vector<1x32xf32> to vector<16x32xf32>
    %135 = arith.addf %133, %134 : vector<16x32xf32>
    %136 = arith.addf %4, %135 : vector<16x32xf32>
    %c0_60 = arith.constant 0 : index
    %c0_61 = arith.constant 0 : index
    %c384 = arith.constant 384 : index
    %137 = vector.load %arg6[%c0_60, %c0_61, %c384] : memref<1x32x1152xf32, #tpu.memory_space<vmem>>, vector<1x32x64xf32>
    %138 = vector.shape_cast %137 : vector<1x32x64xf32> to vector<32x64xf32>
    %c0_62 = arith.constant 0 : index
    %c0_63 = arith.constant 0 : index
    %c384_64 = arith.constant 384 : index
    %139 = vector.load %arg7[%c0_62, %c0_63, %c384_64] : memref<1x1x1792xf32, #tpu.memory_space<vmem>>, vector<1x1x64xf32>
    %140 = vector.shape_cast %139 : vector<1x1x64xf32> to vector<1x64xf32>
    %cst_65 = arith.constant dense<0.000000e+00> : vector<1x64xf32>
    %141 = tpu.matmul %10, %138, %cst_65 {dimension_numbers = #tpu.dot_dimension_numbers<[1], [0], [0], [1], [0, 0, 1, 1], [], []>} : vector<1x32xf32>, vector<32x64xf32>, vector<1x64xf32> -> vector<1x64xf32>
    %142 = arith.addf %141, %140 : vector<1x64xf32>
    %cst_66 = arith.constant dense<0.000000e+00> : vector<16xf32>
    %143 = vector.multi_reduction <add>, %136, %cst_66 [1] : vector<16x32xf32> to vector<16xf32>
    %144 = vector.shape_cast %143 : vector<16xf32> to vector<16x1xf32>
    %cst_67 = arith.constant 3.200000e+01 : f32
    %145 = vector.broadcast %cst_67 : f32 to vector<16x1xf32>
    %146 = arith.divf %144, %145 : vector<16x1xf32>
    %147 = vector.broadcast %146 : vector<16x1xf32> to vector<16x32xf32>
    %148 = arith.subf %136, %147 : vector<16x32xf32>
    %149 = arith.mulf %148, %148 : vector<16x32xf32>
    %cst_68 = arith.constant dense<0.000000e+00> : vector<16xf32>
    %150 = vector.multi_reduction <add>, %149, %cst_68 [1] : vector<16x32xf32> to vector<16xf32>
    %151 = vector.shape_cast %150 : vector<16xf32> to vector<16x1xf32>
    %cst_69 = arith.constant 3.200000e+01 : f32
    %152 = vector.broadcast %cst_69 : f32 to vector<16x1xf32>
    %153 = arith.divf %151, %152 : vector<16x1xf32>
    %154 = vector.broadcast %146 : vector<16x1xf32> to vector<16x32xf32>
    %155 = arith.subf %136, %154 : vector<16x32xf32>
    %cst_70 = arith.constant 9.99999974E-6 : f32
    %156 = vector.broadcast %cst_70 : f32 to vector<16x1xf32>
    %157 = arith.addf %153, %156 : vector<16x1xf32>
    %158 = math.rsqrt %157 : vector<16x1xf32>
    %159 = vector.broadcast %158 : vector<16x1xf32> to vector<16x32xf32>
    %160 = arith.mulf %155, %159 : vector<16x32xf32>
    %161 = vector.extract_strided_slice %142 {offsets = [0, 0], sizes = [1, 32], strides = [1, 1]} : vector<1x64xf32> to vector<1x32xf32>
    %cst_71 = arith.constant 1.000000e+00 : f32
    %162 = vector.broadcast %cst_71 : f32 to vector<1x32xf32>
    %163 = arith.addf %162, %161 : vector<1x32xf32>
    %164 = vector.broadcast %163 : vector<1x32xf32> to vector<16x32xf32>
    %165 = arith.mulf %160, %164 : vector<16x32xf32>
    %166 = vector.extract_strided_slice %142 {offsets = [0, 32], sizes = [1, 32], strides = [1, 1]} : vector<1x64xf32> to vector<1x32xf32>
    %167 = vector.broadcast %166 : vector<1x32xf32> to vector<16x32xf32>
    %168 = arith.addf %165, %167 : vector<16x32xf32>
    %c0_72 = arith.constant 0 : index
    %c0_73 = arith.constant 0 : index
    %c512 = arith.constant 512 : index
    %169 = vector.load %arg6[%c0_72, %c0_73, %c512] : memref<1x32x1152xf32, #tpu.memory_space<vmem>>, vector<1x32x32xf32>
    %170 = vector.shape_cast %169 : vector<1x32x32xf32> to vector<32x32xf32>
    %cst_74 = arith.constant dense<0.000000e+00> : vector<16x32xf32>
    %171 = tpu.matmul %168, %170, %cst_74 {dimension_numbers = #tpu.dot_dimension_numbers<[1], [0], [0], [1], [0, 0, 1, 1], [], []>} : vector<16x32xf32>, vector<32x32xf32>, vector<16x32xf32> -> vector<16x32xf32>
    %c0_75 = arith.constant 0 : index
    %c0_76 = arith.constant 0 : index
    %c512_77 = arith.constant 512 : index
    %172 = vector.load %arg7[%c0_75, %c0_76, %c512_77] : memref<1x1x1792xf32, #tpu.memory_space<vmem>>, vector<1x1x32xf32>
    %173 = vector.shape_cast %172 : vector<1x1x32xf32> to vector<1x32xf32>
    %174 = vector.broadcast %173 : vector<1x32xf32> to vector<16x32xf32>
    %175 = arith.addf %171, %174 : vector<16x32xf32>
    %c0_78 = arith.constant 0 : index
    %c0_79 = arith.constant 0 : index
    %c0_80 = arith.constant 0 : index
    %176 = vector.load %arg8[%c0_78, %c0_79, %c0_80] : memref<1x64x64xf32, #tpu.memory_space<vmem>>, vector<1x64x64xf32>
    %177 = vector.shape_cast %176 : vector<1x64x64xf32> to vector<64x64xf32>
    %cst_81 = arith.constant dense<0.000000e+00> : vector<16x64xf32>
    %178 = tpu.matmul %6, %177, %cst_81 {dimension_numbers = #tpu.dot_dimension_numbers<[1], [0], [0], [1], [0, 0, 1, 1], [], []>} : vector<16x64xf32>, vector<64x64xf32>, vector<16x64xf32> -> vector<16x64xf32>
    %c0_82 = arith.constant 0 : index
    %c0_83 = arith.constant 0 : index
    %c640 = arith.constant 640 : index
    %179 = vector.load %arg7[%c0_82, %c0_83, %c640] : memref<1x1x1792xf32, #tpu.memory_space<vmem>>, vector<1x1x64xf32>
    %180 = vector.shape_cast %179 : vector<1x1x64xf32> to vector<1x64xf32>
    %181 = vector.broadcast %180 : vector<1x64xf32> to vector<16x64xf32>
    %182 = arith.addf %178, %181 : vector<16x64xf32>
    %183 = vector.extract_strided_slice %182 {offsets = [0, 0], sizes = [16, 32], strides = [1, 1]} : vector<16x64xf32> to vector<16x32xf32>
    %184 = vector.extract_strided_slice %182 {offsets = [0, 32], sizes = [16, 32], strides = [1, 1]} : vector<16x64xf32> to vector<16x32xf32>
    %c0_84 = arith.constant 0 : index
    %c0_85 = arith.constant 0 : index
    %c640_86 = arith.constant 640 : index
    %185 = vector.load %arg6[%c0_84, %c0_85, %c640_86] : memref<1x32x1152xf32, #tpu.memory_space<vmem>>, vector<1x32x32xf32>
    %186 = vector.shape_cast %185 : vector<1x32x32xf32> to vector<32x32xf32>
    %c0_87 = arith.constant 0 : index
    %c0_88 = arith.constant 0 : index
    %c768 = arith.constant 768 : index
    %187 = vector.load %arg7[%c0_87, %c0_88, %c768] : memref<1x1x1792xf32, #tpu.memory_space<vmem>>, vector<1x1x32xf32>
    %188 = vector.shape_cast %187 : vector<1x1x32xf32> to vector<1x32xf32>
    %cst_89 = arith.constant 0.000000e+00 : f32
    %189 = vector.broadcast %cst_89 : f32 to vector<16x32xf32>
    %190 = vector.extract_strided_slice %175 {offsets = [0, 0], sizes = [16, 8], strides = [1, 1]} : vector<16x32xf32> to vector<16x8xf32>
    %191 = vector.extract_strided_slice %183 {offsets = [0, 0], sizes = [16, 8], strides = [1, 1]} : vector<16x32xf32> to vector<16x8xf32>
    %cst_90 = arith.constant dense<0.000000e+00> : vector<16x16xf32>
    %192 = tpu.matmul %190, %191, %cst_90 {dimension_numbers = #tpu.dot_dimension_numbers<[1], [1], [0], [0], [0, 0, 1, 0], [], []>} : vector<16x8xf32>, vector<16x8xf32>, vector<16x16xf32> -> vector<16x16xf32>
    %cst_91 = arith.constant 0.353553385 : f32
    %193 = vector.broadcast %cst_91 : f32 to vector<16x16xf32>
    %194 = arith.mulf %192, %193 : vector<16x16xf32>
    %cst_92 = arith.constant dense<0xFF800000> : vector<16xf32>
    %195 = vector.multi_reduction <maximumf>, %194, %cst_92 [1] : vector<16x16xf32> to vector<16xf32>
    %196 = vector.shape_cast %195 : vector<16xf32> to vector<16x1xf32>
    %197 = vector.broadcast %196 : vector<16x1xf32> to vector<16x16xf32>
    %198 = arith.subf %194, %197 : vector<16x16xf32>
    %199 = math.exp %198 : vector<16x16xf32>
    %cst_93 = arith.constant dense<0.000000e+00> : vector<16xf32>
    %200 = vector.multi_reduction <add>, %199, %cst_93 [1] : vector<16x16xf32> to vector<16xf32>
    %201 = vector.shape_cast %200 : vector<16xf32> to vector<16x1xf32>
    %202 = vector.broadcast %201 : vector<16x1xf32> to vector<16x16xf32>
    %203 = arith.divf %199, %202 : vector<16x16xf32>
    %204 = vector.extract_strided_slice %184 {offsets = [0, 0], sizes = [16, 8], strides = [1, 1]} : vector<16x32xf32> to vector<16x8xf32>
    %cst_94 = arith.constant dense<0.000000e+00> : vector<16x8xf32>
    %205 = tpu.matmul %203, %204, %cst_94 {dimension_numbers = #tpu.dot_dimension_numbers<[1], [0], [0], [1], [0, 0, 1, 1], [], []>} : vector<16x16xf32>, vector<16x8xf32>, vector<16x8xf32> -> vector<16x8xf32>
    %206 = vector.extract_strided_slice %186 {offsets = [0, 0], sizes = [8, 32], strides = [1, 1]} : vector<32x32xf32> to vector<8x32xf32>
    %cst_95 = arith.constant dense<0.000000e+00> : vector<16x32xf32>
    %207 = tpu.matmul %205, %206, %cst_95 {dimension_numbers = #tpu.dot_dimension_numbers<[1], [0], [0], [1], [0, 0, 1, 1], [], []>} : vector<16x8xf32>, vector<8x32xf32>, vector<16x32xf32> -> vector<16x32xf32>
    %208 = arith.addf %189, %207 : vector<16x32xf32>
    %209 = vector.extract_strided_slice %175 {offsets = [0, 8], sizes = [16, 8], strides = [1, 1]} : vector<16x32xf32> to vector<16x8xf32>
    %210 = vector.extract_strided_slice %183 {offsets = [0, 8], sizes = [16, 8], strides = [1, 1]} : vector<16x32xf32> to vector<16x8xf32>
    %cst_96 = arith.constant dense<0.000000e+00> : vector<16x16xf32>
    %211 = tpu.matmul %209, %210, %cst_96 {dimension_numbers = #tpu.dot_dimension_numbers<[1], [1], [0], [0], [0, 0, 1, 0], [], []>} : vector<16x8xf32>, vector<16x8xf32>, vector<16x16xf32> -> vector<16x16xf32>
    %cst_97 = arith.constant 0.353553385 : f32
    %212 = vector.broadcast %cst_97 : f32 to vector<16x16xf32>
    %213 = arith.mulf %211, %212 : vector<16x16xf32>
    %cst_98 = arith.constant dense<0xFF800000> : vector<16xf32>
    %214 = vector.multi_reduction <maximumf>, %213, %cst_98 [1] : vector<16x16xf32> to vector<16xf32>
    %215 = vector.shape_cast %214 : vector<16xf32> to vector<16x1xf32>
    %216 = vector.broadcast %215 : vector<16x1xf32> to vector<16x16xf32>
    %217 = arith.subf %213, %216 : vector<16x16xf32>
    %218 = math.exp %217 : vector<16x16xf32>
    %cst_99 = arith.constant dense<0.000000e+00> : vector<16xf32>
    %219 = vector.multi_reduction <add>, %218, %cst_99 [1] : vector<16x16xf32> to vector<16xf32>
    %220 = vector.shape_cast %219 : vector<16xf32> to vector<16x1xf32>
    %221 = vector.broadcast %220 : vector<16x1xf32> to vector<16x16xf32>
    %222 = arith.divf %218, %221 : vector<16x16xf32>
    %223 = vector.extract_strided_slice %184 {offsets = [0, 8], sizes = [16, 8], strides = [1, 1]} : vector<16x32xf32> to vector<16x8xf32>
    %cst_100 = arith.constant dense<0.000000e+00> : vector<16x8xf32>
    %224 = tpu.matmul %222, %223, %cst_100 {dimension_numbers = #tpu.dot_dimension_numbers<[1], [0], [0], [1], [0, 0, 1, 1], [], []>} : vector<16x16xf32>, vector<16x8xf32>, vector<16x8xf32> -> vector<16x8xf32>
    %225 = vector.extract_strided_slice %186 {offsets = [8, 0], sizes = [8, 32], strides = [1, 1]} : vector<32x32xf32> to vector<8x32xf32>
    %cst_101 = arith.constant dense<0.000000e+00> : vector<16x32xf32>
    %226 = tpu.matmul %224, %225, %cst_101 {dimension_numbers = #tpu.dot_dimension_numbers<[1], [0], [0], [1], [0, 0, 1, 1], [], []>} : vector<16x8xf32>, vector<8x32xf32>, vector<16x32xf32> -> vector<16x32xf32>
    %227 = arith.addf %208, %226 : vector<16x32xf32>
    %228 = vector.extract_strided_slice %175 {offsets = [0, 16], sizes = [16, 8], strides = [1, 1]} : vector<16x32xf32> to vector<16x8xf32>
    %229 = vector.extract_strided_slice %183 {offsets = [0, 16], sizes = [16, 8], strides = [1, 1]} : vector<16x32xf32> to vector<16x8xf32>
    %cst_102 = arith.constant dense<0.000000e+00> : vector<16x16xf32>
    %230 = tpu.matmul %228, %229, %cst_102 {dimension_numbers = #tpu.dot_dimension_numbers<[1], [1], [0], [0], [0, 0, 1, 0], [], []>} : vector<16x8xf32>, vector<16x8xf32>, vector<16x16xf32> -> vector<16x16xf32>
    %cst_103 = arith.constant 0.353553385 : f32
    %231 = vector.broadcast %cst_103 : f32 to vector<16x16xf32>
    %232 = arith.mulf %230, %231 : vector<16x16xf32>
    %cst_104 = arith.constant dense<0xFF800000> : vector<16xf32>
    %233 = vector.multi_reduction <maximumf>, %232, %cst_104 [1] : vector<16x16xf32> to vector<16xf32>
    %234 = vector.shape_cast %233 : vector<16xf32> to vector<16x1xf32>
    %235 = vector.broadcast %234 : vector<16x1xf32> to vector<16x16xf32>
    %236 = arith.subf %232, %235 : vector<16x16xf32>
    %237 = math.exp %236 : vector<16x16xf32>
    %cst_105 = arith.constant dense<0.000000e+00> : vector<16xf32>
    %238 = vector.multi_reduction <add>, %237, %cst_105 [1] : vector<16x16xf32> to vector<16xf32>
    %239 = vector.shape_cast %238 : vector<16xf32> to vector<16x1xf32>
    %240 = vector.broadcast %239 : vector<16x1xf32> to vector<16x16xf32>
    %241 = arith.divf %237, %240 : vector<16x16xf32>
    %242 = vector.extract_strided_slice %184 {offsets = [0, 16], sizes = [16, 8], strides = [1, 1]} : vector<16x32xf32> to vector<16x8xf32>
    %cst_106 = arith.constant dense<0.000000e+00> : vector<16x8xf32>
    %243 = tpu.matmul %241, %242, %cst_106 {dimension_numbers = #tpu.dot_dimension_numbers<[1], [0], [0], [1], [0, 0, 1, 1], [], []>} : vector<16x16xf32>, vector<16x8xf32>, vector<16x8xf32> -> vector<16x8xf32>
    %244 = vector.extract_strided_slice %186 {offsets = [16, 0], sizes = [8, 32], strides = [1, 1]} : vector<32x32xf32> to vector<8x32xf32>
    %cst_107 = arith.constant dense<0.000000e+00> : vector<16x32xf32>
    %245 = tpu.matmul %243, %244, %cst_107 {dimension_numbers = #tpu.dot_dimension_numbers<[1], [0], [0], [1], [0, 0, 1, 1], [], []>} : vector<16x8xf32>, vector<8x32xf32>, vector<16x32xf32> -> vector<16x32xf32>
    %246 = arith.addf %227, %245 : vector<16x32xf32>
    %247 = vector.extract_strided_slice %175 {offsets = [0, 24], sizes = [16, 8], strides = [1, 1]} : vector<16x32xf32> to vector<16x8xf32>
    %248 = vector.extract_strided_slice %183 {offsets = [0, 24], sizes = [16, 8], strides = [1, 1]} : vector<16x32xf32> to vector<16x8xf32>
    %cst_108 = arith.constant dense<0.000000e+00> : vector<16x16xf32>
    %249 = tpu.matmul %247, %248, %cst_108 {dimension_numbers = #tpu.dot_dimension_numbers<[1], [1], [0], [0], [0, 0, 1, 0], [], []>} : vector<16x8xf32>, vector<16x8xf32>, vector<16x16xf32> -> vector<16x16xf32>
    %cst_109 = arith.constant 0.353553385 : f32
    %250 = vector.broadcast %cst_109 : f32 to vector<16x16xf32>
    %251 = arith.mulf %249, %250 : vector<16x16xf32>
    %cst_110 = arith.constant dense<0xFF800000> : vector<16xf32>
    %252 = vector.multi_reduction <maximumf>, %251, %cst_110 [1] : vector<16x16xf32> to vector<16xf32>
    %253 = vector.shape_cast %252 : vector<16xf32> to vector<16x1xf32>
    %254 = vector.broadcast %253 : vector<16x1xf32> to vector<16x16xf32>
    %255 = arith.subf %251, %254 : vector<16x16xf32>
    %256 = math.exp %255 : vector<16x16xf32>
    %cst_111 = arith.constant dense<0.000000e+00> : vector<16xf32>
    %257 = vector.multi_reduction <add>, %256, %cst_111 [1] : vector<16x16xf32> to vector<16xf32>
    %258 = vector.shape_cast %257 : vector<16xf32> to vector<16x1xf32>
    %259 = vector.broadcast %258 : vector<16x1xf32> to vector<16x16xf32>
    %260 = arith.divf %256, %259 : vector<16x16xf32>
    %261 = vector.extract_strided_slice %184 {offsets = [0, 24], sizes = [16, 8], strides = [1, 1]} : vector<16x32xf32> to vector<16x8xf32>
    %cst_112 = arith.constant dense<0.000000e+00> : vector<16x8xf32>
    %262 = tpu.matmul %260, %261, %cst_112 {dimension_numbers = #tpu.dot_dimension_numbers<[1], [0], [0], [1], [0, 0, 1, 1], [], []>} : vector<16x16xf32>, vector<16x8xf32>, vector<16x8xf32> -> vector<16x8xf32>
    %263 = vector.extract_strided_slice %186 {offsets = [24, 0], sizes = [8, 32], strides = [1, 1]} : vector<32x32xf32> to vector<8x32xf32>
    %cst_113 = arith.constant dense<0.000000e+00> : vector<16x32xf32>
    %264 = tpu.matmul %262, %263, %cst_113 {dimension_numbers = #tpu.dot_dimension_numbers<[1], [0], [0], [1], [0, 0, 1, 1], [], []>} : vector<16x8xf32>, vector<8x32xf32>, vector<16x32xf32> -> vector<16x32xf32>
    %265 = arith.addf %246, %264 : vector<16x32xf32>
    %266 = vector.broadcast %188 : vector<1x32xf32> to vector<16x32xf32>
    %267 = arith.addf %265, %266 : vector<16x32xf32>
    %268 = arith.addf %136, %267 : vector<16x32xf32>
    %c0_114 = arith.constant 0 : index
    %c0_115 = arith.constant 0 : index
    %c0_116 = arith.constant 0 : index
    %269 = vector.load %arg13[%c0_114, %c0_115, %c0_116] : memref<1x16x16xf32, #tpu.memory_space<vmem>>, vector<1x16x16xf32>
    %270 = vector.shape_cast %269 : vector<1x16x16xf32> to vector<16x16xf32>
    %cst_117 = arith.constant dense<0.000000e+00> : vector<16x32xf32>
    %271 = tpu.matmul %270, %268, %cst_117 {dimension_numbers = #tpu.dot_dimension_numbers<[1], [0], [0], [1], [0, 0, 1, 1], [], []>} : vector<16x16xf32>, vector<16x32xf32>, vector<16x32xf32> -> vector<16x32xf32>
    %c0_118 = arith.constant 0 : index
    %c0_119 = arith.constant 0 : index
    %c0_120 = arith.constant 0 : index
    %272 = vector.load %arg14[%c0_118, %c0_119, %c0_120] : memref<1x16x256xf32, #tpu.memory_space<vmem>>, vector<1x16x32xf32>
    %273 = vector.shape_cast %272 : vector<1x16x32xf32> to vector<16x32xf32>
    %274 = arith.addf %271, %273 : vector<16x32xf32>
    %c0_121 = arith.constant 0 : index
    %c0_122 = arith.constant 0 : index
    %c0_123 = arith.constant 0 : index
    %c0_124 = arith.constant 0 : index
    %275 = vector.load %arg12[%c0_121, %c0_122, %c0_123, %c0_124] : memref<1x3x3x16xf32, #tpu.memory_space<vmem>>, vector<1x1x3x16xf32>
    %276 = vector.shape_cast %275 : vector<1x1x3x16xf32> to vector<3x16xf32>
    %cst_125 = arith.constant dense<0.000000e+00> : vector<3x32xf32>
    %277 = tpu.matmul %276, %268, %cst_125 {dimension_numbers = #tpu.dot_dimension_numbers<[1], [0], [0], [1], [0, 0, 1, 1], [], []>} : vector<3x16xf32>, vector<16x32xf32>, vector<3x32xf32> -> vector<3x32xf32>
    %c0_126 = arith.constant 0 : index
    %c1 = arith.constant 1 : index
    %c0_127 = arith.constant 0 : index
    %c0_128 = arith.constant 0 : index
    %278 = vector.load %arg12[%c0_126, %c1, %c0_127, %c0_128] : memref<1x3x3x16xf32, #tpu.memory_space<vmem>>, vector<1x1x3x16xf32>
    %279 = vector.shape_cast %278 : vector<1x1x3x16xf32> to vector<3x16xf32>
    %cst_129 = arith.constant dense<0.000000e+00> : vector<3x32xf32>
    %280 = tpu.matmul %279, %268, %cst_129 {dimension_numbers = #tpu.dot_dimension_numbers<[1], [0], [0], [1], [0, 0, 1, 1], [], []>} : vector<3x16xf32>, vector<16x32xf32>, vector<3x32xf32> -> vector<3x32xf32>
    %c0_130 = arith.constant 0 : index
    %c2 = arith.constant 2 : index
    %c0_131 = arith.constant 0 : index
    %c0_132 = arith.constant 0 : index
    %281 = vector.load %arg12[%c0_130, %c2, %c0_131, %c0_132] : memref<1x3x3x16xf32, #tpu.memory_space<vmem>>, vector<1x1x3x16xf32>
    %282 = vector.shape_cast %281 : vector<1x1x3x16xf32> to vector<3x16xf32>
    %cst_133 = arith.constant dense<0.000000e+00> : vector<3x32xf32>
    %283 = tpu.matmul %282, %268, %cst_133 {dimension_numbers = #tpu.dot_dimension_numbers<[1], [0], [0], [1], [0, 0, 1, 1], [], []>} : vector<3x16xf32>, vector<16x32xf32>, vector<3x32xf32> -> vector<3x32xf32>
    %c0_134 = arith.constant 0 : index
    %c0_135 = arith.constant 0 : index
    %c0_136 = arith.constant 0 : index
    %284 = vector.load %arg15[%c0_134, %c0_135, %c0_136] : memref<1x3x32xf32, #tpu.memory_space<vmem>>, vector<1x3x32xf32>
    %285 = vector.shape_cast %284 : vector<1x3x32xf32> to vector<3x32xf32>
    %286 = arith.addf %285, %280 : vector<3x32xf32>
    %c0_137 = arith.constant 0 : index
    %c0_138 = arith.constant 0 : index
    %c0_139 = arith.constant 0 : index
    %287 = vector.load %arg16[%c0_137, %c0_138, %c0_139] : memref<2x32x32xf32, #tpu.memory_space<vmem>>, vector<1x32x32xf32>
    %288 = vector.shape_cast %287 : vector<1x32x32xf32> to vector<32x32xf32>
    %cst_140 = arith.constant dense<0.000000e+00> : vector<3x32xf32>
    %289 = tpu.matmul %277, %288, %cst_140 {dimension_numbers = #tpu.dot_dimension_numbers<[1], [0], [0], [1], [0, 0, 1, 1], [], []>} : vector<3x32xf32>, vector<32x32xf32>, vector<3x32xf32> -> vector<3x32xf32>
    %290 = arith.addf %286, %289 : vector<3x32xf32>
    %c1_141 = arith.constant 1 : index
    %c0_142 = arith.constant 0 : index
    %c0_143 = arith.constant 0 : index
    %291 = vector.load %arg16[%c1_141, %c0_142, %c0_143] : memref<2x32x32xf32, #tpu.memory_space<vmem>>, vector<1x32x32xf32>
    %292 = vector.shape_cast %291 : vector<1x32x32xf32> to vector<32x32xf32>
    %cst_144 = arith.constant dense<0.000000e+00> : vector<3x32xf32>
    %293 = tpu.matmul %283, %292, %cst_144 {dimension_numbers = #tpu.dot_dimension_numbers<[1], [0], [0], [1], [0, 0, 1, 1], [], []>} : vector<3x32xf32>, vector<32x32xf32>, vector<3x32xf32> -> vector<3x32xf32>
    %294 = arith.addf %290, %293 : vector<3x32xf32>
    %cst_145 = arith.constant 5.000000e-01 : f32
    %295 = vector.broadcast %cst_145 : f32 to vector<3x32xf32>
    %296 = arith.mulf %295, %294 : vector<3x32xf32>
    %cst_146 = arith.constant 4.471500e-02 : f32
    %297 = vector.broadcast %cst_146 : f32 to vector<3x32xf32>
    %298 = arith.mulf %297, %294 : vector<3x32xf32>
    %299 = arith.mulf %298, %294 : vector<3x32xf32>
    %300 = arith.mulf %299, %294 : vector<3x32xf32>
    %301 = arith.addf %294, %300 : vector<3x32xf32>
    %cst_147 = arith.constant 0.797884583 : f32
    %302 = vector.broadcast %cst_147 : f32 to vector<3x32xf32>
    %303 = arith.mulf %302, %301 : vector<3x32xf32>
    %304 = math.tanh %303 : vector<3x32xf32>
    %cst_148 = arith.constant 1.000000e+00 : f32
    %305 = vector.broadcast %cst_148 : f32 to vector<3x32xf32>
    %306 = arith.addf %305, %304 : vector<3x32xf32>
    %307 = arith.mulf %296, %306 : vector<3x32xf32>
    %c0_149 = arith.constant 0 : index
    %c0_150 = arith.constant 0 : index
    %c128_151 = arith.constant 128 : index
    %308 = vector.load %arg14[%c0_149, %c0_150, %c128_151] : memref<1x16x256xf32, #tpu.memory_space<vmem>>, vector<1x16x23xf32>
    %309 = vector.shape_cast %308 : vector<1x16x23xf32> to vector<16x23xf32>
    %c0_152 = arith.constant 0 : index
    %c0_153 = arith.constant 0 : index
    %c0_154 = arith.constant 0 : index
    %310 = vector.load %arg17[%c0_152, %c0_153, %c0_154] : memref<3x16x3xf32, #tpu.memory_space<vmem>>, vector<1x16x3xf32>
    %311 = vector.shape_cast %310 : vector<1x16x3xf32> to vector<16x3xf32>
    %c0_155 = arith.constant 0 : index
    %c0_156 = arith.constant 0 : index
    %c0_157 = arith.constant 0 : index
    %c0_158 = arith.constant 0 : index
    %312 = vector.load %arg11[%c0_155, %c0_156, %c0_157, %c0_158] : memref<1x3x32x23xf32, #tpu.memory_space<vmem>>, vector<1x1x32x23xf32>
    %313 = vector.shape_cast %312 : vector<1x1x32x23xf32> to vector<32x23xf32>
    %cst_159 = arith.constant dense<0.000000e+00> : vector<3x23xf32>
    %314 = tpu.matmul %307, %313, %cst_159 {dimension_numbers = #tpu.dot_dimension_numbers<[1], [0], [0], [1], [0, 0, 1, 1], [], []>} : vector<3x32xf32>, vector<32x23xf32>, vector<3x23xf32> -> vector<3x23xf32>
    %cst_160 = arith.constant dense<0.000000e+00> : vector<16x23xf32>
    %315 = tpu.matmul %311, %314, %cst_160 {dimension_numbers = #tpu.dot_dimension_numbers<[1], [0], [0], [1], [0, 0, 1, 1], [], []>} : vector<16x3xf32>, vector<3x23xf32>, vector<16x23xf32> -> vector<16x23xf32>
    %316 = arith.addf %309, %315 : vector<16x23xf32>
    %c1_161 = arith.constant 1 : index
    %c0_162 = arith.constant 0 : index
    %c0_163 = arith.constant 0 : index
    %317 = vector.load %arg17[%c1_161, %c0_162, %c0_163] : memref<3x16x3xf32, #tpu.memory_space<vmem>>, vector<1x16x3xf32>
    %318 = vector.shape_cast %317 : vector<1x16x3xf32> to vector<16x3xf32>
    %c0_164 = arith.constant 0 : index
    %c1_165 = arith.constant 1 : index
    %c0_166 = arith.constant 0 : index
    %c0_167 = arith.constant 0 : index
    %319 = vector.load %arg11[%c0_164, %c1_165, %c0_166, %c0_167] : memref<1x3x32x23xf32, #tpu.memory_space<vmem>>, vector<1x1x32x23xf32>
    %320 = vector.shape_cast %319 : vector<1x1x32x23xf32> to vector<32x23xf32>
    %cst_168 = arith.constant dense<0.000000e+00> : vector<3x23xf32>
    %321 = tpu.matmul %307, %320, %cst_168 {dimension_numbers = #tpu.dot_dimension_numbers<[1], [0], [0], [1], [0, 0, 1, 1], [], []>} : vector<3x32xf32>, vector<32x23xf32>, vector<3x23xf32> -> vector<3x23xf32>
    %cst_169 = arith.constant dense<0.000000e+00> : vector<16x23xf32>
    %322 = tpu.matmul %318, %321, %cst_169 {dimension_numbers = #tpu.dot_dimension_numbers<[1], [0], [0], [1], [0, 0, 1, 1], [], []>} : vector<16x3xf32>, vector<3x23xf32>, vector<16x23xf32> -> vector<16x23xf32>
    %323 = arith.addf %316, %322 : vector<16x23xf32>
    %c2_170 = arith.constant 2 : index
    %c0_171 = arith.constant 0 : index
    %c0_172 = arith.constant 0 : index
    %324 = vector.load %arg17[%c2_170, %c0_171, %c0_172] : memref<3x16x3xf32, #tpu.memory_space<vmem>>, vector<1x16x3xf32>
    %325 = vector.shape_cast %324 : vector<1x16x3xf32> to vector<16x3xf32>
    %c0_173 = arith.constant 0 : index
    %c2_174 = arith.constant 2 : index
    %c0_175 = arith.constant 0 : index
    %c0_176 = arith.constant 0 : index
    %326 = vector.load %arg11[%c0_173, %c2_174, %c0_175, %c0_176] : memref<1x3x32x23xf32, #tpu.memory_space<vmem>>, vector<1x1x32x23xf32>
    %327 = vector.shape_cast %326 : vector<1x1x32x23xf32> to vector<32x23xf32>
    %cst_177 = arith.constant dense<0.000000e+00> : vector<3x23xf32>
    %328 = tpu.matmul %307, %327, %cst_177 {dimension_numbers = #tpu.dot_dimension_numbers<[1], [0], [0], [1], [0, 0, 1, 1], [], []>} : vector<3x32xf32>, vector<32x23xf32>, vector<3x23xf32> -> vector<3x23xf32>
    %cst_178 = arith.constant dense<0.000000e+00> : vector<16x23xf32>
    %329 = tpu.matmul %325, %328, %cst_178 {dimension_numbers = #tpu.dot_dimension_numbers<[1], [0], [0], [1], [0, 0, 1, 1], [], []>} : vector<16x3xf32>, vector<3x23xf32>, vector<16x23xf32> -> vector<16x23xf32>
    %330 = arith.addf %323, %329 : vector<16x23xf32>
    %cst_179 = arith.constant dense<0.000000e+00> : vector<16xf32>
    %331 = vector.multi_reduction <add>, %268, %cst_179 [1] : vector<16x32xf32> to vector<16xf32>
    %332 = vector.shape_cast %331 : vector<16xf32> to vector<16x1xf32>
    %cst_180 = arith.constant 3.200000e+01 : f32
    %333 = vector.broadcast %cst_180 : f32 to vector<16x1xf32>
    %334 = arith.divf %332, %333 : vector<16x1xf32>
    %335 = vector.broadcast %334 : vector<16x1xf32> to vector<16x32xf32>
    %336 = arith.subf %268, %335 : vector<16x32xf32>
    %337 = arith.mulf %336, %336 : vector<16x32xf32>
    %cst_181 = arith.constant dense<0.000000e+00> : vector<16xf32>
    %338 = vector.multi_reduction <add>, %337, %cst_181 [1] : vector<16x32xf32> to vector<16xf32>
    %339 = vector.shape_cast %338 : vector<16xf32> to vector<16x1xf32>
    %cst_182 = arith.constant 3.200000e+01 : f32
    %340 = vector.broadcast %cst_182 : f32 to vector<16x1xf32>
    %341 = arith.divf %339, %340 : vector<16x1xf32>
    %342 = vector.broadcast %334 : vector<16x1xf32> to vector<16x32xf32>
    %343 = arith.subf %268, %342 : vector<16x32xf32>
    %cst_183 = arith.constant 9.99999974E-6 : f32
    %344 = vector.broadcast %cst_183 : f32 to vector<16x1xf32>
    %345 = arith.addf %341, %344 : vector<16x1xf32>
    %346 = math.rsqrt %345 : vector<16x1xf32>
    %347 = vector.broadcast %346 : vector<16x1xf32> to vector<16x32xf32>
    %348 = arith.mulf %343, %347 : vector<16x32xf32>
    %c0_184 = arith.constant 0 : index
    %c0_185 = arith.constant 0 : index
    %c896 = arith.constant 896 : index
    %349 = vector.load %arg7[%c0_184, %c0_185, %c896] : memref<1x1x1792xf32, #tpu.memory_space<vmem>>, vector<1x1x32xf32>
    %350 = vector.shape_cast %349 : vector<1x1x32xf32> to vector<1x32xf32>
    %351 = vector.broadcast %350 : vector<1x32xf32> to vector<16x32xf32>
    %352 = arith.mulf %348, %351 : vector<16x32xf32>
    %c0_186 = arith.constant 0 : index
    %c0_187 = arith.constant 0 : index
    %c1024 = arith.constant 1024 : index
    %353 = vector.load %arg7[%c0_186, %c0_187, %c1024] : memref<1x1x1792xf32, #tpu.memory_space<vmem>>, vector<1x1x32xf32>
    %354 = vector.shape_cast %353 : vector<1x1x32xf32> to vector<1x32xf32>
    %355 = vector.broadcast %354 : vector<1x32xf32> to vector<16x32xf32>
    %356 = arith.addf %352, %355 : vector<16x32xf32>
    %c0_188 = arith.constant 0 : index
    %c0_189 = arith.constant 0 : index
    %c768_190 = arith.constant 768 : index
    %357 = vector.load %arg6[%c0_188, %c0_189, %c768_190] : memref<1x32x1152xf32, #tpu.memory_space<vmem>>, vector<1x32x128xf32>
    %358 = vector.shape_cast %357 : vector<1x32x128xf32> to vector<32x128xf32>
    %cst_191 = arith.constant dense<0.000000e+00> : vector<16x128xf32>
    %359 = tpu.matmul %356, %358, %cst_191 {dimension_numbers = #tpu.dot_dimension_numbers<[1], [0], [0], [1], [0, 0, 1, 1], [], []>} : vector<16x32xf32>, vector<32x128xf32>, vector<16x128xf32> -> vector<16x128xf32>
    %c0_192 = arith.constant 0 : index
    %c0_193 = arith.constant 0 : index
    %c1152 = arith.constant 1152 : index
    %360 = vector.load %arg7[%c0_192, %c0_193, %c1152] : memref<1x1x1792xf32, #tpu.memory_space<vmem>>, vector<1x1x128xf32>
    %361 = vector.shape_cast %360 : vector<1x1x128xf32> to vector<1x128xf32>
    %362 = vector.broadcast %361 : vector<1x128xf32> to vector<16x128xf32>
    %363 = arith.addf %359, %362 : vector<16x128xf32>
    %cst_194 = arith.constant 5.000000e-01 : f32
    %364 = vector.broadcast %cst_194 : f32 to vector<16x128xf32>
    %365 = arith.mulf %364, %363 : vector<16x128xf32>
    %cst_195 = arith.constant 4.471500e-02 : f32
    %366 = vector.broadcast %cst_195 : f32 to vector<16x128xf32>
    %367 = arith.mulf %366, %363 : vector<16x128xf32>
    %368 = arith.mulf %367, %363 : vector<16x128xf32>
    %369 = arith.mulf %368, %363 : vector<16x128xf32>
    %370 = arith.addf %363, %369 : vector<16x128xf32>
    %cst_196 = arith.constant 0.797884583 : f32
    %371 = vector.broadcast %cst_196 : f32 to vector<16x128xf32>
    %372 = arith.mulf %371, %370 : vector<16x128xf32>
    %373 = math.tanh %372 : vector<16x128xf32>
    %cst_197 = arith.constant 1.000000e+00 : f32
    %374 = vector.broadcast %cst_197 : f32 to vector<16x128xf32>
    %375 = arith.addf %374, %373 : vector<16x128xf32>
    %376 = arith.mulf %365, %375 : vector<16x128xf32>
    %c0_198 = arith.constant 0 : index
    %c0_199 = arith.constant 0 : index
    %c0_200 = arith.constant 0 : index
    %377 = vector.load %arg9[%c0_198, %c0_199, %c0_200] : memref<1x128x32xf32, #tpu.memory_space<vmem>>, vector<1x128x32xf32>
    %378 = vector.shape_cast %377 : vector<1x128x32xf32> to vector<128x32xf32>
    %cst_201 = arith.constant dense<0.000000e+00> : vector<16x32xf32>
    %379 = tpu.matmul %376, %378, %cst_201 {dimension_numbers = #tpu.dot_dimension_numbers<[1], [0], [0], [1], [0, 0, 1, 1], [], []>} : vector<16x128xf32>, vector<128x32xf32>, vector<16x32xf32> -> vector<16x32xf32>
    %380 = arith.addf %268, %379 : vector<16x32xf32>
    %c0_202 = arith.constant 0 : index
    %c0_203 = arith.constant 0 : index
    %c1280 = arith.constant 1280 : index
    %381 = vector.load %arg7[%c0_202, %c0_203, %c1280] : memref<1x1x1792xf32, #tpu.memory_space<vmem>>, vector<1x1x32xf32>
    %382 = vector.shape_cast %381 : vector<1x1x32xf32> to vector<1x32xf32>
    %383 = vector.broadcast %382 : vector<1x32xf32> to vector<16x32xf32>
    %384 = arith.addf %380, %383 : vector<16x32xf32>
    %cst_204 = arith.constant 0.000000e+00 : f32
    %385 = vector.broadcast %cst_204 : f32 to vector<2x32xf32>
    %c0_205 = arith.constant 0 : index
    %c0_206 = arith.constant 0 : index
    %386 = vector.load %arg20[%c0_205, %c0_206] : memref<20x32xf32, #tpu.memory_space<vmem>>, vector<2x32xf32>
    tpu.vector_store %arg20[%c0_205, %c0_206], %385 {strides = array<i32>} : memref<20x32xf32, #tpu.memory_space<vmem>>, vector<2x32xf32>,
    %c2_207 = arith.constant 2 : index
    %c0_208 = arith.constant 0 : index
    %387 = vector.load %arg20[%c2_207, %c0_208] : memref<20x32xf32, #tpu.memory_space<vmem>>, vector<16x32xf32>
    tpu.vector_store %arg20[%c2_207, %c0_208], %384 {strides = array<i32>} : memref<20x32xf32, #tpu.memory_space<vmem>>, vector<16x32xf32>,
    %cst_209 = arith.constant 0.000000e+00 : f32
    %388 = vector.broadcast %cst_209 : f32 to vector<2x32xf32>
    %c18 = arith.constant 18 : index
    %c0_210 = arith.constant 0 : index
    %389 = vector.load %arg20[%c18, %c0_210] : memref<20x32xf32, #tpu.memory_space<vmem>>, vector<2x32xf32>
    tpu.vector_store %arg20[%c18, %c0_210], %388 {strides = array<i32>} : memref<20x32xf32, #tpu.memory_space<vmem>>, vector<2x32xf32>,
    %cst_211 = arith.constant 0.000000e+00 : f32
    %390 = vector.broadcast %cst_211 : f32 to vector<16x32xf32>
    %c0_212 = arith.constant 0 : index
    %c0_213 = arith.constant 0 : index
    %c1408 = arith.constant 1408 : index
    %391 = vector.load %arg7[%c0_212, %c0_213, %c1408] : memref<1x1x1792xf32, #tpu.memory_space<vmem>>, vector<1x1x32xf32>
    %392 = vector.shape_cast %391 : vector<1x1x32xf32> to vector<1x32xf32>
    %393 = vector.broadcast %392 : vector<1x32xf32> to vector<16x32xf32>
    %394 = arith.addf %390, %393 : vector<16x32xf32>
    %c0_214 = arith.constant 0 : index
    %c0_215 = arith.constant 0 : index
    %395 = vector.load %arg20[%c0_214, %c0_215] : memref<20x32xf32, #tpu.memory_space<vmem>>, vector<16x32xf32>
    %c0_216 = arith.constant 0 : index
    %c0_217 = arith.constant 0 : index
    %c0_218 = arith.constant 0 : index
    %c0_219 = arith.constant 0 : index
    %396 = vector.load %arg10[%c0_216, %c0_217, %c0_218, %c0_219] : memref<1x5x32x32xf32, #tpu.memory_space<vmem>>, vector<1x1x32x32xf32>
    %397 = vector.shape_cast %396 : vector<1x1x32x32xf32> to vector<32x32xf32>
    %cst_220 = arith.constant dense<0.000000e+00> : vector<16x32xf32>
    %398 = tpu.matmul %395, %397, %cst_220 {dimension_numbers = #tpu.dot_dimension_numbers<[1], [0], [0], [1], [0, 0, 1, 1], [], []>} : vector<16x32xf32>, vector<32x32xf32>, vector<16x32xf32> -> vector<16x32xf32>
    %399 = arith.addf %394, %398 : vector<16x32xf32>
    %c1_221 = arith.constant 1 : index
    %c0_222 = arith.constant 0 : index
    %400 = vector.load %arg20[%c1_221, %c0_222] : memref<20x32xf32, #tpu.memory_space<vmem>>, vector<16x32xf32>
    %c0_223 = arith.constant 0 : index
    %c1_224 = arith.constant 1 : index
    %c0_225 = arith.constant 0 : index
    %c0_226 = arith.constant 0 : index
    %401 = vector.load %arg10[%c0_223, %c1_224, %c0_225, %c0_226] : memref<1x5x32x32xf32, #tpu.memory_space<vmem>>, vector<1x1x32x32xf32>
    %402 = vector.shape_cast %401 : vector<1x1x32x32xf32> to vector<32x32xf32>
    %cst_227 = arith.constant dense<0.000000e+00> : vector<16x32xf32>
    %403 = tpu.matmul %400, %402, %cst_227 {dimension_numbers = #tpu.dot_dimension_numbers<[1], [0], [0], [1], [0, 0, 1, 1], [], []>} : vector<16x32xf32>, vector<32x32xf32>, vector<16x32xf32> -> vector<16x32xf32>
    %404 = arith.addf %399, %403 : vector<16x32xf32>
    %c2_228 = arith.constant 2 : index
    %c0_229 = arith.constant 0 : index
    %405 = vector.load %arg20[%c2_228, %c0_229] : memref<20x32xf32, #tpu.memory_space<vmem>>, vector<16x32xf32>
    %c0_230 = arith.constant 0 : index
    %c2_231 = arith.constant 2 : index
    %c0_232 = arith.constant 0 : index
    %c0_233 = arith.constant 0 : index
    %406 = vector.load %arg10[%c0_230, %c2_231, %c0_232, %c0_233] : memref<1x5x32x32xf32, #tpu.memory_space<vmem>>, vector<1x1x32x32xf32>
    %407 = vector.shape_cast %406 : vector<1x1x32x32xf32> to vector<32x32xf32>
    %cst_234 = arith.constant dense<0.000000e+00> : vector<16x32xf32>
    %408 = tpu.matmul %405, %407, %cst_234 {dimension_numbers = #tpu.dot_dimension_numbers<[1], [0], [0], [1], [0, 0, 1, 1], [], []>} : vector<16x32xf32>, vector<32x32xf32>, vector<16x32xf32> -> vector<16x32xf32>
    %409 = arith.addf %404, %408 : vector<16x32xf32>
    %c3 = arith.constant 3 : index
    %c0_235 = arith.constant 0 : index
    %410 = vector.load %arg20[%c3, %c0_235] : memref<20x32xf32, #tpu.memory_space<vmem>>, vector<16x32xf32>
    %c0_236 = arith.constant 0 : index
    %c3_237 = arith.constant 3 : index
    %c0_238 = arith.constant 0 : index
    %c0_239 = arith.constant 0 : index
    %411 = vector.load %arg10[%c0_236, %c3_237, %c0_238, %c0_239] : memref<1x5x32x32xf32, #tpu.memory_space<vmem>>, vector<1x1x32x32xf32>
    %412 = vector.shape_cast %411 : vector<1x1x32x32xf32> to vector<32x32xf32>
    %cst_240 = arith.constant dense<0.000000e+00> : vector<16x32xf32>
    %413 = tpu.matmul %410, %412, %cst_240 {dimension_numbers = #tpu.dot_dimension_numbers<[1], [0], [0], [1], [0, 0, 1, 1], [], []>} : vector<16x32xf32>, vector<32x32xf32>, vector<16x32xf32> -> vector<16x32xf32>
    %414 = arith.addf %409, %413 : vector<16x32xf32>
    %c4 = arith.constant 4 : index
    %c0_241 = arith.constant 0 : index
    %415 = vector.load %arg20[%c4, %c0_241] : memref<20x32xf32, #tpu.memory_space<vmem>>, vector<16x32xf32>
    %c0_242 = arith.constant 0 : index
    %c4_243 = arith.constant 4 : index
    %c0_244 = arith.constant 0 : index
    %c0_245 = arith.constant 0 : index
    %416 = vector.load %arg10[%c0_242, %c4_243, %c0_244, %c0_245] : memref<1x5x32x32xf32, #tpu.memory_space<vmem>>, vector<1x1x32x32xf32>
    %417 = vector.shape_cast %416 : vector<1x1x32x32xf32> to vector<32x32xf32>
    %cst_246 = arith.constant dense<0.000000e+00> : vector<16x32xf32>
    %418 = tpu.matmul %415, %417, %cst_246 {dimension_numbers = #tpu.dot_dimension_numbers<[1], [0], [0], [1], [0, 0, 1, 1], [], []>} : vector<16x32xf32>, vector<32x32xf32>, vector<16x32xf32> -> vector<16x32xf32>
    %419 = arith.addf %414, %418 : vector<16x32xf32>
    %c0_247 = arith.constant 0 : index
    %c0_248 = arith.constant 0 : index
    %c896_249 = arith.constant 896 : index
    %420 = vector.load %arg6[%c0_247, %c0_248, %c896_249] : memref<1x32x1152xf32, #tpu.memory_space<vmem>>, vector<1x32x32xf32>
    %421 = vector.shape_cast %420 : vector<1x32x32xf32> to vector<32x32xf32>
    %cst_250 = arith.constant dense<0.000000e+00> : vector<16x32xf32>
    %422 = tpu.matmul %384, %421, %cst_250 {dimension_numbers = #tpu.dot_dimension_numbers<[1], [0], [0], [1], [0, 0, 1, 1], [], []>} : vector<16x32xf32>, vector<32x32xf32>, vector<16x32xf32> -> vector<16x32xf32>
    %c0_251 = arith.constant 0 : index
    %c0_252 = arith.constant 0 : index
    %c1536 = arith.constant 1536 : index
    %423 = vector.load %arg7[%c0_251, %c0_252, %c1536] : memref<1x1x1792xf32, #tpu.memory_space<vmem>>, vector<1x1x32xf32>
    %424 = vector.shape_cast %423 : vector<1x1x32xf32> to vector<1x32xf32>
    %425 = vector.broadcast %424 : vector<1x32xf32> to vector<16x32xf32>
    %426 = arith.addf %422, %425 : vector<16x32xf32>
    %cst_253 = arith.constant 0.000000e+00 : f32
    %427 = vector.broadcast %cst_253 : f32 to vector<16x32xf32>
    %428 = arith.subf %427, %426 : vector<16x32xf32>
    %429 = math.exp %428 : vector<16x32xf32>
    %cst_254 = arith.constant 1.000000e+00 : f32
    %430 = vector.broadcast %cst_254 : f32 to vector<16x32xf32>
    %431 = arith.addf %430, %429 : vector<16x32xf32>
    %432 = tpu.reciprocal %431 {approx = true} : vector<16x32xf32> -> vector<16x32xf32>
    %433 = arith.mulf %419, %432 : vector<16x32xf32>
    %434 = arith.addf %384, %433 : vector<16x32xf32>
    %cst_255 = arith.constant dense<0.000000e+00> : vector<32xf32>
    %435 = vector.multi_reduction <add>, %434, %cst_255 [0] : vector<16x32xf32> to vector<32xf32>
    %436 = vector.shape_cast %435 : vector<32xf32> to vector<1x32xf32>
    %cst_256 = arith.constant 1.600000e+01 : f32
    %437 = vector.broadcast %cst_256 : f32 to vector<1x32xf32>
    %438 = arith.divf %436, %437 : vector<1x32xf32>
    %439 = vector.broadcast %438 : vector<1x32xf32> to vector<16x32xf32>
    %440 = arith.subf %434, %439 : vector<16x32xf32>
    %c0_257 = arith.constant 0 : index
    %c0_258 = arith.constant 0 : index
    %c1024_259 = arith.constant 1024 : index
    %441 = vector.load %arg6[%c0_257, %c0_258, %c1024_259] : memref<1x32x1152xf32, #tpu.memory_space<vmem>>, vector<1x32x23xf32>
    %442 = vector.shape_cast %441 : vector<1x32x23xf32> to vector<32x23xf32>
    %cst_260 = arith.constant dense<0.000000e+00> : vector<1x23xf32>
    %443 = tpu.matmul %438, %442, %cst_260 {dimension_numbers = #tpu.dot_dimension_numbers<[1], [0], [0], [1], [0, 0, 1, 1], [], []>} : vector<1x32xf32>, vector<32x23xf32>, vector<1x23xf32> -> vector<1x23xf32>
    %c0_261 = arith.constant 0 : index
    %c0_262 = arith.constant 0 : index
    %c1664 = arith.constant 1664 : index
    %444 = vector.load %arg7[%c0_261, %c0_262, %c1664] : memref<1x1x1792xf32, #tpu.memory_space<vmem>>, vector<1x1x23xf32>
    %445 = vector.shape_cast %444 : vector<1x1x23xf32> to vector<1x23xf32>
    %446 = arith.addf %443, %445 : vector<1x23xf32>
    %c0_263 = arith.constant 0 : index
    %c0_264 = arith.constant 0 : index
    %c0_265 = arith.constant 0 : index
    %447 = vector.load %arg18[%c0_263, %c0_264, %c0_265] : memref<1x16x32xf32, #tpu.memory_space<vmem>>, vector<1x16x32xf32>
    %448 = vector.shape_cast %447 : vector<1x16x32xf32> to vector<16x32xf32>
    %449 = vector.shape_cast %440 : vector<16x32xf32> to vector<1x16x32xf32>
    tpu.vector_store %arg18[%c0_263, %c0_264, %c0_265], %449 {strides = array<i32>} : memref<1x16x32xf32, #tpu.memory_space<vmem>>, vector<1x16x32xf32>,
    %cst_266 = arith.constant 0.000000e+00 : f32
    %450 = vector.broadcast %cst_266 : f32 to vector<16x9xf32>
    %451 = vector.shape_cast %446 : vector<1x23xf32> to vector<1x23xf32>
    %452 = vector.broadcast %451 : vector<1x23xf32> to vector<16x23xf32>
    %cst_267 = arith.constant 0.000000e+00 : f32
    %453 = vector.broadcast %cst_267 : f32 to vector<16x41xf32>
    %454 = tpu.concatenate %274, %330, %450, %452, %453 in 1 : vector<16x32xf32>, vector<16x23xf32>, vector<16x9xf32>, vector<16x23xf32>, vector<16x41xf32> -> vector<16x128xf32>
    %c0_268 = arith.constant 0 : index
    %c0_269 = arith.constant 0 : index
    %c0_270 = arith.constant 0 : index
    %c0_271 = arith.constant 0 : index
    %455 = vector.load %arg19[%c0_268, %c0_269, %c0_270, %c0_271] : memref<1x1x16x128xf32, #tpu.memory_space<vmem>>, vector<1x1x16x128xf32>
    %456 = vector.shape_cast %455 : vector<1x1x16x128xf32> to vector<16x128xf32>
    %457 = vector.shape_cast %454 : vector<16x128xf32> to vector<1x1x16x128xf32>
    tpu.vector_store %arg19[%c0_268, %c0_269, %c0_270, %c0_271], %457 {strides = array<i32>} : memref<1x1x16x128xf32, #tpu.memory_space<vmem>>, vector<1x1x16x128xf32>,
    return
  }
  func.func @transform_0(%arg0: i32, %arg1: i32) -> (i32, i32, i32) {
    %c0_i32 = arith.constant 0 : i32
    %c0_i32_0 = arith.constant 0 : i32
    %c0_i32_1 = arith.constant 0 : i32
    return %arg0, %c0_i32, %c0_i32_0 : i32, i32, i32
  }
  func.func @transform_1(%arg0: i32, %arg1: i32) -> (i32, i32, i32) {
    %c0_i32 = arith.constant 0 : i32
    %c0_i32_0 = arith.constant 0 : i32
    %c0_i32_1 = arith.constant 0 : i32
    return %arg0, %c0_i32, %c0_i32_0 : i32, i32, i32
  }
  func.func @transform_2(%arg0: i32, %arg1: i32) -> (i32, i32, i32) {
    %c0_i32 = arith.constant 0 : i32
    %c0_i32_0 = arith.constant 0 : i32
    %c0_i32_1 = arith.constant 0 : i32
    return %arg0, %c0_i32, %c0_i32_0 : i32, i32, i32
  }
  func.func @transform_3(%arg0: i32, %arg1: i32) -> (i32, i32, i32) {
    %c0_i32 = arith.constant 0 : i32
    %c0_i32_0 = arith.constant 0 : i32
    %c0_i32_1 = arith.constant 0 : i32
    return %arg0, %c0_i32, %c0_i32_0 : i32, i32, i32
  }
  func.func @transform_4(%arg0: i32, %arg1: i32) -> (i32, i32, i32) {
    %c0_i32 = arith.constant 0 : i32
    %c0_i32_0 = arith.constant 0 : i32
    %c0_i32_1 = arith.constant 0 : i32
    return %arg1, %c0_i32, %c0_i32_0 : i32, i32, i32
  }
  func.func @transform_5(%arg0: i32, %arg1: i32) -> (i32, i32, i32) {
    %c0_i32 = arith.constant 0 : i32
    %c0_i32_0 = arith.constant 0 : i32
    %c0_i32_1 = arith.constant 0 : i32
    return %arg1, %c0_i32, %c0_i32_0 : i32, i32, i32
  }
  func.func @transform_6(%arg0: i32, %arg1: i32) -> (i32, i32, i32) {
    %c0_i32 = arith.constant 0 : i32
    %c0_i32_0 = arith.constant 0 : i32
    %c0_i32_1 = arith.constant 0 : i32
    return %arg1, %c0_i32, %c0_i32_0 : i32, i32, i32
  }
  func.func @transform_7(%arg0: i32, %arg1: i32) -> (i32, i32, i32) {
    %c0_i32 = arith.constant 0 : i32
    %c0_i32_0 = arith.constant 0 : i32
    %c0_i32_1 = arith.constant 0 : i32
    return %arg1, %c0_i32, %c0_i32_0 : i32, i32, i32
  }
  func.func @transform_8(%arg0: i32, %arg1: i32) -> (i32, i32, i32, i32) {
    %c0_i32 = arith.constant 0 : i32
    %c0_i32_0 = arith.constant 0 : i32
    %c0_i32_1 = arith.constant 0 : i32
    %c0_i32_2 = arith.constant 0 : i32
    return %arg1, %c0_i32, %c0_i32_0, %c0_i32_1 : i32, i32, i32, i32
  }
  func.func @transform_9(%arg0: i32, %arg1: i32) -> (i32, i32, i32, i32) {
    %c0_i32 = arith.constant 0 : i32
    %c0_i32_0 = arith.constant 0 : i32
    %c0_i32_1 = arith.constant 0 : i32
    %c0_i32_2 = arith.constant 0 : i32
    return %arg1, %c0_i32, %c0_i32_0, %c0_i32_1 : i32, i32, i32, i32
  }
  func.func @transform_10(%arg0: i32, %arg1: i32) -> (i32, i32, i32, i32) {
    %c0_i32 = arith.constant 0 : i32
    %c0_i32_0 = arith.constant 0 : i32
    %c0_i32_1 = arith.constant 0 : i32
    %c0_i32_2 = arith.constant 0 : i32
    return %arg1, %c0_i32, %c0_i32_0, %c0_i32_1 : i32, i32, i32, i32
  }
  func.func @transform_11(%arg0: i32, %arg1: i32) -> (i32, i32, i32) {
    %c0_i32 = arith.constant 0 : i32
    %c0_i32_0 = arith.constant 0 : i32
    %c0_i32_1 = arith.constant 0 : i32
    return %arg1, %c0_i32, %c0_i32_0 : i32, i32, i32
  }
  func.func @transform_12(%arg0: i32, %arg1: i32) -> (i32, i32, i32) {
    %c0_i32 = arith.constant 0 : i32
    %c0_i32_0 = arith.constant 0 : i32
    %c0_i32_1 = arith.constant 0 : i32
    return %arg1, %c0_i32, %c0_i32_0 : i32, i32, i32
  }
  func.func @transform_13(%arg0: i32, %arg1: i32) -> (i32, i32, i32) {
    %c0_i32 = arith.constant 0 : i32
    %c0_i32_0 = arith.constant 0 : i32
    %c0_i32_1 = arith.constant 0 : i32
    return %arg1, %c0_i32, %c0_i32_0 : i32, i32, i32
  }
  func.func @transform_14(%arg0: i32, %arg1: i32) -> (i32, i32, i32) {
    %c0_i32 = arith.constant 0 : i32
    %c0_i32_0 = arith.constant 0 : i32
    %c0_i32_1 = arith.constant 0 : i32
    %c0_i32_2 = arith.constant 0 : i32
    return %c0_i32, %c0_i32_0, %c0_i32_1 : i32, i32, i32
  }
  func.func @transform_15(%arg0: i32, %arg1: i32) -> (i32, i32, i32) {
    %c0_i32 = arith.constant 0 : i32
    %c0_i32_0 = arith.constant 0 : i32
    %c0_i32_1 = arith.constant 0 : i32
    %c0_i32_2 = arith.constant 0 : i32
    return %c0_i32, %c0_i32_0, %c0_i32_1 : i32, i32, i32
  }
  func.func @transform_16(%arg0: i32, %arg1: i32) -> (i32, i32, i32) {
    %c0_i32 = arith.constant 0 : i32
    %c0_i32_0 = arith.constant 0 : i32
    %c0_i32_1 = arith.constant 0 : i32
    return %arg0, %c0_i32, %c0_i32_0 : i32, i32, i32
  }
  func.func @transform_17(%arg0: i32, %arg1: i32) -> (i32, i32, i32, i32) {
    %c0_i32 = arith.constant 0 : i32
    %c0_i32_0 = arith.constant 0 : i32
    %c0_i32_1 = arith.constant 0 : i32
    return %arg0, %arg1, %c0_i32, %c0_i32_0 : i32, i32, i32, i32
  }
}

</mosaic_0001>

<bundles_post_ra>
// kernel: neg.6
= control target key start
LH: loop header
LB: loop body
LE: loop exit
PB: predicated region body
PF: predicated region fallthrough
CT: control target
= control target key end

     0   :  { %s24_s0 = inlined_call_operand.vmem [shape: f32[4,1,32], index: 0, kind: input, shape index: {}]   ;;  %s25_s1 = inlined_call_operand.vmem [shape: f32[4,1,32], index: 1, kind: output, shape index: {}]  }
   0x1   :  { %v2_v0 = vld [vmem:[%s24_s0] sm:$0xf] }
   0x2   :  { %v5_v1 = vxor.u32 2147483648, %v2_v0 }
   0x4   :  { %7 = vst [vmem:[%s25_s1] sm:$0xf] %v5_v1 }

// kernel: decoder_forward.1
= control target key start
LH: loop header
LB: loop body
LE: loop exit
PB: predicated region body
PF: predicated region fallthrough
CT: control target
= control target key end

     0   :  { %s5501_s0 = inlined_call_operand.hbm [shape: f32[2,16,32], index: 0, kind: input, shape index: {}]   ;;  %s5502_s1 = inlined_call_operand.hbm [shape: f32[2,16,64], index: 1, kind: input, shape index: {}]   ;;  %s5503_s2 = inlined_call_operand.vmem [shape: f32[2,1,32], index: 2, kind: input, shape index: {}, may-alias: {2,3}]   ;;  %s5504_s3 = inlined_call_operand.vmem [shape: f32[2,1,32], index: 3, kind: input, shape index: {}, may-alias: {2,3}]   ;;  %s5505_s4 = inlined_call_operand.hbm [shape: f32[2,32,1152], index: 4, kind: input, shape index: {}]   ;;  %s5506_s5 = inlined_call_operand.hbm [shape: f32[2,1,1792], index: 5, kind: input, shape index: {}]   ;;  %s5507_s6 = inlined_call_operand.vmem [shape: f32[2,64,64], index: 6, kind: input, shape index: {}]   ;;  %s5508_s7 = inlined_call_operand.vmem [shape: f32[2,128,32], index: 7, kind: input, shape index: {}]   ;;  %s5509_s8 = inlined_call_operand.vmem [shape: f32[2,5,32,32], index: 8, kind: input, shape index: {}]   ;;  %s5510_s9 = inlined_call_operand.vmem [shape: f32[2,3,32,23], index: 9, kind: input, shape index: {}]   ;;  %s5511_s10 = inlined_call_operand.vmem [shape: f32[2,3,3,16], index: 10, kind: input, shape index: {}]   ;;  %s5512_s11 = inlined_call_operand.hbm [shape: f32[2,16,16], index: 11, kind: input, shape index: {}]   ;;  %s5513_s12 = inlined_call_operand.vmem [shape: f32[2,16,256], index: 12, kind: input, shape index: {}]   ;;  %s5514_s13 = inlined_call_operand.vmem [shape: f32[2,3,32], index: 13, kind: input, shape index: {}]   ;;  %s5515_s14 = inlined_call_operand.vmem [shape: f32[2,32,32], index: 14, kind: input, shape index: {}]   ;;  %s5516_s15 = inlined_call_operand.vmem [shape: f32[3,16,3], index: 15, kind: input, shape index: {}]   ;;  %s5517_s16 = inlined_call_operand.hbm [shape: f32[2,16,32], index: 16, kind: output, shape index: {0}]   ;;  %s5518_s17 = inlined_call_operand.vmem [shape: f32[2,2,16,128], index: 17, kind: output, shape index: {1}]  }
   0x1   :  { %5551 = sst [smem:[#allocation37_spill]] %s5501_s0 }
   0x2   :  { %5552 = sst [smem:[#allocation38_spill]] %s5502_s1 }
   0x3   :  { %5553 = sst [smem:[#allocation39_spill]] %s5503_s2 }
   0x4   :  { %5554 = sst [smem:[#allocation40_spill]] %s5504_s3 }
   0x5   :  { %5555 = sst [smem:[#allocation41_spill]] %s5505_s4 }
   0x6   :  { %5556 = sst [smem:[#allocation42_spill]] %s5506_s5 }
   0x7   :  { %5557 = sst [smem:[#allocation43_spill]] %s5507_s6 }
   0x8   :  { %5558 = sst [smem:[#allocation44_spill]] %s5508_s7 }
   0x9   :  { %5559 = sst [smem:[#allocation45_spill]] %s5509_s8 }
   0xa   :  { %5560 = sst [smem:[#allocation46_spill]] %s5510_s9 }
   0xb   :  { %5561 = sst [smem:[#allocation47_spill]] %s5511_s10 }
   0xc   :  { %5562 = sst [smem:[#allocation48_spill]] %s5512_s11 }
   0xd   :  { %5563 = sst [smem:[#allocation49_spill]] %s5513_s12 }
   0xe   :  { %5564 = sst [smem:[#allocation50_spill]] %s5514_s13 }
   0xf   :  { %5565 = sst [smem:[#allocation51_spill]] %s5515_s14 }
  0x10   :  { %5566 = sst [smem:[#allocation52_spill]] %s5516_s15 }
  0x11   :  { %5567 = sst [smem:[#allocation53_spill]] %s5517_s16 }
  0x12   :  { %5568 = sst [smem:[#allocation54_spill]] %s5518_s17 }
  0x13   :  { %23 = vsyncpa [#allocation4], 0 }
  0x14   :  { %25 = vsyncpa [#allocation4 + $0x1], 0 }
  0x15   :  { %26 = vsyncpa [#allocation7], 0 }
  0x16   :  { %28 = vsyncpa [#allocation7 + $0x1], 0 }
  0x17   :  { %29 = vsyncpa [#allocation10], 0 }
  0x18   :  { %31 = vsyncpa [#allocation10 + $0x1], 0 }
  0x19   :  { %32 = vsyncpa [#allocation5], 0 }
  0x1a   :  { %34 = vsyncpa [#allocation5 + $0x1], 0  ;;  %s4553_s24 = smov 0   ;;  %s4555_s25 = smov 0  }
  0x1b   :  { %s4557_s26 = smov 0   ;;  %s4559_s27 = smov 0  }
  0x1c   :  { %s4561_s28 = smov 0   ;;  %s4563_s29 = smov 0  }
  0x1d   :  { %s4565_s0 = smov 0   ;;  %s4567_s30 = smov 0  }
  0x1e   :  { %s4569_s18 = smov 0   ;;  %s4571_s19 = smov 0  }
  0x1f   :  { %s4573_s1 = smov 0  }
  0x20 LB: > { %5569 = sst [smem:[#allocation18_spill]] %s4404_s25  ;;  %s3675_s20 = sadd.s32 4294967294, %s4440_s1   ;;  %s4440_s1 = sphi %s4573_s1, %s40_s1   ;;  %s4436_s19 = sphi %s4571_s19, %s5654_s19   ;;  %s4432_s18 = sphi %s4569_s18, %s5653_s18   ;;  %s4428_s30 = sphi %s4567_s30, %s5652_s30   ;;  %s4424_s0 = sphi %s4565_s0, %s5651_s0   ;;  %s4420_s29 = sphi %s4563_s29, %s5650_s29   ;;  %s4416_s28 = sphi %s4561_s28, %s5649_s28   ;;  %s4412_s27 = sphi %s4559_s27, %s5648_s27   ;;  %s4408_s26 = sphi %s4557_s26, %s5647_s26   ;;  %s4404_s25 = sphi %s4555_s25, %s5646_s25   ;;  %s4400_s24 = sphi %s4553_s24, %s5645_s24  }
  0x21   : > { %5570 = sst [smem:[#allocation19_spill]] %s4408_s26  ;;  %p5530_p0 = scmp.ne.s32.totalorder %s4420_s29, %s4416_s28 }
  0x22   : > { %5571 = sst [smem:[#allocation20_spill]] %s4412_s27  ;;  %p67_p1 = scmp.eq.s32.totalorder %s4440_s1, 0 }
  0x23   : > { %5572 = sst [smem:[#allocation21_spill]] %s4416_s28  ;;  %p72_p2 = scmp.ne.s32.totalorder %s4416_s28, %s4412_s27 }
  0x24   : > { %5573 = sst [smem:[#allocation22_spill]] %s4420_s29  ;;  %p482_p3 = scmp.eq.s32.totalorder %s3675_s20, 3 }
  0x25   : > { %5574 = sst [smem:[#allocation23_spill]] %s4424_s0  ;;  %p68_p4 = por %p67_p1, %p5530_p0 }
  0x26   : > { %5575 = sst [smem:[#allocation24_spill]] %s4428_s30  ;;  %p5526_p5 = scmp.lt.s32.totalorder %s4440_s1, 4 }
  0x27   : > { %5576 = sst [smem:[#allocation25_spill]] %s4432_s18  ;;  %p4625_p6 = por %p482_p3, %p72_p2 }
  0x28   : > { %5577 = sst [smem:[#allocation26_spill]] %s4436_s19  ;;  %s5523_s16 = sand.u32 1, %s4420_s29  }
  0x29   : > { %5578 = sst [smem:[#allocation27_spill]] %s4440_s1  ;;  %s4632_s21 = sshll.u32 %s5523_s16, 4 }
  0x2a   : > { %s5579_s23 = scalar_select %p4625_p6, 1, 0 }
  0x2b   : > { %s5529_s22 = sshll.u32 %s4436_s19, 4  ;;  %p4637_p7 = pnand %p5526_p5, %p68_p4 }
  0x2c   : > { %5580 = sst [smem:[#allocation28_spill]] %s5579_s23  ;;  %s5531_s15 = sand.u32 1, %s4440_s1  }
  0x2d   : > { %s5582_s17 = sld [smem:[#allocation38_spill]]  ;;  %s562_s16 = scalar_lea.vmem [#allocation6], %s4632_s21 }
  0x2e   : > { %s570_s9 = sshll.u32 %s562_s16, 4  ;;  %s4650_s8 = scalar_lea.sflag [#allocation7], %s5531_s15  ;;  %s571_s9 = int_to_ptr.vmem [resolvable:$true] %s570_s9 }
  0x2f   : > { %s5524_s12 = smov 128   ;;  %s5527_s14 = smov 8  }
  0x30   : > { %p3688_p8 = scmp.ge.s32.totalorder %s4440_s1, 1  ;;  %p708_p9 = scmp.lt.s32.totalorder %s4440_s1, 5 }
  0x31   : > { %s4665_s16 = sadd.s32 4294967295, %s4440_s1   ;;  %p170_p3 = scmp.ne.s32.totalorder %s4408_s26, %s4404_s25 }
  0x32   : > { %p4660_p10 = pnand %p3688_p8, %p708_p9  ;;  %p73_p11 = scmp.eq.s32.totalorder %s4665_s16, 0 }
  0x33   : > { %s567_s13 = scalar_lea.hbm %s5582_s17, %s5529_s22  ;;  %s49_s17 = sadd.s32 1, %s4432_s18 }
  0x34   : > { %s568_s10 = sshll.u32 %s567_s13, 4  ;;  %p50_p12 = scmp.ge.s32.totalorder %s49_s17, 2  ;;  %s569_s10 = int_to_ptr.hbm [resolvable:$true] %s568_s10 }
  0x35   : > { %3886 = dma.hbm_to_vmem [thread:$0]  (!%p4637_p7), %s569_s10, 256, %s571_s9, %s4650_s8, %s5524_s12, %s5524_s12, %s5527_s14  }
  0x36   : > { %s163_s9 = sadd.s32 1, %s4408_s26  ;;  %p4675_p13 = por %p73_p11, %p72_p2 }
  0x37   : > { %s5656_s17 = smov (%p50_p12, %s49_s17), 0  ;;  %s5586_s23 = sadd.s32 1, %s4436_s19 }
  0x38   : > { %5585 = sst [smem:[#allocation29_spill]] %s5656_s17  ;;  %s5658_s23 = smov (!%p50_p12, %s5586_s23), %s4436_s19 }
  0x39   : > { %s160_s12 = ssub.s32 %s4432_s18, %s5656_s17  ;;  %p172_p4 = por %p170_p3, %p67_p1 }
  0x3a   : > { %p54_p8 = scmp.ge.s32.totalorder %s5658_s23, 2  ;;  %p161_p9 = scmp.eq.s32.totalorder %s160_s12, 0 }
  0x3b   : > { %p176_p2 = scmp.ne.s32.totalorder %s4404_s25, %s4400_s24  ;;  %p476_p5 = scmp.eq.s32.totalorder %s4665_s16, 3 }
  0x3c   : > { %s5660_s23 = smov (%p54_p8, %s5658_s23), 0  ;;  %p5591_p6 = scmp.ne.s32.totalorder %s4420_s29, %s4416_s28 }
  0x3d   : > { %5587 = sst [smem:[#allocation30_spill]] %s5660_s23  ;;  %s56_s22 = ssub.s32 %s4436_s19, %s5660_s23 }
  0x3e   : > { %s4696_s14 = scalar_select %p161_p9, %s4408_s26, %s163_s9  }
  0x3f   : > { %p4702_p0 = por %p176_p2, %p73_p11  ;;  %p57_p12 = scmp.eq.s32.totalorder %s56_s22, 0 }
  0x40   : > { %5588 = sst [smem:[#allocation31_spill]] %s4696_s14  ;;  %p4709_p1 = por %p476_p5, %p5591_p6 }
  0x41   : > { %s5589_s15 = scalar_select %p4702_p0, 1, 0 }
  0x42   : > { %s5592_s17 = scalar_select %p4709_p1, 1, 0 }
  0x43   : > { %5590 = sst [smem:[#allocation32_spill]] %s5589_s15  ;;  %s594_s12 = sand.u32 1, %s4408_s26  }
  0x44   : > { %5593 = sst [smem:[#allocation33_spill]] %s5592_s17  ;;  %p5594_p3 = scmp.lt.s32.totalorder %s4440_s1, 4 }
  0x45   : > { %s5596_s9 = sadd.s32 1, %s4420_s29  ;;  %s3859_s14 = smul.u32 288, %s594_s12 }
  0x46   : > { %p4716_p8 = pnand %p5594_p3, %p172_p4  ;;  %s3861_s27 = smul.u32 14, %s594_s12 }
  0x47   : > { %s4723_s23 = scalar_select %p57_p12, %s4420_s29, %s5596_s9  }
  0x48   : > { %s3862_s22 = smul.u32 14, %s4432_s18  ;;  %s596_s7 = scalar_lea.vmem [#allocation8], %s3859_s14 }
  0x49   : > { %5597 = sst [smem:[#allocation34_spill]] %s4723_s23  ;;  %s604_s6 = sshll.u32 %s596_s7, 4  ;;  %s605_s6 = int_to_ptr.vmem [resolvable:$true] %s604_s6 }
  0x4a   : > { %s5598_s5 = sld [smem:[#allocation42_spill]]  ;;  %s618_s0 = scalar_lea.vmem [#allocation9], %s3861_s27 }
  0x4b   : > { %s626_s30 = sshll.u32 %s618_s0, 4  ;;  %s5599_s9 = sand.u32 1, %s4440_s1   ;;  %s627_s30 = int_to_ptr.vmem [resolvable:$true] %s626_s30 }
  0x4c   : > { %s4731_s23 = scalar_lea.sflag [#allocation10], %s5599_s9  ;;  %s3685_s14 = sshll.u32 %s594_s12, 4 }
  0x4d   : > { %s677_s7 = scalar_lea.vmem [#allocation11], %s3685_s14  ;;  %s5600_s3 = sshll.u32 %s4436_s19, 4 }
  0x4e   : > { %s685_s2 = sshll.u32 %s677_s7, 4  ;;  %s5603_s9 = smov 8   ;;  %s686_s2 = int_to_ptr.vmem [resolvable:$true] %s685_s2 }
  0x4f   : > { %s5604_s14 = smov 128   ;;  %s5605_s4 = sld [smem:[#allocation41_spill]] }
  0x50   : > { %s622_s26 = scalar_lea.hbm %s5598_s5, %s3862_s22  ;;  %s5601_s22 = sld [smem:[#allocation37_spill]] }
  0x51   : > { %s624_s17 = sshll.u32 %s622_s26, 4  ;;  %s540_s5 = scalar_lea.vmem [#allocation3], %s4632_s21  ;;  %s625_s17 = int_to_ptr.hbm [resolvable:$true] %s624_s17 }
  0x52   : > { %3892 = dma.hbm_to_vmem [thread:$0]  (!%p4716_p8), %s625_s17, 224, %s627_s30, %s4731_s23  }
  0x53   : > { %s548_s15 = sshll.u32 %s540_s5, 4  ;;  %s3860_s30 = smul.u32 288, %s4432_s18  ;;  %s549_s15 = int_to_ptr.vmem [resolvable:$true] %s548_s15 }
  0x54   : > { %s5602_s17 = sand.u32 1, %s4420_s29   ;;  %s3854_s5 = sshll.u32 %s4432_s18, 4 }
  0x55   : > { %s537_s12 = scalar_lea.sflag [#allocation4], %s5602_s17  ;;  %s601_s27 = scalar_lea.hbm %s5605_s4, %s3860_s30 }
  0x56   : > { %s545_s0 = scalar_lea.hbm %s5601_s22, %s5600_s3  ;;  %s602_s3 = sshll.u32 %s601_s27, 4  ;;  %s603_s3 = int_to_ptr.hbm [resolvable:$true] %s602_s3 }
  0x57   : > { %s546_s1 = sshll.u32 %s545_s0, 4  ;;  %s4444_s21 = smov 1152   ;;  %s547_s1 = int_to_ptr.hbm [resolvable:$true] %s546_s1 }
  0x58   : > { %3883 = dma.hbm_to_vmem [thread:$0]  (!%p4637_p7), %s547_s1, 256, %s549_s15, %s537_s12, %s5604_s14, %s5604_s14, %s5603_s9  }
  0x59   : > { %s4445_s22 = smov 72   ;;  %s5606_s11 = sld [smem:[#allocation48_spill]] }
  0x5a   : > { %3889 = dma.hbm_to_vmem [thread:$0]  (!%p4716_p8), %s603_s3, 4608, %s605_s6, %s4650_s8, %s4444_s21, %s4444_s21, %s4445_s22  }
  0x5d   : > { %712 = sbr.rel (%p4660_p10) target bundleno = 4563 (0x11d3), region = 84 }
  0x5f   : > { %s682_s20 = scalar_lea.hbm %s5606_s11, %s3854_s5 }
  0x60   : > { %s683_s17 = sshll.u32 %s682_s20, 4  ;;  %s684_s17 = int_to_ptr.hbm [resolvable:$true] %s683_s17 }
  0x61   : > { %3895 = dma.hbm_to_vmem [thread:$0]  (!%p4716_p8), %s684_s17, 256, %s686_s2, %s4731_s23, %s5604_s14, %s5604_s14, %s5603_s9  }
  0x62   : > { %s4769_s15 = sand.u32 1, %s4416_s28  }
  0x63   : > { %5607 = sst [smem:[#allocation35_spill]] %s4769_s15  ;;  %s4772_s6 = sshll.u32 %s4769_s15, 4 }
  0x64   : > { %s715_s8 = scalar_lea.sflag [#allocation4], %s4769_s15 }
  0x65   : > { %4379 = dma.done.wait (%p4675_p13), %s715_s8, 256  }
  0x66   : > { %4381 = vsyncadd (%p4675_p13), %s715_s8, 4294967040  ;;  %s724_s1 = sand.u32 1, %s4665_s16  }
  0x67   : > { %s725_s13 = scalar_lea.sflag [#allocation7], %s724_s1 }
  0x68   : > { %4383 = dma.done.wait (%p4675_p13), %s725_s13, 256  }
  0x69   : > { %4385 = vsyncadd (%p4675_p13), %s725_s13, 4294967040  ;;  %s4787_s2 = sand.u32 1, %s4404_s25  }
  0x6a   : > { %s3863_s30 = smul.u32 288, %s4787_s2 }
  0x6c   : > { %s4790_s12 = scalar_lea.vmem [#allocation8], %s3863_s30 }
  0x6d   : > { %4387 = dma.done.wait (%p4702_p0), %s725_s13, 4608  }
  0x6e   : > { %4389 = vsyncadd (%p4702_p0), %s725_s13, 4294962688  ;;  %s3864_s16 = smul.u32 14, %s4787_s2  ;;  %s745_s9 = scalar_lea.sflag [#allocation10], %s724_s1 }
  0x70   : > { %s4797_s14 = scalar_lea.vmem [#allocation9], %s3864_s16 }
  0x71   : > { %4391 = dma.done.wait (%p4702_p0), %s745_s9, 480  }
  0x72   : > { %4393 = vsyncadd (%p4702_p0), %s745_s9, 4294966816  ;;  %s5609_s10 = sld [smem:[#allocation24_spill]]  ;;  %s3691_s26 = sshll.u32 %s4787_s2, 4 }
  0x73   : > { %s5610_s7 = sld [smem:[#allocation23_spill]] }
  0x74   : > { %s5613_s30 = sld [smem:[#allocation43_spill]] }
  0x75   : > { %s5614_s19 = sld [smem:[#allocation44_spill]] }
  0x76   : > { %s5615_s20 = sld [smem:[#allocation49_spill]] }
  0x77   : > { %s5616_s18 = sld [smem:[#allocation45_spill]] }
  0x78   : > { %p879_p5 = scmp.lt.s32.totalorder %s5609_s10, 1  ;;  %s5618_s23 = sld [smem:[#allocation46_spill]] }
  0x79   : > { %p885_p6 = scmp.lt.s32.totalorder %s5610_s7, 1  ;;  %s5619_s28 = sld [smem:[#allocation47_spill]] }
  0x7a   : > { %s5662_s10 = smov (!%p879_p5, %s5609_s10), 1  ;;  %s5620_s0 = sld [smem:[#allocation50_spill]] }
  0x7b   : > { %s886_s27 = scalar_select %p885_p6, %s5610_s7, 1 }
  0x7c   : > { %s5621_s2 = sld [smem:[#allocation54_spill]]  ;;  %p3706_p0 = scmp.ne.s32.totalorder %s5610_s7, 0 }
  0x7d   : > { %s3855_s1 = sshll.u32 %s886_s27, 6  ;;  %s3856_s13 = sshll.u32 %s886_s27, 7 }
  0x7e   : > { %s4821_s16 = scalar_lea.vmem %s5613_s30, %s3855_s1  ;;  %s4826_s4 = scalar_lea.vmem %s5614_s19, %s3856_s13 }
  0x7f   : > { %s3865_s11 = smul.u32 160, %s886_s27  ;;  %s3857_s3 = sshll.u32 %s886_s27, 5 }
  0x80   : > { %s3866_s5 = smul.u32 96, %s886_s27  ;;  %s4831_s17 = scalar_lea.vmem %s5615_s20, %s3857_s3 }
  0x81   : > { %s4836_s24 = scalar_lea.vmem %s5616_s18, %s3865_s11  ;;  %s3867_s1 = smul.u32 12, %s886_s27 }
  0x82   : > { %5617 = sst [smem:[#allocation36_spill]] %s4836_s24  ;;  %s4841_s19 = scalar_lea.vmem %s5618_s23, %s3866_s5 }
  0x83   : > { %s3702_s13 = sshll.u32 %s886_s27, 2  ;;  %s4846_s25 = scalar_lea.vmem %s5619_s28, %s3867_s1 }
  0x84   : > { %s4851_s20 = scalar_lea.vmem %s5620_s0, %s3702_s13  ;;  %s3703_s22 = sshll.u32 %s886_s27, 1 }
  0x85   : > { %s3704_s11 = sshll.u32 %s5662_s10, 2  ;;  %s4859_s30 = scalar_lea.vmem [#allocation11], %s3691_s26 }
  0x86   : > { %s925_s18 = sadd.s32 %s3704_s11, %s3703_s22  ;;  %s4862_s23 = scalar_lea.vmem [#allocation12], %s4772_s6 }
  0x87   : > { %s3705_s8 = sshll.u32 %s925_s18, 3  ;;  %931 = sbr.rel (%p3706_p0) target bundleno = 143 (0x8f), region = 108 }
  0x88   : > { %s4857_s5 = scalar_lea.vmem %s5621_s2, %s3705_s8  ;;  %s5622_s28 = scalar_lea.vmem (!%p3706_p0), [#allocation3], %s4772_s6 }
  0x89   : > { %s5623_s29 = smov (!%p3706_p0), %s5622_s28 }
  0x8c   : > { %v932_v0 = vld [vmem:[%s5622_s28] sm:$0xff]  ;;  %vm934_vm0 = vcmask 261120  }
  0x8d   : > { %v933_v1 = vld [vmem:[%s5623_s29 + $0x8] sm:$0xff]  ;;  %935 = vst.msk [vmem:[%s4862_s23] sm:$0xff] %vm934_vm0, %v932_v0 }
  0x8e   : > { %936 = vst.msk [vmem:[%s4862_s23 + $0x8] sm:$0xff] %vm934_vm0, %v933_v1 }
  0x8f PF: > { %vm948_vm1 = vcmask 261120   ;;  %v946_v3 = vld [vmem:[%s4790_s12 + $0xd8] sm:$0xff]  ;;  %v945_v5 = vld [vmem:[%s4790_s12 + $0x90] sm:$0xff]  ;;  %v944_v6 = vld [vmem:[%s4790_s12 + $0x48] sm:$0xff]  ;;  %s5624_s26 = sld [smem:[#allocation39_spill]]  ;;  %v4446_v11 = vmov 32.0  }
  0x90   : > { %964 = vmatpush.msra.mxu0 %v946_v3  ;;  %v943_v8 = vld [vmem:[%s4790_s12] sm:$0xff]  ;;  %4062 = vrcp.f32 %v4446_v11  ;;  %s4447_s24 = smov 96   ;;  %v1036_v33 = vld [vmem:[%s4790_s12 + $0x98] sm:$0xff]  ;;  %v1035_v34 = vld [vmem:[%s4790_s12 + $0x50] sm:$0xff]  ;;  %s4448_s1 = smov 64   ;;  %vm1082_vm9 = vcmask 64512  }
  0x91   : > { %v947_v27 = vld [vmem:[%s4797_s14] sm:$0x1]  ;;  %v4051_v1 = vld [vmem:[%s4797_s14 + $0x1] ss:$0 sm:$0xff]  ;;  %s4449_s13 = smov 88   ;;  %s4450_s9 = smov 120  }
  0x92   : > { %965 = vmatpush.msra.mxu0 %v945_v5  ;;  %v1037_v32 = vld [vmem:[%s4790_s12 + $0xe0] sm:$0xff]  ;;  %v1034_v35 = vld [vmem:[%s4790_s12 + $0x8] sm:$0xff]  ;;  %s4451_s21 = smov 72   ;;  %s4452_s3 = smov 80   ;;  %vm1116_vm10 = vcmask 130048  }
  0x93   : > { %1060 = vmatpush.msra.mxu1 %v1037_v32  ;;  %s4453_s0 = smov 112   ;;  %s4454_s22 = smov 104  }
  0x94   : > { %v4872_v2 = vld [vmem:[%s4862_s23] sm:$0xff]  ;;  %966 = vmatpush.msra.mxu0 %v944_v6  ;;  %s4455_s11 = smov 56   ;;  %s4456_s18 = smov 48  }
  0x95   : > { %v972_v4 = vsel %vm948_vm1, %v4872_v2, 0.0  ;;  %v4880_v7 = vld [vmem:[%s4862_s23 + $0x8] sm:$0xff]  ;;  %s5625_s27 = scalar_lea.vmem %s5624_s26, %s5662_s10  ;;  %1061 = vmatpush.msra.mxu1 %v1036_v33  ;;  %s4457_s8 = smov 40  }
  0x96   : > { %973 = vadd.xlane.f32.xlu0 %v972_v4  ;;  %v941_v9 = vld [vmem:[%s5625_s27] sm:$0x1]  ;;  %v975_v10 = vsel %vm948_vm1, %v4880_v7, 0.0  ;;  %967 = vmatpush.msra.mxu0 %v943_v8  ;;  %v4063_v12 = vpop.eup %4062  ;;  %s5626_s29 = sld [smem:[#allocation40_spill]]  ;;  %s3355_s28 = sshll.u32 %s4862_s23, 4  ;;  %s3356_s28 = int_to_ptr.vmem [resolvable:$true] %s3355_s28 }
  0x97   : > { %3707 = vmatmul.msk.f32.vlgmr.msra.gmra.mxu0 %vm948_vm1, %v941_v9  ;;  %v979_v13 = vmul.f32 32.0, %v4063_v12  ;;  %vm983_vm2 = vweird.f32 %v4063_v12  ;;  %1062 = vmatpush.msra.mxu1 %v1035_v34  ;;  %s5632_s26 = sld [smem:[#allocation51_spill]] }
  0x98   : > { %s5640_s2 = sld [smem:[#allocation53_spill]] }
  0x99   : > { %v980_v14 = vsub.f32 1.0, %v979_v13  ;;  %1063 = vmatpush.msra.mxu1 %v1034_v35 }
  0x9b   : > { %v981_v15 = vmul.f32 %v4063_v12, %v980_v14 }
  0x9c   : > { %s5627_s15 = scalar_lea.vmem %s5626_s29, %s5662_s10  ;;  %s5628_s10 = scalar_lea.vmem [#allocation6], %s4772_s6 }
  0x9d   : > { %v982_v16 = vadd.f32 %v4063_v12, %v981_v15  ;;  %s5629_s7 = smov %s5628_s10  ;;  %s5634_s29 = sld [smem:[#allocation52_spill]] }
  0x9e   : > { %976 = vadd.xlane.f32.xlu0 %v975_v10 }
  0x9f   : > { %v4891_v17 = vsel %vm983_vm2, %v4063_v12, %v982_v16 }
 0x109   : > { %v974_v18 = vpop.xlane.xlu0 %973 }
 0x10a   : > { %v985_v19 = vmul.f32 %v4891_v17, %v974_v18 }
 0x10c   : > { %v987_v20 = vsub.f32 %v4872_v2, %v985_v19 }
 0x10e   : > { %v989_v21 = vmul.f32 %v987_v20, %v987_v20 }
 0x110   : > { %v991_v22 = vsel %vm948_vm1, %v989_v21, 0.0  ;;  %v1071_v21 = vld [vmem:[%s4790_s12 + $0x10] sm:$0xff] }
 0x111   : > { %992 = vadd.xlane.f32.xlu1 %v991_v22  ;;  %v977_v23 = vpop.xlane.xlu0 %976 }
 0x112   : > { %v986_v24 = vmul.f32 %v4891_v17, %v977_v23 }
 0x114   : > { %v988_v25 = vsub.f32 %v4880_v7, %v986_v24  ;;  %v969_v29 = vpop.f32.mrf.mxu0 }
 0x115   : > { %v970_v30 = vadd.f32 %v969_v29, %v947_v27 }
 0x116   : > { %v990_v26 = vmul.f32 %v988_v25, %v988_v25 }
 0x117   : > { %v1027_v31 = vperm.slane %v970_v30, 0  ;;  %v1023_v48 = vadd.f32 1.0, %v970_v30 }
 0x118   : > { %v994_v28 = vsel %vm948_vm1, %v990_v26, 0.0 }
 0x119   : > { %995 = vadd.xlane.f32.xlu1 %v994_v28  ;;  %1029 = vrot.lane.b32.xlu2 %v1027_v31, %s4447_s24  ;;  %v1024_v53 = vperm.slane %v1023_v48, 0 }
 0x173   : > { %v1030_v56 = vpop.permute.xlu2 %1029 }
 0x184   : > { %v993_v36 = vpop.xlane.xlu1 %992 }
 0x185   : > { %v997_v37 = vmul.f32 %v993_v36, %v4891_v17 }
 0x187   : > { %v999_v38 = vadd.f32 1e-05, %v997_v37 }
 0x189   : > { %4064 = vrsqrt.f32 %v999_v38  ;;  %vm1007_vm4 = vweird.f32 %v999_v38 }
 0x18c   : > { %v996_v39 = vpop.xlane.xlu1 %995 }
 0x18d   : > { %v998_v40 = vmul.f32 %v996_v39, %v4891_v17 }
 0x18f   : > { %v4065_v41 = vpop.eup %4064  ;;  %v1000_v42 = vadd.f32 1e-05, %v998_v40 }
 0x190   : > { %v1002_v43 = vmul.f32 %v4065_v41, %v999_v38  ;;  %vm1008_vm3 = vweird.f32 %v4065_v41 }
 0x191   : > { %4066 = vrsqrt.f32 %v1000_v42  ;;  %vm1009_vm5 = vmor %vm1007_vm4, %vm1008_vm3  ;;  %vm1017_vm6 = vweird.f32 %v1000_v42 }
 0x192   : > { %v1003_v44 = vmul.f32 %v4065_v41, %v1002_v43 }
 0x194   : > { %v1004_v45 = vmul.f32 0.5, %v1003_v44 }
 0x196   : > { %v1005_v46 = vsub.f32 1.5, %v1004_v45 }
 0x197   : > { %v4067_v47 = vpop.eup %4066 }
 0x198   : > { %v1006_v49 = vmul.f32 %v4065_v41, %v1005_v46  ;;  %v1012_v50 = vmul.f32 %v4067_v47, %v1000_v42  ;;  %vm1018_vm7 = vweird.f32 %v4067_v47 }
 0x199   : > { %vm1019_vm8 = vmor %vm1017_vm6, %vm1018_vm7 }
 0x19a   : > { %v1013_v51 = vmul.f32 %v4067_v47, %v1012_v50  ;;  %v1010_v52 = vsel %vm1009_vm5, %v4065_v41, %v1006_v49 }
 0x19b   : > { %v1021_v54 = vmul.f32 %v1010_v52, %v987_v20 }
 0x19c   : > { %v1014_v55 = vmul.f32 0.5, %v1013_v51 }
 0x19d   : > { %v1025_v57 = vmul.f32 %v1024_v53, %v1021_v54 }
 0x19e   : > { %v1015_v58 = vsub.f32 1.5, %v1014_v55 }
 0x19f   : > { %v1032_v59 = vadd.f32 %v1030_v56, %v1025_v57 }
 0x1a0   : > { %v1016_v60 = vmul.f32 %v4067_v47, %v1015_v58 }
 0x1a1   : > { %3708 = vmatmul.msk.f32.vlgmr.msra.gmra.mxu1 %vm948_vm1, %v1032_v59 }
 0x1a2   : > { %v1020_v61 = vsel %vm1019_vm8, %v4067_v47, %v1016_v60 }
 0x1a3   : > { %v1022_v62 = vmul.f32 %v1020_v61, %v988_v25 }
 0x1a5   : > { %v1026_v63 = vmul.f32 %v1024_v53, %v1022_v62 }
 0x1a7   : > { %v1033_v0 = vadd.f32 %v1030_v56, %v1026_v63 }
 0x1a9   : > { %3709 = vmatmul.msk.f32.gmra.mxu1 %vm948_vm1, %v1033_v0 }
 0x21e   : > { %v1065_v3 = vpop.f32.mrf.mxu1 }
 0x21f   : > { %v4910_v4 = vadd.f32 %v4051_v1, %v1065_v3 }
 0x221   : > { %1078 = vrot.lane.b32.xlu0 %v4910_v4, %s4447_s24 }
 0x226   : > { %v1068_v5 = vpop.f32.mrf.mxu1 }
 0x227   : > { %v4914_v6 = vadd.f32 %v4051_v1, %v1068_v5 }
 0x229   : > { %1080 = vrot.lane.b32.xlu2 %v4914_v6, %s4447_s24  ;;  %v4920_v8 = vpack.i.bf16 %v4910_v4, %v4914_v6 }
 0x22b   : > { %4012 = vrot.lane.b32.xlu0 %v4920_v8, %s4448_s1 }
 0x233   : > { %1204 = vrot.lane.b32.xlu0 %v4910_v4, %s4449_s13 }
 0x23b   : > { %1200 = vrot.lane.b32.xlu0 %v4910_v4, %s4450_s9 }
 0x243   : > { %1202 = vrot.lane.b32.xlu0 %v4914_v6, %s4450_s9 }
 0x24b   : > { %1541 = vrot.lane.b32.xlu0 %v4910_v4, %s4451_s21 }
 0x253   : > { %1386 = vrot.lane.b32.xlu0 %v4910_v4, %s4452_s3 }
 0x25b   : > { %1384 = vrot.lane.b32.xlu0 %v4914_v6, %s4453_s0 }
 0x283   : > { %v1081_v9 = vpop.permute.xlu2 %1080 }
 0x284   : > { %3710 = vmatpush.xpose.msk.msra.mxu2 %vm1082_vm9, %v1081_v9 }
 0x293   : > { %v1079_v10 = vpop.permute.xlu0 %1078 }
 0x294   : > { %3711 = vmatpush.xpose.msk.msra.mxu2 %vm1082_vm9, %v1079_v10 }
 0x297   : > { %3712 = vmatmul.msk.f32.vlgmr.msra.gmra.mxu2 %vm1082_vm9, %v4910_v4 }
 0x298   : > { %1374 = vmatpush.msrb.mxu2 %v1071_v21 }
 0x29d   : > { %v4013_v11 = vpop.permute.xlu0 %4012 }
 0x29e   : > { %v4014_v12 = vunpack.i.l.bf16 %v4013_v11  ;;  %v4015_v13 = vunpack.i.h.bf16 %v4013_v11 }
 0x29f   : > { %3713 = vmatmul.msk.f32.gmra.mxu2 %vm1082_vm9, %v4914_v6 }
 0x2a0   : > { %1191 = vmatpush.msra.mxu3 %v4014_v12 }
 0x2a2   : > { %1192 = vmatpush.msra.mxu3 %v4015_v13 }
 0x2a5   : > { %v4949_v22 = vpop.permute.xlu0 %1204 }
 0x2ad   : > { %v4951_v23 = vpop.permute.xlu0 %1200 }
 0x2b5   : > { %v1203_v29 = vpop.permute.xlu0 %1202 }
 0x2bd   : > { %v1542_v35 = vpop.permute.xlu0 %1541 }
 0x2c5   : > { %v1387_v63 = vpop.permute.xlu0 %1386 }
 0x2cd   : > { %v1385_v3 = vpop.permute.xlu0 %1384 }
 0x31a   : > { %v1108_v14 = vpop.f32.mrf.mxu2 }
 0x31b   : > { %v1114_v15 = vmul.f32 0.35355338, %v1108_v14 }
 0x31d   : > { %v1117_v16 = vsel %vm1116_vm10, %v1114_v15, -inf }
 0x31e   : > { %1118 = vmax.xlane.f32.xlu1 %v1117_v16 }
 0x322   : > { %v1111_v18 = vpop.f32.mrf.mxu2 }
 0x323   : > { %v1115_v19 = vmul.f32 0.35355338, %v1111_v18 }
 0x325   : > { %v1120_v20 = vsel %vm1116_vm10, %v1115_v19, -inf }
 0x326   : > { %1121 = vmax.xlane.f32.xlu2 %v1120_v20 }
 0x33e   : > { %1543 = vrot.lane.b32.xlu2 %v4914_v6, %s4451_s21 }
 0x346   : > { %1539 = vrot.lane.b32.xlu2 %v4914_v6, %s4454_s22 }
 0x391   : > { %v1119_v24 = vpop.xlane.xlu1 %1118 }
 0x392   : > { %v1123_v25 = vsub.f32 %v1114_v15, %v1119_v24 }
 0x394   : > { %v1125_v26 = vmul.f32 1.442695, %v1123_v25 }
 0x396   : > { %4068 = vpow2.f32 %v1125_v26 }
 0x399   : > { %v1122_v27 = vpop.xlane.xlu2 %1121 }
 0x39a   : > { %v1124_v28 = vsub.f32 %v1115_v19, %v1122_v27 }
 0x39c   : > { %v4069_v30 = vpop.eup %4068  ;;  %v1127_v31 = vmul.f32 1.442695, %v1124_v28 }
 0x39d   : > { %v1129_v32 = vsel %vm1116_vm10, %v4069_v30, 0.0 }
 0x39e   : > { %4070 = vpow2.f32 %v1127_v31  ;;  %1130 = vadd.xlane.f32.xlu1 %v1129_v32 }
 0x3a1   : > { %v1544_v33 = vpop.permute.xlu2 %1543 }
 0x3a2   : > { %3734 = vmatpush.xpose.msk.msra.mxu2 %vm1082_vm9, %v1544_v33 }
 0x3a4   : > { %v4071_v34 = vpop.eup %4070 }
 0x3a5   : > { %v1132_v36 = vsel %vm1116_vm10, %v4071_v34, 0.0 }
 0x3a6   : > { %1133 = vadd.xlane.f32.xlu1 %v1132_v36  ;;  %3735 = vmatpush.xpose.msk.msra.mxu2 %vm1082_vm9, %v1542_v35 }
 0x3a9   : > { %v1540_v13 = vpop.permute.xlu2 %1539 }
 0x3bf   : > { %1206 = vrot.lane.b32.xlu1 %v4914_v6, %s4449_s13 }
 0x3c7   : > { %1388 = vrot.lane.b32.xlu1 %v4914_v6, %s4452_s3 }
 0x3cf   : > { %1537 = vrot.lane.b32.xlu1 %v4910_v4, %s4454_s22 }
 0x3d7   : > { %1382 = vrot.lane.b32.xlu1 %v4910_v4, %s4453_s0 }
 0x411   : > { %v1131_v37 = vpop.xlane.xlu1 %1130 }
 0x412   : > { %4072 = vrcp.f32 %v1131_v37  ;;  %v1146_v42 = vand.u32 2147483648, %v1131_v37  ;;  %v1144_v44 = vand.u32 2147483647, %v1131_v37  ;;  %vm1140_vm12 = vweird.f32 %v1131_v37 }
 0x414   : > { %v1147_v47 = vor.u32 1.1754944e-38, %v1146_v42  ;;  %vm1145_vm14 = vcmp.eq.f32.partialorder %v1144_v44, 8.507059e+37 }
 0x418   : > { %v4073_v38 = vpop.eup %4072 }
 0x419   : > { %v1136_v39 = vmul.f32 %v4073_v38, %v1131_v37  ;;  %v1134_v40 = vpop.xlane.xlu1 %1133  ;;  %vm1141_vm11 = vweird.f32 %v4073_v38 }
 0x41a   : > { %4074 = vrcp.f32 %v1134_v40  ;;  %vm1142_vm13 = vmor %vm1140_vm12, %vm1141_vm11  ;;  %v1161_v53 = vand.u32 2147483648, %v1134_v40  ;;  %v1159_v55 = vand.u32 2147483647, %v1134_v40  ;;  %vm1155_vm0 = vweird.f32 %v1134_v40 }
 0x41b   : > { %v1137_v41 = vsub.f32 1.0, %v1136_v39 }
 0x41c   : > { %v1162_v57 = vor.u32 1.1754944e-38, %v1161_v53  ;;  %vm1160_vm3 = vcmp.eq.f32.partialorder %v1159_v55, 8.507059e+37 }
 0x41d   : > { %v1138_v43 = vmul.f32 %v4073_v38, %v1137_v41 }
 0x41f   : > { %v1139_v45 = vadd.f32 %v4073_v38, %v1138_v43 }
 0x420   : > { %v4075_v46 = vpop.eup %4074 }
 0x421   : > { %v1151_v48 = vmul.f32 %v4075_v46, %v1134_v40  ;;  %v1143_v49 = vsel %vm1142_vm13, %v4073_v38, %v1139_v45  ;;  %vm1156_vm15 = vweird.f32 %v4075_v46 }
 0x422   : > { %v1148_v50 = vsel %vm1145_vm14, %v1147_v47, %v1143_v49  ;;  %vm1157_vm2 = vmor %vm1155_vm0, %vm1156_vm15 }
 0x423   : > { %v1152_v51 = vsub.f32 1.0, %v1151_v48  ;;  %v1149_v52 = vmul.f32 %v4069_v30, %v1148_v50 }
 0x425   : > { %v1153_v54 = vmul.f32 %v4075_v46, %v1152_v51  ;;  %3714 = vmatmul.msk.f32.vlgmr.msra.gmra.mxu3 %vm1116_vm10, %v1149_v52 }
 0x427   : > { %v1154_v56 = vadd.f32 %v4075_v46, %v1153_v54 }
 0x429   : > { %v1158_v58 = vsel %vm1157_vm2, %v4075_v46, %v1154_v56 }
 0x42a   : > { %v1163_v59 = vsel %vm1160_vm3, %v1162_v57, %v1158_v58 }
 0x42b   : > { %v1164_v60 = vmul.f32 %v4071_v34, %v1163_v59 }
 0x42d   : > { %3715 = vmatmul.msk.f32.gmra.mxu3 %vm1116_vm10, %v1164_v60 }
 0x431   : > { %v1207_v61 = vpop.permute.xlu1 %1206 }
 0x432   : > { %3716 = vmatpush.xpose.msk.msrb.mxu0 %vm1082_vm9, %v1207_v61 }
 0x436   : > { %3717 = vmatpush.xpose.msk.msrb.mxu0 %vm1082_vm9, %v4949_v22 }
 0x439   : > { %v1389_v62 = vpop.permute.xlu1 %1388  ;;  %3718 = vmatmul.msk.f32.vlgmr.msrb.gmra.mxu0 %vm1082_vm9, %v4951_v23 }
 0x43a   : > { %3726 = vmatpush.xpose.msk.msra.mxu0 %vm1082_vm9, %v1389_v62 }
 0x43e   : > { %3727 = vmatpush.xpose.msk.msra.mxu0 %vm1082_vm9, %v1387_v63 }
 0x441   : > { %v1538_v0 = vpop.permute.xlu1 %1537  ;;  %3719 = vmatmul.msk.f32.gmra.mxu0 %vm1082_vm9, %v1203_v29 }
 0x449   : > { %v1383_v1 = vpop.permute.xlu1 %1382 }
 0x44a   : > { %3728 = vmatmul.msk.f32.vlgmr.msra.gmra.mxu0 %vm1082_vm9, %v1383_v1 }
 0x452   : > { %3729 = vmatmul.msk.f32.gmra.mxu0 %vm1082_vm9, %v1385_v3 }
 0x4a8   : > { %v1194_v4 = vpop.f32.mrf.mxu3 }
 0x4a9   : > { %3724 = vmatmul.msk.f32.vlgmr.msrb.gmra.mxu2 %vm1082_vm9, %v1194_v4 }
 0x4b0   : > { %v1197_v5 = vpop.f32.mrf.mxu3 }
 0x4b1   : > { %3725 = vmatmul.msk.f32.gmra.mxu2 %vm1082_vm9, %v1197_v5 }
 0x4b6   : > { %v1233_v6 = vpop.f32.mrf.mxu0 }
 0x4b7   : > { %v1239_v9 = vmul.f32 0.35355338, %v1233_v6 }
 0x4b9   : > { %3736 = vmatmul.msk.f32.vlgmr.msra.gmra.mxu2 %vm1082_vm9, %v1538_v0  ;;  %v1241_v10 = vsel %vm1116_vm10, %v1239_v9, -inf }
 0x4ba   : > { %1242 = vmax.xlane.f32.xlu1 %v1241_v10 }
 0x4be   : > { %v1236_v11 = vpop.f32.mrf.mxu0 }
 0x4bf   : > { %v1240_v12 = vmul.f32 0.35355338, %v1236_v11 }
 0x4c1   : > { %3737 = vmatmul.msk.f32.gmra.mxu2 %vm1082_vm9, %v1540_v13  ;;  %v1244_v14 = vsel %vm1116_vm10, %v1240_v12, -inf }
 0x4c2   : > { %1245 = vmax.xlane.f32.xlu2 %v1244_v14 }
 0x4c7   : > { %v1415_v15 = vpop.f32.mrf.mxu0 }
 0x4c8   : > { %v1421_v16 = vmul.f32 0.35355338, %v1415_v15 }
 0x4ca   : > { %v1423_v18 = vsel %vm1116_vm10, %v1421_v16, -inf }
 0x4cb   : > { %1424 = vmax.xlane.f32.xlu0 %v1423_v18 }
 0x4cf   : > { %v1418_v19 = vpop.f32.mrf.mxu0 }
 0x4d0   : > { %v1422_v20 = vmul.f32 0.35355338, %v1418_v19 }
 0x4d2   : > { %v1426_v21 = vsel %vm1116_vm10, %v1422_v20, -inf }
 0x4d3   : > { %1427 = vmax.xlane.f32.xlu1 %v1426_v21 }
 0x52c   : > { %v4985_v22 = vpop.f32.mrf.mxu2 }
 0x52d   : > { %v1243_v23 = vpop.xlane.xlu1 %1242 }
 0x52e   : > { %v1247_v26 = vsub.f32 %v1239_v9, %v1243_v23 }
 0x530   : > { %v1249_v29 = vmul.f32 1.442695, %v1247_v26 }
 0x534   : > { %v4987_v24 = vpop.f32.mrf.mxu2 }
 0x535   : > { %v1246_v25 = vpop.xlane.xlu2 %1245 }
 0x536   : > { %v1248_v27 = vsub.f32 %v1240_v12, %v1246_v25 }
 0x538   : > { %v1251_v28 = vmul.f32 1.442695, %v1248_v27 }
 0x53a   : > { %4076 = vpow2.f32 %v1251_v28 }
 0x53b   : > { %4078 = vpow2.f32 %v1249_v29 }
 0x53c   : > { %v1570_v30 = vpop.f32.mrf.mxu2 }
 0x53d   : > { %v1576_v31 = vmul.f32 0.35355338, %v1570_v30 }
 0x53e   : > { %v1425_v32 = vpop.xlane.xlu0 %1424 }
 0x53f   : > { %v1429_v33 = vsub.f32 %v1421_v16, %v1425_v32  ;;  %v1578_v34 = vsel %vm1116_vm10, %v1576_v31, -inf }
 0x540   : > { %v4990_v35 = vpop.eup %4076  ;;  %1579 = vmax.xlane.f32.xlu2 %v1578_v34 }
 0x541   : > { %v1256_v36 = vsel %vm1116_vm10, %v4990_v35, 0.0  ;;  %v1431_v37 = vmul.f32 1.442695, %v1429_v33  ;;  %v4994_v38 = vpop.eup %4078 }
 0x542   : > { %1257 = vadd.xlane.f32.xlu1 %v1256_v36  ;;  %v1253_v43 = vsel %vm1116_vm10, %v4994_v38, 0.0 }
 0x543   : > { %4080 = vpow2.f32 %v1431_v37 }
 0x544   : > { %v1573_v39 = vpop.f32.mrf.mxu2 }
 0x545   : > { %v1577_v40 = vmul.f32 0.35355338, %v1573_v39 }
 0x546   : > { %v1428_v41 = vpop.xlane.xlu1 %1427 }
 0x547   : > { %v1430_v42 = vsub.f32 %v1422_v20, %v1428_v41  ;;  %v1581_v44 = vsel %vm1116_vm10, %v1577_v40, -inf }
 0x548   : > { %1254 = vadd.xlane.f32.xlu2 %v1253_v43  ;;  %1582 = vmax.xlane.f32.xlu0 %v1581_v44 }
 0x549   : > { %v1433_v45 = vmul.f32 1.442695, %v1430_v42  ;;  %v4999_v46 = vpop.eup %4080 }
 0x54a   : > { %v1435_v47 = vsel %vm1116_vm10, %v4999_v46, 0.0 }
 0x54b   : > { %4082 = vpow2.f32 %v1433_v45 }
 0x550   : > { %1436 = vadd.xlane.f32.xlu0 %v1435_v47 }
 0x551   : > { %v5003_v48 = vpop.eup %4082 }
 0x552   : > { %v1438_v49 = vsel %vm1116_vm10, %v5003_v48, 0.0 }
 0x558   : > { %1439 = vadd.xlane.f32.xlu0 %v1438_v49 }
 0x560   : > { %4017 = vrot.lane.b32.xlu2 %v4920_v8, %s4455_s11 }
 0x56c   : > { %4022 = vrot.lane.b32.xlu0 %v4920_v8, %s4456_s18 }
 0x5b3   : > { %v1580_v50 = vpop.xlane.xlu2 %1579 }
 0x5b4   : > { %v1584_v51 = vsub.f32 %v1576_v31, %v1580_v50 }
 0x5b5   : > { %v1258_v52 = vpop.xlane.xlu1 %1257 }
 0x5b6   : > { %v1586_v53 = vmul.f32 1.442695, %v1584_v51  ;;  %4084 = vrcp.f32 %v1258_v52  ;;  %v1285_v23 = vand.u32 2147483648, %v1258_v52  ;;  %vm1279_vm11 = vweird.f32 %v1258_v52 }
 0x5b7   : > { %v1283_v28 = vand.u32 2147483647, %v1258_v52 }
 0x5b8   : > { %4086 = vpow2.f32 %v1586_v53  ;;  %v1286_v30 = vor.u32 1.1754944e-38, %v1285_v23 }
 0x5b9   : > { %vm1284_vm13 = vcmp.eq.f32.partialorder %v1283_v28, 8.507059e+37 }
 0x5bb   : > { %v1255_v54 = vpop.xlane.xlu2 %1254  ;;  %v1583_v55 = vpop.xlane.xlu0 %1582 }
 0x5bc   : > { %v4085_v56 = vpop.eup %4084  ;;  %4088 = vrcp.f32 %v1255_v54  ;;  %v1585_v57 = vsub.f32 %v1577_v40, %v1583_v55  ;;  %v1268_v6 = vand.u32 2147483647, %v1255_v54  ;;  %v1270_v9 = vand.u32 2147483648, %v1255_v54 }
 0x5bd   : > { %v1275_v59 = vmul.f32 %v4085_v56, %v1258_v52  ;;  %vm1264_vm5 = vweird.f32 %v1255_v54  ;;  %vm1280_vm8 = vweird.f32 %v4085_v56 }
 0x5be   : > { %v5009_v58 = vpop.eup %4086  ;;  %v1588_v60 = vmul.f32 1.442695, %v1585_v57  ;;  %v1271_v18 = vor.u32 1.1754944e-38, %v1270_v9  ;;  %vm1269_vm7 = vcmp.eq.f32.partialorder %v1268_v6, 8.507059e+37  ;;  %vm1281_vm12 = vmor %vm1279_vm11, %vm1280_vm8 }
 0x5bf   : > { %v1590_v61 = vsel %vm1116_vm10, %v5009_v58, 0.0  ;;  %v1276_v63 = vsub.f32 1.0, %v1275_v59  ;;  %v1072_v59 = vld [vmem:[%s4790_s12 + $0x58] sm:$0xff] }
 0x5c0   : > { %1591 = vadd.xlane.f32.xlu1 %v1590_v61  ;;  %4090 = vpow2.f32 %v1588_v60  ;;  %1345 = vmatpush.msrb.mxu1 %v1072_v59 }
 0x5c1   : > { %v1277_v11 = vmul.f32 %v4085_v56, %v1276_v63 }
 0x5c2   : > { %v4089_v62 = vpop.eup %4088 }
 0x5c3   : > { %v1260_v0 = vmul.f32 %v4089_v62, %v1255_v54  ;;  %v4018_v1 = vpop.permute.xlu2 %4017  ;;  %v1437_v3 = vpop.xlane.xlu0 %1436  ;;  %vm1265_vm4 = vweird.f32 %v4089_v62  ;;  %v1278_v21 = vadd.f32 %v4085_v56, %v1277_v11 }
 0x5c4   : > { %4092 = vrcp.f32 %v1437_v3  ;;  %v4019_v5 = vunpack.i.l.bf16 %v4018_v1  ;;  %v4020_v13 = vunpack.i.h.bf16 %v4018_v1  ;;  %vm1266_vm6 = vmor %vm1264_vm5, %vm1265_vm4  ;;  %vm1446_vm15 = vweird.f32 %v1437_v3 }
 0x5c5   : > { %v1261_v4 = vsub.f32 1.0, %v1260_v0  ;;  %v1282_v29 = vsel %vm1281_vm12, %v4085_v56, %v1278_v21  ;;  %v1450_v41 = vand.u32 2147483647, %v1437_v3  ;;  %v1073_v0 = vld [vmem:[%s4790_s12 + $0xa0] sm:$0xff] }
 0x5c6   : > { %v5013_v10 = vpop.eup %4090  ;;  %1315 = vmatpush.msrb.mxu3 %v4019_v5  ;;  %v1287_v33 = vsel %vm1284_vm13, %v1286_v30, %v1282_v29  ;;  %1527 = vmatpush.msra.mxu1 %v1073_v0 }
 0x5c7   : > { %v1262_v12 = vmul.f32 %v4089_v62, %v1261_v4  ;;  %v1593_v14 = vsel %vm1116_vm10, %v5013_v10, 0.0  ;;  %v1288_v37 = vmul.f32 %v4990_v35, %v1287_v33  ;;  %vm1451_vm2 = vcmp.eq.f32.partialorder %v1450_v41, 8.507059e+37 }
 0x5c8   : > { %1316 = vmatpush.msrb.mxu3 %v4020_v13  ;;  %1594 = vadd.xlane.f32.xlu1 %v1593_v14 }
 0x5c9   : > { %v1263_v15 = vadd.f32 %v4089_v62, %v1262_v12 }
 0x5ca   : > { %v4093_v16 = vpop.eup %4092 }
 0x5cb   : > { %v1440_v19 = vpop.xlane.xlu0 %1439  ;;  %v1267_v20 = vsel %vm1266_vm6, %v4089_v62, %v1263_v15  ;;  %v1442_v25 = vmul.f32 %v4093_v16, %v1437_v3  ;;  %vm1447_vm14 = vweird.f32 %v4093_v16 }
 0x5cc   : > { %4094 = vrcp.f32 %v1440_v19  ;;  %v1272_v26 = vsel %vm1269_vm7, %v1271_v18, %v1267_v20  ;;  %vm1448_vm0 = vmor %vm1446_vm15, %vm1447_vm14  ;;  %v1467_v51 = vand.u32 2147483648, %v1440_v19  ;;  %vm1461_vm4 = vweird.f32 %v1440_v19 }
 0x5cd   : > { %v1273_v27 = vmul.f32 %v4994_v38, %v1272_v26  ;;  %v1443_v31 = vsub.f32 1.0, %v1442_v25  ;;  %v1452_v38 = vand.u32 2147483648, %v1437_v3  ;;  %v1465_v53 = vand.u32 2147483647, %v1440_v19 }
 0x5ce   : > { %v1468_v55 = vor.u32 1.1754944e-38, %v1467_v51 }
 0x5cf   : > { %3720 = vmatmul.msk.f32.vlgmr.msrb.gmra.mxu3 %vm1116_vm10, %v1273_v27  ;;  %v1444_v34 = vmul.f32 %v4093_v16, %v1443_v31  ;;  %v1453_v44 = vor.u32 1.1754944e-38, %v1452_v38  ;;  %vm1466_vm6 = vcmp.eq.f32.partialorder %v1465_v53, 8.507059e+37  ;;  %v1074_v31 = vld [vmem:[%s4790_s12 + $0xe8] sm:$0xff] }
 0x5d0   : > { %v942_v38 = vld [vmem:[%s5627_s15] sm:$0x1]  ;;  %s5635_s15 = smov %s5634_s29 }
 0x5d1   : > { %v1445_v39 = vadd.f32 %v4093_v16, %v1444_v34  ;;  %v1702_v34 = vld [vmem:[%s4790_s12 + $0xf0] sm:$0xff] }
 0x5d2   : > { %v4095_v32 = vpop.eup %4094 }
 0x5d3   : > { %v1457_v36 = vmul.f32 %v4095_v32, %v1440_v19  ;;  %v1449_v42 = vsel %vm1448_vm0, %v4093_v16, %v1445_v39  ;;  %vm1462_vm3 = vweird.f32 %v4095_v32  ;;  %v1700_v39 = vld [vmem:[%s4790_s12 + $0x60] sm:$0xff] }
 0x5d4   : > { %v1454_v47 = vsel %vm1451_vm2, %v1453_v44, %v1449_v42  ;;  %vm1463_vm5 = vmor %vm1461_vm4, %vm1462_vm3  ;;  %v4052_v44 = vld [vmem:[%s4797_s14 + $0x2] ss:$0 sm:$0xff]  ;;  %vm1831_vm2 = vcmask 523264  }
 0x5d5   : > { %v1458_v40 = vsub.f32 1.0, %v1457_v36  ;;  %v1455_v52 = vmul.f32 %v4999_v46, %v1454_v47  ;;  %v1701_v36 = vld [vmem:[%s4790_s12 + $0xa8] sm:$0xff] }
 0x5d7   : > { %3721 = vmatmul.msk.f32.gmra.mxu3 %vm1116_vm10, %v1288_v37  ;;  %v1459_v43 = vmul.f32 %v4095_v32, %v1458_v40  ;;  %v1699_v40 = vld [vmem:[%s4790_s12 + $0x18] sm:$0xff] }
 0x5d9   : > { %v1460_v50 = vadd.f32 %v4095_v32, %v1459_v43 }
 0x5db   : > { %v1464_v54 = vsel %vm1463_vm5, %v4095_v32, %v1460_v50 }
 0x5dc   : > { %v1469_v56 = vsel %vm1466_vm6, %v1468_v55, %v1464_v54 }
 0x5dd   : > { %v1470_v57 = vmul.f32 %v5003_v48, %v1469_v56 }
 0x5de   : > { %v4023_v45 = vpop.permute.xlu0 %4022 }
 0x5df   : > { %v4024_v49 = vunpack.i.l.bf16 %v4023_v45  ;;  %v4025_v35 = vunpack.i.h.bf16 %v4023_v45 }
 0x5e1   : > { %1497 = vmatpush.msra.mxu3 %v4024_v49  ;;  %4027 = vrot.lane.b32.xlu1 %v4920_v8, %s4457_s8 }
 0x5e3   : > { %1498 = vmatpush.msra.mxu3 %v4025_v35 }
 0x5e4   : > { %3730 = vmatmul.msk.f32.vlgmr.msra.gmra.mxu3 %vm1116_vm10, %v1455_v52 }
 0x5e5   : > { %1682 = vmatpush.msrb.mxu3 %v1074_v31 }
 0x5ec   : > { %3731 = vmatmul.msk.f32.gmra.mxu3 %vm1116_vm10, %v1470_v57 }
 0x633   : > { %v1592_v60 = vpop.xlane.xlu1 %1591 }
 0x634   : > { %4096 = vrcp.f32 %v1592_v60  ;;  %v1607_v48 = vand.u32 2147483648, %v1592_v60  ;;  %vm1601_vm8 = vweird.f32 %v1592_v60  ;;  %v1605_v6 = vand.u32 2147483647, %v1592_v60 }
 0x636   : > { %v1608_v13 = vor.u32 1.1754944e-38, %v1607_v48  ;;  %vm1606_vm12 = vcmp.eq.f32.partialorder %v1605_v6, 8.507059e+37 }
 0x63a   : > { %v4097_v46 = vpop.eup %4096 }
 0x63b   : > { %v1595_v8 = vpop.xlane.xlu1 %1594  ;;  %v1597_v61 = vmul.f32 %v4097_v46, %v1592_v60  ;;  %vm1602_vm7 = vweird.f32 %v4097_v46 }
 0x63c   : > { %4098 = vrcp.f32 %v1595_v8  ;;  %vm1603_vm11 = vmor %vm1601_vm8, %vm1602_vm7  ;;  %v1622_v19 = vand.u32 2147483648, %v1595_v8  ;;  %vm1616_vm14 = vweird.f32 %v1595_v8  ;;  %v1620_v23 = vand.u32 2147483647, %v1595_v8 }
 0x63d   : > { %v1598_v62 = vsub.f32 1.0, %v1597_v61  ;;  %v1825_v61 = vld [vmem:[%s4821_s16 + $0x30] sm:$0xff] }
 0x63e   : > { %v1623_v27 = vor.u32 1.1754944e-38, %v1622_v19  ;;  %vm1621_vm0 = vcmp.eq.f32.partialorder %v1620_v23, 8.507059e+37  ;;  %v1784_v19 = vld [vmem:[%s4790_s12 + $0xb0] sm:$0xff] }
 0x63f   : > { %v1599_v1 = vmul.f32 %v4097_v46, %v1598_v62 }
 0x641   : > { %v1600_v4 = vadd.f32 %v4097_v46, %v1599_v1  ;;  %v1823_v1 = vld [vmem:[%s4821_s16 + $0x20] sm:$0xff] }
 0x642   : > { %v4099_v63 = vpop.eup %4098 }
 0x643   : > { %v1612_v3 = vmul.f32 %v4099_v63, %v1595_v8  ;;  %v1604_v9 = vsel %vm1603_vm11, %v4097_v46, %v1600_v4  ;;  %vm1617_vm13 = vweird.f32 %v4099_v63  ;;  %v1826_v46 = vld [vmem:[%s4821_s16 + $0x38] sm:$0xff] }
 0x644   : > { %v1609_v15 = vsel %vm1606_vm12, %v1608_v13, %v1604_v9  ;;  %vm1618_vm15 = vmor %vm1616_vm14, %vm1617_vm13  ;;  %v1820_v13 = vld [vmem:[%s4821_s16 + $0x8] sm:$0xff] }
 0x645   : > { %v1613_v5 = vsub.f32 1.0, %v1612_v3  ;;  %v1610_v21 = vmul.f32 %v5009_v58, %v1609_v15  ;;  %v939_v15 = vld [vmem:[%s5628_s10] sm:$0xff] }
 0x647   : > { %v1614_v11 = vmul.f32 %v4099_v63, %v1613_v5  ;;  %v1703_v5 = vld [vmem:[%s4797_s14 + $0x3] sm:$0x1] }
 0x649   : > { %v1615_v18 = vadd.f32 %v4099_v63, %v1614_v11  ;;  %v1822_v11 = vld [vmem:[%s4821_s16 + $0x18] sm:$0xff] }
 0x64b   : > { %v1619_v26 = vsel %vm1618_vm15, %v4099_v63, %v1615_v18  ;;  %v1824_v63 = vld [vmem:[%s4821_s16 + $0x28] sm:$0xff]  ;;  %v1785_v18 = vld [vmem:[%s4790_s12 + $0xf8] sm:$0xff] }
 0x64c   : > { %v1624_v28 = vsel %vm1621_vm0, %v1623_v27, %v1619_v26  ;;  %1808 = vmatpush.msrb.mxu2 %v1785_v18 }
 0x64d   : > { %v1625_v29 = vmul.f32 %v5013_v10, %v1624_v28 }
 0x64e   : > { %1809 = vmatpush.msrb.mxu2 %v1784_v19 }
 0x652   : > { %v1318_v12 = vpop.f32.mrf.mxu3 }
 0x653   : > { %3722 = vmatmul.msk.f32.vlgmr.msrb.gmra.mxu1 %vm1082_vm9, %v1318_v12  ;;  %v4028_v14 = vpop.permute.xlu1 %4027  ;;  %v1821_v12 = vld [vmem:[%s4821_s16 + $0x10] sm:$0xff] }
 0x654   : > { %v4029_v16 = vunpack.i.l.bf16 %v4028_v14  ;;  %v4030_v20 = vunpack.i.h.bf16 %v4028_v14  ;;  %1719 = vmatpush.msrb.mxu1 %v1702_v34  ;;  %v1819_v14 = vld [vmem:[%s4821_s16] sm:$0xff]  ;;  %s4326_s16 = scalar_lea.hbm %s5640_s2, 32 }
 0x656   : > { %1652 = vmatpush.msrb.mxu0 %v4029_v16  ;;  %1720 = vmatpush.msrb.mxu1 %v1701_v36  ;;  %v940_v16 = vld [vmem:[%s5629_s7 + $0x8] sm:$0xff] }
 0x658   : > { %1653 = vmatpush.msrb.mxu0 %v4030_v20  ;;  %1721 = vmatpush.msrb.mxu1 %v1700_v39  ;;  %v1783_v20 = vld [vmem:[%s4790_s12 + $0x68] sm:$0xff] }
 0x659   : > { %3738 = vmatmul.msk.f32.vlgmr.msrb.gmra.mxu0 %vm1116_vm10, %v1610_v21  ;;  %1810 = vmatpush.msrb.mxu2 %v1783_v20  ;;  %v1782_v21 = vld [vmem:[%s4790_s12 + $0x20] sm:$0xff] }
 0x65a   : > { %v1321_v25 = vpop.f32.mrf.mxu3  ;;  %1722 = vmatpush.msrb.mxu1 %v1699_v40  ;;  %1846 = vmatpush.msra.mxu0 %v1826_v46 }
 0x65b   : > { %3723 = vmatmul.msk.f32.gmra.mxu1 %vm1082_vm9, %v1321_v25  ;;  %1811 = vmatpush.msrb.mxu2 %v1782_v21 }
 0x65c   : > { %1847 = vmatpush.msra.mxu0 %v1825_v61 }
 0x65e   : > { %1848 = vmatpush.msra.mxu0 %v1824_v63 }
 0x660   : > { %1849 = vmatpush.msra.mxu0 %v1823_v1 }
 0x661   : > { %3739 = vmatmul.msk.f32.gmra.mxu0 %vm1116_vm10, %v1625_v29 }
 0x662   : > { %1850 = vmatpush.msra.mxu0 %v1822_v11 }
 0x664   : > { %1851 = vmatpush.msra.mxu0 %v1821_v12 }
 0x666   : > { %1852 = vmatpush.msra.mxu0 %v1820_v13 }
 0x667   : > { %v1500_v58 = vpop.f32.mrf.mxu3 }
 0x668   : > { %3732 = vmatmul.msk.f32.vlgmr.msra.gmra.mxu1 %vm1082_vm9, %v1500_v58  ;;  %1853 = vmatpush.msra.mxu0 %v1819_v14 }
 0x669   : > { %3745 = vmatmul.msk.f32.vlgmr.msra.gmra.mxu0 %vm1831_vm2, %v939_v15 }
 0x66f   : > { %v1503_v30 = vpop.f32.mrf.mxu3 }
 0x670   : > { %3733 = vmatmul.msk.f32.gmra.mxu1 %vm1082_vm9, %v1503_v30 }
 0x671   : > { %3746 = vmatmul.msk.f32.gmra.mxu0 %vm1831_vm2, %v940_v16 }
 0x678   : > { %3742 = vmatmul.msk.f32.vlgmr.msrb.gmra.mxu1 %vm948_vm1, %v942_v38 }
 0x6d0   : > { %v1347_v10 = vpop.f32.mrf.mxu1 }
 0x6d1   : > { %v1377_v42 = vadd.f32 %v4985_v22, %v1347_v10 }
 0x6d6   : > { %v1655_v32 = vpop.f32.mrf.mxu0 }
 0x6d7   : > { %3740 = vmatmul.msk.f32.vlgmr.msrb.gmra.mxu3 %vm1082_vm9, %v1655_v32 }
 0x6d8   : > { %v1350_v37 = vpop.f32.mrf.mxu1 }
 0x6d9   : > { %v1380_v51 = vadd.f32 %v4987_v24, %v1350_v37 }
 0x6de   : > { %v1658_v33 = vpop.f32.mrf.mxu0 }
 0x6df   : > { %3741 = vmatmul.msk.f32.gmra.mxu3 %vm1082_vm9, %v1658_v33 }
 0x6e5   : > { %v1529_v41 = vpop.f32.mrf.mxu1 }
 0x6e6   : > { %v1535_v43 = vadd.f32 %v1529_v41, %v1377_v42 }
 0x6ed   : > { %v1532_v50 = vpop.f32.mrf.mxu1 }
 0x6ee   : > { %v1536_v52 = vadd.f32 %v1532_v50, %v1380_v51 }
 0x6f5   : > { %v1724_v48 = vpop.f32.mrf.mxu1 }
 0x6f6   : > { %v1725_v6 = vadd.f32 %v1724_v48, %v1703_v5 }
 0x6f8   : > { %v1775_v9 = vperm.slane %v1725_v6, 0  ;;  %v1771_v34 = vadd.f32 1.0, %v1725_v6 }
 0x6fa   : > { %v1772_v38 = vperm.slane %v1771_v34, 0 }
 0x75a   : > { %v1684_v45 = vpop.f32.mrf.mxu3 }
 0x75b   : > { %v1690_v47 = vadd.f32 %v1684_v45, %v1535_v43 }
 0x75d   : > { %v1695_v49 = vadd.f32 %v4052_v44, %v1690_v47 }
 0x75f   : > { %v5053_v35 = vadd.f32 %v1695_v49, %v4872_v2 }
 0x761   : > { %v1727_v53 = vsel %vm948_vm1, %v5053_v35, 0.0 }
 0x762   : > { %1728 = vadd.xlane.f32.xlu2 %v1727_v53  ;;  %v1687_v54 = vpop.f32.mrf.mxu3 }
 0x763   : > { %v1691_v22 = vadd.f32 %v1687_v54, %v1536_v52  ;;  %v1855_v54 = vpop.f32.mrf.mxu0 }
 0x765   : > { %v1696_v55 = vadd.f32 %v4052_v44, %v1691_v22  ;;  %v4053_v22 = vld [vmem:[%s4797_s14 + $0x5] ss:$0 sm:$0xff] }
 0x767   : > { %v5058_v56 = vadd.f32 %v1696_v55, %v4880_v7 }
 0x769   : > { %v1730_v24 = vsel %vm948_vm1, %v5058_v56, 0.0 }
 0x76a   : > { %1731 = vadd.xlane.f32.xlu0 %v1730_v24 }
 0x76b   : > { %v1858_v55 = vpop.f32.mrf.mxu0 }
 0x76c   : > { %v1859_v24 = vadd.f32 %v4053_v22, %v1858_v55 }
 0x76e   : > { %3747 = vmatpush.xpose.msk.msra.mxu1 %vm1082_vm9, %v1859_v24 }
 0x7d5   : > { %v1729_v2 = vpop.xlane.xlu2 %1728 }
 0x7d6   : > { %v1733_v57 = vmul.f32 %v1729_v2, %v4891_v17  ;;  %v1856_v2 = vadd.f32 %v4053_v22, %v1855_v54 }
 0x7d8   : > { %v5064_v59 = vsub.f32 %v5053_v35, %v1733_v57  ;;  %3748 = vmatpush.xpose.msk.msra.mxu1 %vm1082_vm9, %v1856_v2  ;;  %v4054_v57 = vld [vmem:[%s4797_s14 + $0x4] ss:$0 sm:$0xff]  ;;  %v5121_v16 = vpack.i.bf16 %v1856_v2, %v1859_v24 }
 0x7da   : > { %v1737_v60 = vmul.f32 %v5064_v59, %v5064_v59 }
 0x7dc   : > { %v1739_v8 = vsel %vm948_vm1, %v1737_v60, 0.0 }
 0x7dd   : > { %1740 = vadd.xlane.f32.xlu1 %v1739_v8  ;;  %v1732_v7 = vpop.xlane.xlu0 %1731 }
 0x7de   : > { %v1734_v62 = vmul.f32 %v1732_v7, %v4891_v17 }
 0x7e0   : > { %v5074_v0 = vsub.f32 %v5058_v56, %v1734_v62 }
 0x7e2   : > { %v1738_v3 = vmul.f32 %v5074_v0, %v5074_v0 }
 0x7e4   : > { %v1742_v4 = vsel %vm948_vm1, %v1738_v3, 0.0 }
 0x7e5   : > { %1743 = vadd.xlane.f32.xlu2 %v1742_v4 }
 0x7fd   : > { %1777 = vrot.lane.b32.xlu2 %v1775_v9, %s4447_s24 }
 0x805   : > { %1992 = vrot.lane.b32.xlu2 %v1859_v24, %s4450_s9 }
 0x850   : > { %v1741_v23 = vpop.xlane.xlu1 %1740 }
 0x851   : > { %v1745_v25 = vmul.f32 %v1741_v23, %v4891_v17 }
 0x853   : > { %v1747_v26 = vadd.f32 1e-05, %v1745_v25 }
 0x855   : > { %4100 = vrsqrt.f32 %v1747_v26  ;;  %vm1755_vm4 = vweird.f32 %v1747_v26 }
 0x858   : > { %v1744_v27 = vpop.xlane.xlu2 %1743 }
 0x859   : > { %v1746_v28 = vmul.f32 %v1744_v27, %v4891_v17 }
 0x85b   : > { %v4101_v29 = vpop.eup %4100  ;;  %v1748_v58 = vadd.f32 1e-05, %v1746_v28 }
 0x85c   : > { %v1750_v30 = vmul.f32 %v4101_v29, %v1747_v26  ;;  %vm1756_vm3 = vweird.f32 %v4101_v29 }
 0x85d   : > { %4102 = vrsqrt.f32 %v1748_v58  ;;  %vm1757_vm5 = vmor %vm1755_vm4, %vm1756_vm3  ;;  %vm1765_vm7 = vweird.f32 %v1748_v58 }
 0x85e   : > { %v1751_v31 = vmul.f32 %v4101_v29, %v1750_v30 }
 0x860   : > { %v1752_v32 = vmul.f32 0.5, %v1751_v31  ;;  %v1778_v43 = vpop.permute.xlu2 %1777 }
 0x862   : > { %v1753_v33 = vsub.f32 1.5, %v1752_v32 }
 0x863   : > { %v4103_v10 = vpop.eup %4102 }
 0x864   : > { %v1754_v36 = vmul.f32 %v4101_v29, %v1753_v33  ;;  %v1760_v37 = vmul.f32 %v4103_v10, %v1748_v58  ;;  %vm1766_vm6 = vweird.f32 %v4103_v10 }
 0x865   : > { %vm1767_vm8 = vmor %vm1765_vm7, %vm1766_vm6 }
 0x866   : > { %v1761_v39 = vmul.f32 %v4103_v10, %v1760_v37  ;;  %v1758_v40 = vsel %vm1757_vm5, %v4101_v29, %v1754_v36 }
 0x867   : > { %v1769_v41 = vmul.f32 %v1758_v40, %v5064_v59 }
 0x868   : > { %v1762_v42 = vmul.f32 0.5, %v1761_v39  ;;  %v1993_v46 = vpop.permute.xlu2 %1992 }
 0x869   : > { %v1773_v44 = vmul.f32 %v1772_v38, %v1769_v41  ;;  %3753 = vmatpush.xpose.msk.msra.mxu2 %vm1082_vm9, %v1993_v46 }
 0x86a   : > { %v1763_v45 = vsub.f32 1.5, %v1762_v42 }
 0x86b   : > { %v1780_v47 = vadd.f32 %v1778_v43, %v1773_v44  ;;  %v1861_v44 = vld [vmem:[%s4790_s12 + $0x28] sm:$0xff] }
 0x86c   : > { %v1764_v49 = vmul.f32 %v4103_v10, %v1763_v45 }
 0x86d   : > { %3743 = vmatmul.msk.f32.vlgmr.msrb.gmra.mxu2 %vm948_vm1, %v1780_v47 }
 0x86e   : > { %v1768_v50 = vsel %vm1767_vm8, %v4103_v10, %v1764_v49 }
 0x86f   : > { %v1770_v51 = vmul.f32 %v1768_v50, %v5074_v0 }
 0x871   : > { %v1774_v52 = vmul.f32 %v1772_v38, %v1770_v51 }
 0x873   : > { %v1781_v53 = vadd.f32 %v1778_v43, %v1774_v52 }
 0x875   : > { %3744 = vmatmul.msk.f32.gmra.mxu2 %vm948_vm1, %v1781_v53 }
 0x8f0   : > { %v1813_v59 = vpop.f32.mrf.mxu2 }
 0x8f1   : > { %v1814_v60 = vadd.f32 %v4054_v57, %v1813_v59 }
 0x8f3   : > { %1986 = vrot.lane.b32.xlu2 %v1814_v60, %s4450_s9  ;;  %3749 = vmatmul.msk.f32.vlgmr.msra.gmra.mxu1 %vm1082_vm9, %v1814_v60 }
 0x8f8   : > { %v1816_v8 = vpop.f32.mrf.mxu2 }
 0x8f9   : > { %v1817_v7 = vadd.f32 %v4054_v57, %v1816_v8 }
 0x8fb   : > { %2329 = vrot.lane.b32.xlu2 %v1859_v24, %s4454_s22  ;;  %3750 = vmatmul.msk.f32.gmra.mxu1 %vm1082_vm9, %v1817_v7 }
 0x903   : > { %2327 = vrot.lane.b32.xlu2 %v1856_v2, %s4454_s22 }
 0x90b   : > { %2168 = vrot.lane.b32.xlu2 %v1814_v60, %s4453_s0 }
 0x94d   : > { %v1987_v27 = vpop.permute.xlu2 %1986 }
 0x955   : > { %v2330_v36 = vpop.permute.xlu2 %2329 }
 0x95d   : > { %v2328_v51 = vpop.permute.xlu2 %2327 }
 0x965   : > { %v2169_v55 = vpop.permute.xlu2 %2168 }
 0x970   : > { %v1895_v61 = vpop.f32.mrf.mxu1 }
 0x971   : > { %v1901_v62 = vmul.f32 0.35355338, %v1895_v61 }
 0x973   : > { %v1903_v63 = vsel %vm1116_vm10, %v1901_v62, -inf }
 0x974   : > { %1904 = vmax.xlane.f32.xlu0 %v1903_v63 }
 0x978   : > { %v1898_v0 = vpop.f32.mrf.mxu1 }
 0x979   : > { %v1902_v1 = vmul.f32 0.35355338, %v1898_v0 }
 0x97b   : > { %v1906_v3 = vsel %vm1116_vm10, %v1902_v1, -inf }
 0x97c   : > { %1907 = vmax.xlane.f32.xlu0 %v1906_v3 }
 0x9e7   : > { %v1905_v4 = vpop.xlane.xlu0 %1904 }
 0x9e8   : > { %v1909_v5 = vsub.f32 %v1901_v62, %v1905_v4 }
 0x9ea   : > { %v1911_v48 = vmul.f32 1.442695, %v1909_v5 }
 0x9ec   : > { %4104 = vpow2.f32 %v1911_v48 }
 0x9ef   : > { %v1908_v6 = vpop.xlane.xlu0 %1907 }
 0x9f0   : > { %v1910_v9 = vsub.f32 %v1902_v1, %v1908_v6 }
 0x9f2   : > { %v4105_v11 = vpop.eup %4104  ;;  %v1913_v12 = vmul.f32 1.442695, %v1910_v9 }
 0x9f3   : > { %v1915_v13 = vsel %vm1116_vm10, %v4105_v11, 0.0 }
 0x9f4   : > { %4106 = vpow2.f32 %v1913_v12  ;;  %1916 = vadd.xlane.f32.xlu1 %v1915_v13 }
 0x9fa   : > { %v5117_v14 = vpop.eup %4106 }
 0x9fb   : > { %v1918_v15 = vsel %vm1116_vm10, %v5117_v14, 0.0 }
 0x9fc   : > { %1919 = vadd.xlane.f32.xlu0 %v1918_v15 }
 0xa0d   : > { %4032 = vrot.lane.b32.xlu1 %v5121_v16, %s4447_s24 }
 0xa10   : > { %1990 = vrot.lane.b32.xlu0 %v1856_v2, %s4450_s9 }
 0xa15   : > { %1988 = vrot.lane.b32.xlu1 %v1817_v7, %s4450_s9 }
 0xa18   : > { %2174 = vrot.lane.b32.xlu0 %v1859_v24, %s4453_s0 }
 0xa1d   : > { %2323 = vrot.lane.b32.xlu1 %v1814_v60, %s4454_s22 }
 0xa20   : > { %2172 = vrot.lane.b32.xlu0 %v1856_v2, %s4453_s0 }
 0xa25   : > { %2325 = vrot.lane.b32.xlu1 %v1817_v7, %s4454_s22 }
 0xa28   : > { %2170 = vrot.lane.b32.xlu0 %v1817_v7, %s4453_s0  ;;  %s5638_s0 = sld [smem:[#allocation35_spill]] }
 0xa67   : > { %v1917_v18 = vpop.xlane.xlu1 %1916 }
 0xa68   : > { %4108 = vrcp.f32 %v1917_v18  ;;  %v1932_v30 = vand.u32 2147483648, %v1917_v18  ;;  %vm1926_vm12 = vweird.f32 %v1917_v18  ;;  %v1930_v31 = vand.u32 2147483647, %v1917_v18 }
 0xa6a   : > { %v1933_v10 = vor.u32 1.1754944e-38, %v1932_v30  ;;  %vm1931_vm14 = vcmp.eq.f32.partialorder %v1930_v31, 8.507059e+37 }
 0xa6e   : > { %v4109_v19 = vpop.eup %4108 }
 0xa6f   : > { %v1922_v20 = vmul.f32 %v4109_v19, %v1917_v18  ;;  %v1920_v21 = vpop.xlane.xlu0 %1919  ;;  %vm1927_vm11 = vweird.f32 %v4109_v19 }
 0xa70   : > { %4110 = vrcp.f32 %v1920_v21  ;;  %vm1928_vm13 = vmor %vm1926_vm12, %vm1927_vm11  ;;  %v1947_v38 = vand.u32 2147483648, %v1920_v21  ;;  %vm1941_vm0 = vweird.f32 %v1920_v21  ;;  %v1945_v45 = vand.u32 2147483647, %v1920_v21 }
 0xa71   : > { %v1923_v23 = vsub.f32 1.0, %v1922_v20 }
 0xa72   : > { %v1948_v49 = vor.u32 1.1754944e-38, %v1947_v38  ;;  %vm1946_vm4 = vcmp.eq.f32.partialorder %v1945_v45, 8.507059e+37 }
 0xa73   : > { %v1924_v25 = vmul.f32 %v4109_v19, %v1923_v23 }
 0xa75   : > { %v1925_v29 = vadd.f32 %v4109_v19, %v1924_v25 }
 0xa76   : > { %v4111_v26 = vpop.eup %4110 }
 0xa77   : > { %v1937_v28 = vmul.f32 %v4111_v26, %v1920_v21  ;;  %v1929_v32 = vsel %vm1928_vm13, %v4109_v19, %v1925_v29  ;;  %vm1942_vm15 = vweird.f32 %v4111_v26 }
 0xa78   : > { %v1934_v37 = vsel %vm1931_vm14, %v1933_v10, %v1929_v32  ;;  %vm1943_vm3 = vmor %vm1941_vm0, %vm1942_vm15 }
 0xa79   : > { %v1938_v58 = vsub.f32 1.0, %v1937_v28  ;;  %v1935_v43 = vmul.f32 %v4105_v11, %v1934_v37 }
 0xa7b   : > { %v1939_v33 = vmul.f32 %v4111_v26, %v1938_v58 }
 0xa7d   : > { %v1940_v40 = vadd.f32 %v4111_v26, %v1939_v33 }
 0xa7f   : > { %v4033_v34 = vpop.permute.xlu1 %4032  ;;  %v1944_v47 = vsel %vm1943_vm3, %v4111_v26, %v1940_v40 }
 0xa80   : > { %v4034_v39 = vunpack.i.l.bf16 %v4033_v34  ;;  %v4035_v41 = vunpack.i.h.bf16 %v4033_v34  ;;  %v1949_v50 = vsel %vm1946_vm4, %v1948_v49, %v1944_v47 }
 0xa81   : > { %v1950_v53 = vmul.f32 %v5117_v14, %v1949_v50 }
 0xa82   : > { %1977 = vmatpush.msra.mxu3 %v4034_v39  ;;  %v1991_v42 = vpop.permute.xlu0 %1990 }
 0xa83   : > { %3754 = vmatpush.xpose.msk.msra.mxu2 %vm1082_vm9, %v1991_v42 }
 0xa84   : > { %1978 = vmatpush.msra.mxu3 %v4035_v41 }
 0xa85   : > { %3751 = vmatmul.msk.f32.vlgmr.msra.gmra.mxu3 %vm1116_vm10, %v1935_v43 }
 0xa86   : > { %2160 = vmatpush.msrb.mxu3 %v1861_v44  ;;  %3755 = vmatmul.msk.f32.vlgmr.msra.gmra.mxu2 %vm1082_vm9, %v1987_v27 }
 0xa87   : > { %v1989_v54 = vpop.permute.xlu1 %1988 }
 0xa88   : > { %3771 = vmatpush.xpose.msk.msra.mxu3 %vm1082_vm9, %v2330_v36 }
 0xa8a   : > { %v2175_v52 = vpop.permute.xlu0 %2174 }
 0xa8b   : > { %3763 = vmatpush.xpose.msk.msrb.mxu2 %vm1082_vm9, %v2175_v52 }
 0xa8c   : > { %3772 = vmatpush.xpose.msk.msra.mxu3 %vm1082_vm9, %v2328_v51 }
 0xa8d   : > { %3752 = vmatmul.msk.f32.gmra.mxu3 %vm1116_vm10, %v1950_v53 }
 0xa8e   : > { %3756 = vmatmul.msk.f32.gmra.mxu2 %vm1082_vm9, %v1989_v54 }
 0xa8f   : > { %v2324_v62 = vpop.permute.xlu1 %2323 }
 0xa92   : > { %v2173_v22 = vpop.permute.xlu0 %2172 }
 0xa93   : > { %3764 = vmatpush.xpose.msk.msrb.mxu2 %vm1082_vm9, %v2173_v22 }
 0xa96   : > { %3765 = vmatmul.msk.f32.vlgmr.msrb.gmra.mxu2 %vm1082_vm9, %v2169_v55 }
 0xa97   : > { %v2326_v3 = vpop.permute.xlu1 %2325 }
 0xa9a   : > { %v2171_v24 = vpop.permute.xlu0 %2170 }
 0xa9e   : > { %3766 = vmatmul.msk.f32.gmra.mxu2 %vm1082_vm9, %v2171_v24 }
 0xb08   : > { %v1980_v2 = vpop.f32.mrf.mxu3 }
 0xb09   : > { %v2019_v57 = vpop.f32.mrf.mxu2  ;;  %3761 = vmatmul.msk.f32.vlgmr.msrb.gmra.mxu3 %vm1082_vm9, %v1980_v2 }
 0xb0a   : > { %v2025_v59 = vmul.f32 0.35355338, %v2019_v57 }
 0xb0c   : > { %v2027_v60 = vsel %vm1116_vm10, %v2025_v59, -inf }
 0xb0d   : > { %2028 = vmax.xlane.f32.xlu2 %v2027_v60 }
 0xb10   : > { %v1983_v8 = vpop.f32.mrf.mxu3 }
 0xb11   : > { %v2022_v7 = vpop.f32.mrf.mxu2  ;;  %3762 = vmatmul.msk.f32.gmra.mxu3 %vm1082_vm9, %v1983_v8 }
 0xb12   : > { %v2026_v46 = vmul.f32 0.35355338, %v2022_v7 }
 0xb14   : > { %v2030_v61 = vsel %vm1116_vm10, %v2026_v46, -inf }
 0xb15   : > { %2031 = vmax.xlane.f32.xlu1 %v2030_v61 }
 0xb19   : > { %v2201_v63 = vpop.f32.mrf.mxu2  ;;  %3773 = vmatmul.msk.f32.vlgmr.msra.gmra.mxu3 %vm1082_vm9, %v2324_v62 }
 0xb1a   : > { %v2207_v0 = vmul.f32 0.35355338, %v2201_v63 }
 0xb1c   : > { %v2209_v1 = vsel %vm1116_vm10, %v2207_v0, -inf }
 0xb1d   : > { %2210 = vmax.xlane.f32.xlu2 %v2209_v1 }
 0xb21   : > { %3774 = vmatmul.msk.f32.gmra.mxu3 %vm1082_vm9, %v2326_v3  ;;  %v2204_v27 = vpop.f32.mrf.mxu2 }
 0xb22   : > { %v2208_v29 = vmul.f32 0.35355338, %v2204_v27 }
 0xb24   : > { %v2212_v32 = vsel %vm1116_vm10, %v2208_v29, -inf }
 0xb80   : > { %v2029_v4 = vpop.xlane.xlu2 %2028 }
 0xb81   : > { %v2033_v5 = vsub.f32 %v2025_v59, %v2029_v4 }
 0xb83   : > { %v2035_v48 = vmul.f32 1.442695, %v2033_v5 }
 0xb85   : > { %4112 = vpow2.f32 %v2035_v48 }
 0xb88   : > { %v2032_v19 = vpop.xlane.xlu1 %2031 }
 0xb89   : > { %v2034_v25 = vsub.f32 %v2026_v46, %v2032_v19 }
 0xb8b   : > { %v5152_v6 = vpop.eup %4112  ;;  %v2037_v28 = vmul.f32 1.442695, %v2034_v25 }
 0xb8c   : > { %v5154_v9 = vpop.f32.mrf.mxu3  ;;  %v2039_v11 = vsel %vm1116_vm10, %v5152_v6, 0.0 }
 0xb8d   : > { %2040 = vadd.xlane.f32.xlu2 %v2039_v11 }
 0xb90   : > { %v2211_v12 = vpop.xlane.xlu2 %2210 }
 0xb91   : > { %v2215_v13 = vsub.f32 %v2207_v0, %v2211_v12 }
 0xb93   : > { %v2217_v14 = vmul.f32 1.442695, %v2215_v13 }
 0xb94   : > { %v5158_v15 = vpop.f32.mrf.mxu3 }
 0xb95   : > { %4114 = vpow2.f32 %v2217_v14 }
 0xb96   : > { %4116 = vpow2.f32 %v2037_v28 }
 0xb9b   : > { %v5160_v18 = vpop.eup %4114 }
 0xb9c   : > { %v2356_v20 = vpop.f32.mrf.mxu3  ;;  %v2221_v21 = vsel %vm1116_vm10, %v5160_v18, 0.0  ;;  %v5167_v33 = vpop.eup %4116 }
 0xb9d   : > { %v2362_v23 = vmul.f32 0.35355338, %v2356_v20  ;;  %2222 = vadd.xlane.f32.xlu2 %v2221_v21  ;;  %v2042_v10 = vsel %vm1116_vm10, %v5167_v33, 0.0 }
 0xb9f   : > { %v2364_v26 = vsel %vm1116_vm10, %v2362_v23, -inf }
 0xba0   : > { %2365 = vmax.xlane.f32.xlu0 %v2364_v26 }
 0xba4   : > { %v2359_v58 = vpop.f32.mrf.mxu3 }
 0xba5   : > { %v2363_v30 = vmul.f32 0.35355338, %v2359_v58 }
 0xba7   : > { %v2367_v31 = vsel %vm1116_vm10, %v2363_v30, -inf }
 0xba8   : > { %2368 = vmax.xlane.f32.xlu1 %v2367_v31  ;;  %2213 = vmax.xlane.f32.xlu0 %v2212_v32  ;;  %v1862_v32 = vld [vmem:[%s4790_s12 + $0x70] sm:$0xff] }
 0xba9   : > { %2131 = vmatpush.msrb.mxu1 %v1862_v32 }
 0xbb0   : > { %2043 = vadd.xlane.f32.xlu1 %v2042_v10 }
 0xbc9   : > { %4037 = vrot.lane.b32.xlu1 %v5121_v16, %s4449_s13  ;;  %s5633_s13 = smov %s5632_s26 }
 0xc00   : > { %v2041_v38 = vpop.xlane.xlu2 %2040 }
 0xc01   : > { %v2056_v8 = vand.u32 2147483648, %v2041_v38  ;;  %vm2050_vm6 = vweird.f32 %v2041_v38  ;;  %v2054_v7 = vand.u32 2147483647, %v2041_v38 }
 0xc03   : > { %v2057_v62 = vor.u32 1.1754944e-38, %v2056_v8  ;;  %vm2055_vm8 = vcmp.eq.f32.partialorder %v2054_v7, 8.507059e+37 }
 0xc10   : > { %v2223_v20 = vpop.xlane.xlu2 %2222 }
 0xc11   : > { %vm2232_vm0 = vweird.f32 %v2223_v20  ;;  %v2236_v31 = vand.u32 2147483647, %v2223_v20 }
 0xc13   : > { %v2366_v34 = vpop.xlane.xlu0 %2365  ;;  %vm2237_vm4 = vcmp.eq.f32.partialorder %v2236_v31, 8.507059e+37 }
 0xc14   : > { %v2370_v36 = vsub.f32 %v2362_v23, %v2366_v34 }
 0xc16   : > { %v2372_v37 = vmul.f32 1.442695, %v2370_v36 }
 0xc18   : > { %4118 = vpow2.f32 %v2372_v37 }
 0xc19   : > { %4120 = vrcp.f32 %v2041_v38 }
 0xc1b   : > { %v2369_v39 = vpop.xlane.xlu1 %2368  ;;  %v2214_v40 = vpop.xlane.xlu0 %2213 }
 0xc1c   : > { %v2371_v41 = vsub.f32 %v2363_v30, %v2369_v39  ;;  %v2216_v42 = vsub.f32 %v2208_v29, %v2214_v40  ;;  %v2238_v30 = vand.u32 2147483648, %v2223_v20 }
 0xc1e   : > { %v5173_v43 = vpop.eup %4118  ;;  %v2374_v44 = vmul.f32 1.442695, %v2371_v41  ;;  %v2219_v45 = vmul.f32 1.442695, %v2216_v42  ;;  %v2239_v34 = vor.u32 1.1754944e-38, %v2238_v30 }
 0xc1f   : > { %v2376_v47 = vsel %vm1116_vm10, %v5173_v43, 0.0  ;;  %v4121_v49 = vpop.eup %4120 }
 0xc20   : > { %4122 = vpow2.f32 %v2374_v44  ;;  %2377 = vadd.xlane.f32.xlu0 %v2376_v47  ;;  %v2046_v22 = vmul.f32 %v4121_v49, %v2041_v38  ;;  %vm2051_vm5 = vweird.f32 %v4121_v49 }
 0xc21   : > { %4124 = vpow2.f32 %v2219_v45  ;;  %vm2052_vm7 = vmor %vm2050_vm6, %vm2051_vm5 }
 0xc22   : > { %v2047_v55 = vsub.f32 1.0, %v2046_v22 }
 0xc23   : > { %v2044_v50 = vpop.xlane.xlu1 %2043 }
 0xc24   : > { %4126 = vrcp.f32 %v2044_v50  ;;  %v2048_v2 = vmul.f32 %v4121_v49, %v2047_v55  ;;  %v2071_v4 = vand.u32 2147483648, %v2044_v50  ;;  %vm2065_vm12 = vweird.f32 %v2044_v50 }
 0xc25   : > { %v2069_v11 = vand.u32 2147483647, %v2044_v50  ;;  %4128 = vrcp.f32 %v2223_v20 }
 0xc26   : > { %v5177_v51 = vpop.eup %4122  ;;  %v2049_v59 = vadd.f32 %v4121_v49, %v2048_v2  ;;  %v2072_v13 = vor.u32 1.1754944e-38, %v2071_v4  ;;  %v3787_v2 = vld [vmem:[%s5633_s13 + $0x20] sm:$0xff] }
 0xc27   : > { %v5179_v52 = vpop.eup %4124  ;;  %v2379_v53 = vsel %vm1116_vm10, %v5177_v51, 0.0  ;;  %vm2070_vm14 = vcmp.eq.f32.partialorder %v2069_v11, 8.507059e+37 }
 0xc28   : > { %2380 = vadd.xlane.f32.xlu0 %v2379_v53  ;;  %v2224_v54 = vsel %vm1116_vm10, %v5179_v52, 0.0  ;;  %v2053_v46 = vsel %vm2052_vm7, %v4121_v49, %v2049_v59 }
 0xc29   : > { %2225 = vadd.xlane.f32.xlu2 %v2224_v54  ;;  %v2058_v0 = vsel %vm2055_vm8, %v2057_v62, %v2053_v46 }
 0xc2a   : > { %v4127_v24 = vpop.eup %4126  ;;  %v2059_v48 = vmul.f32 %v5152_v6, %v2058_v0 }
 0xc2b   : > { %v2061_v57 = vmul.f32 %v4127_v24, %v2044_v50  ;;  %vm2066_vm11 = vweird.f32 %v4127_v24  ;;  %v4129_v21 = vpop.eup %4128 }
 0xc2c   : > { %vm2067_vm13 = vmor %vm2065_vm12, %vm2066_vm11  ;;  %v2228_v6 = vmul.f32 %v4129_v21, %v2223_v20  ;;  %vm2233_vm15 = vweird.f32 %v4129_v21 }
 0xc2d   : > { %v2062_v60 = vsub.f32 1.0, %v2061_v57  ;;  %vm2234_vm3 = vmor %vm2232_vm0, %vm2233_vm15 }
 0xc2e   : > { %v2229_v25 = vsub.f32 1.0, %v2228_v6 }
 0xc2f   : > { %v2063_v61 = vmul.f32 %v4127_v24, %v2062_v60 }
 0xc30   : > { %v2230_v26 = vmul.f32 %v4129_v21, %v2229_v25 }
 0xc31   : > { %v2064_v3 = vadd.f32 %v4127_v24, %v2063_v61 }
 0xc32   : > { %v2231_v28 = vadd.f32 %v4129_v21, %v2230_v26 }
 0xc33   : > { %v2068_v12 = vsel %vm2067_vm13, %v4127_v24, %v2064_v3 }
 0xc34   : > { %v2073_v14 = vsel %vm2070_vm14, %v2072_v13, %v2068_v12 }
 0xc35   : > { %v2074_v19 = vmul.f32 %v5167_v33, %v2073_v14  ;;  %v2235_v33 = vsel %vm2234_vm3, %v4129_v21, %v2231_v28  ;;  %v1864_v21 = vld [vmem:[%s4790_s12 + $0x100] sm:$0xff] }
 0xc36   : > { %v2240_v39 = vsel %vm2237_vm4, %v2239_v34, %v2235_v33 }
 0xc37   : > { %v2241_v47 = vmul.f32 %v5160_v18, %v2240_v39 }
 0xc3b   : > { %v4038_v63 = vpop.permute.xlu1 %4037 }
 0xc3c   : > { %v4039_v1 = vunpack.i.l.bf16 %v4038_v63  ;;  %4042 = vrot.lane.b32.xlu0 %v5121_v16, %s4451_s21  ;;  %v4040_v5 = vunpack.i.h.bf16 %v4038_v63 }
 0xc3e   : > { %2101 = vmatpush.msrb.mxu0 %v4039_v1 }
 0xc40   : > { %2102 = vmatpush.msrb.mxu0 %v4040_v5 }
 0xc41   : > { %4047 = vrot.lane.b32.xlu2 %v5121_v16, %s4452_s3  ;;  %3757 = vmatmul.msk.f32.vlgmr.msrb.gmra.mxu0 %vm1116_vm10, %v2059_v48  ;;  %s5636_s3 = sld [smem:[#allocation36_spill]] }
 0xc49   : > { %3758 = vmatmul.msk.f32.gmra.mxu0 %vm1116_vm10, %v2074_v19 }
 0xc93   : > { %v2378_v23 = vpop.xlane.xlu0 %2377 }
 0xc94   : > { %4130 = vrcp.f32 %v2378_v23  ;;  %vm2387_vm7 = vweird.f32 %v2378_v23  ;;  %v2393_v24 = vand.u32 2147483648, %v2378_v23  ;;  %v2391_v57 = vand.u32 2147483647, %v2378_v23 }
 0xc96   : > { %v2394_v46 = vor.u32 1.1754944e-38, %v2393_v24  ;;  %vm2392_vm14 = vcmp.eq.f32.partialorder %v2391_v57, 8.507059e+37 }
 0xc9a   : > { %v4131_v16 = vpop.eup %4130 }
 0xc9b   : > { %v5193_v27 = vpop.xlane.xlu0 %2380  ;;  %v2383_v29 = vmul.f32 %v4131_v16, %v2378_v23  ;;  %vm2388_vm5 = vweird.f32 %v4131_v16 }
 0xc9c   : > { %4132 = vrcp.f32 %v5193_v27  ;;  %v2226_v58 = vpop.xlane.xlu2 %2225  ;;  %vm5199_vm8 = vmor %vm2387_vm7, %vm2388_vm5  ;;  %v2408_v4 = vand.u32 2147483648, %v5193_v27  ;;  %vm2402_vm0 = vweird.f32 %v5193_v27  ;;  %v2406_v11 = vand.u32 2147483647, %v5193_v27 }
 0xc9d   : > { %4134 = vrcp.f32 %v2226_v58  ;;  %v2384_v10 = vsub.f32 1.0, %v2383_v29  ;;  %v2253_v49 = vand.u32 2147483648, %v2226_v58  ;;  %v2251_v53 = vand.u32 2147483647, %v2226_v58 }
 0xc9e   : > { %vm2247_vm11 = vweird.f32 %v2226_v58  ;;  %v2409_v12 = vor.u32 1.1754944e-38, %v2408_v4  ;;  %vm2407_vm4 = vcmp.eq.f32.partialorder %v2406_v11, 8.507059e+37  ;;  %v2666_v4 = vld [vmem:[%s4841_s19 + $0x10] sm:$0xff]  ;;  %v3799_v11 = vld [vmem:[%s4841_s19 + $0x28] sm:$0xff] }
 0xc9f   : > { %v2385_v40 = vmul.f32 %v4131_v16, %v2384_v10  ;;  %v2254_v59 = vor.u32 1.1754944e-38, %v2253_v49  ;;  %vm2252_vm13 = vcmp.eq.f32.partialorder %v2251_v53, 8.507059e+37  ;;  %v2486_v49 = vld [vmem:[%s4859_s30 + $0x8] sm:$0xff] }
 0xca0   : > { %v3789_v53 = vld [vmem:[%s5633_s13 + $0x30] sm:$0xff] }
 0xca1   : > { %v2386_v54 = vadd.f32 %v4131_v16, %v2385_v40 }
 0xca2   : > { %v4133_v36 = vpop.eup %4132 }
 0xca3   : > { %v4135_v37 = vpop.eup %4134  ;;  %v2398_v38 = vmul.f32 %v4133_v36, %v5193_v27  ;;  %v2390_v60 = vsel %vm5199_vm8, %v4131_v16, %v2386_v54  ;;  %vm2403_vm15 = vweird.f32 %v4133_v36  ;;  %v2594_v54 = vld [vmem:[%s5633_s13] sm:$0xff] }
 0xca4   : > { %v2243_v41 = vmul.f32 %v4135_v37, %v2226_v58  ;;  %v4048_v42 = vpop.permute.xlu2 %4047  ;;  %vm2248_vm6 = vweird.f32 %v4135_v37  ;;  %v2395_v63 = vsel %vm2392_vm14, %v2394_v46, %v2390_v60  ;;  %vm2404_vm3 = vmor %vm2402_vm0, %vm2403_vm15  ;;  %v4055_v58 = vld [vmem:[%s4797_s14 + $0x6] ss:$0 sm:$0xff] }
 0xca5   : > { %v4049_v44 = vunpack.i.l.bf16 %v4048_v42  ;;  %v4050_v50 = vunpack.i.h.bf16 %v4048_v42  ;;  %v2399_v22 = vsub.f32 1.0, %v2398_v38  ;;  %vm2249_vm12 = vmor %vm2247_vm11, %vm2248_vm6  ;;  %v2396_v48 = vmul.f32 %v5173_v43, %v2395_v63  ;;  %v1863_v43 = vld [vmem:[%s4790_s12 + $0xb8] sm:$0xff]  ;;  %v3782_v42 = vld [vmem:[%s4846_s25 + $0x4] sm:$0x7] }
 0xca6   : > { %v2244_v45 = vsub.f32 1.0, %v2243_v41  ;;  %2313 = vmatpush.msra.mxu1 %v1863_v43  ;;  %v2485_v41 = vld [vmem:[%s4859_s30] sm:$0xff]  ;;  %v2592_v43 = vld [vmem:[%s4851_s20] sm:$0x7]  ;;  %vm2698_vm11 = vcmask 1042432   ;;  %s3334_s20 = scalar_lea.sflag [#allocation5], %s5638_s0 }
 0xca7   : > { %2283 = vmatpush.msra.mxu0 %v4049_v44  ;;  %v2400_v8 = vmul.f32 %v4133_v36, %v2399_v22  ;;  %v2597_v44 = vld [vmem:[%s5632_s26 + $0x18] sm:$0xff]  ;;  %v3788_v22 = vld [vmem:[%s5633_s13 + $0x28] sm:$0xff] }
 0xca8   : > { %v2245_v55 = vmul.f32 %v4135_v37, %v2244_v45  ;;  %v2596_v45 = vld [vmem:[%s5633_s13 + $0x10] sm:$0xff] }
 0xca9   : > { %2284 = vmatpush.msra.mxu0 %v4050_v50  ;;  %v2401_v3 = vadd.f32 %v4133_v36, %v2400_v8  ;;  %v3790_v50 = vld [vmem:[%s5633_s13 + $0x38] sm:$0xff] }
 0xcaa   : > { %3767 = vmatmul.msk.f32.vlgmr.msra.gmra.mxu0 %vm1116_vm10, %v2241_v47  ;;  %v2246_v18 = vadd.f32 %v4135_v37, %v2245_v55  ;;  %v2595_v47 = vld [vmem:[%s5633_s13 + $0x8] sm:$0xff] }
 0xcab   : > { %2468 = vmatpush.msrb.mxu0 %v1864_v21  ;;  %v3811_v21 = vld [vmem:[%s4841_s19 + $0x58] sm:$0xff] }
 0xcac   : > { %v2250_v7 = vsel %vm2249_vm12, %v4135_v37, %v2246_v18  ;;  %vm2691_vm12 = vcmask 23552  }
 0xcad   : > { %v2255_v61 = vsel %vm2252_vm13, %v2254_v59, %v2250_v7  ;;  %2613 = vmatpush.msra.mxu0 %v2597_v44  ;;  %vm3009_vm13 = vcmask 254976  }
 0xcae   : > { %v4043_v62 = vpop.permute.xlu0 %4042  ;;  %v2256_v1 = vmul.f32 %v5179_v52, %v2255_v61  ;;  %v2405_v52 = vsel %vm2404_vm3, %v4133_v36, %v2401_v3  ;;  %v3801_v3 = vld [vmem:[%s4841_s19 + $0x38] sm:$0xff] }
 0xcaf   : > { %v4044_v0 = vunpack.i.l.bf16 %v4043_v62  ;;  %v4045_v5 = vunpack.i.h.bf16 %v4043_v62  ;;  %v2410_v13 = vsel %vm2407_vm4, %v2409_v12, %v2405_v52  ;;  %2614 = vmatpush.msra.mxu0 %v2596_v45  ;;  %v2664_v52 = vld [vmem:[%s4841_s19] sm:$0xff] }
 0xcb0   : > { %v2411_v14 = vmul.f32 %v5177_v51, %v2410_v13  ;;  %v3798_v12 = vld [vmem:[%s4841_s19 + $0x20] sm:$0xff] }
 0xcb1   : > { %2438 = vmatpush.msra.mxu2 %v4044_v0  ;;  %2615 = vmatpush.msra.mxu0 %v2595_v47 }
 0xcb2   : > { %3768 = vmatmul.msk.f32.gmra.mxu0 %vm1116_vm10, %v2256_v1  ;;  %v2667_v1 = vld [vmem:[%s4841_s19 + $0x18] sm:$0xff] }
 0xcb3   : > { %2439 = vmatpush.msra.mxu2 %v4045_v5  ;;  %2616 = vmatpush.msra.mxu0 %v2594_v54  ;;  %v3800_v5 = vld [vmem:[%s4841_s19 + $0x30] sm:$0xff]  ;;  %v2909_v54 = vld [vmem:[%s4790_s12 + $0xc0] sm:$0xff] }
 0xcb4   : > { %3775 = vmatmul.msk.f32.vlgmr.msra.gmra.mxu2 %vm1116_vm10, %v2396_v48  ;;  %v2665_v48 = vld [vmem:[%s4841_s19 + $0x8] sm:$0xff] }
 0xcbc   : > { %3776 = vmatmul.msk.f32.gmra.mxu2 %vm1116_vm10, %v2411_v14 }
 0xcbe   : > { %v2104_v19 = vpop.f32.mrf.mxu0 }
 0xcbf   : > { %3759 = vmatmul.msk.f32.vlgmr.msrb.gmra.mxu1 %vm1082_vm9, %v2104_v19 }
 0xcc6   : > { %v2107_v20 = vpop.f32.mrf.mxu0 }
 0xcc7   : > { %3760 = vmatmul.msk.f32.gmra.mxu1 %vm1082_vm9, %v2107_v20 }
 0xd27   : > { %v2286_v6 = vpop.f32.mrf.mxu0 }
 0xd28   : > { %3769 = vmatmul.msk.f32.vlgmr.msra.gmra.mxu1 %vm1082_vm9, %v2286_v6  ;;  %v3810_v6 = vld [vmem:[%s4841_s19 + $0x50] sm:$0xff] }
 0xd2f   : > { %v2289_v23 = vpop.f32.mrf.mxu0 }
 0xd30   : > { %3770 = vmatmul.msk.f32.gmra.mxu1 %vm1082_vm9, %v2289_v23 }
 0xd37   : > { %v2441_v51 = vpop.f32.mrf.mxu2 }
 0xd38   : > { %3777 = vmatmul.msk.f32.vlgmr.msrb.gmra.mxu0 %vm1082_vm9, %v2441_v51  ;;  %v3809_v51 = vld [vmem:[%s4841_s19 + $0x48] sm:$0xff] }
 0xd39   : > { %2747 = vmatpush.msrb.mxu0 %v3801_v3 }
 0xd3b   : > { %2748 = vmatpush.msrb.mxu0 %v3800_v5 }
 0xd3c   : > { %v2133_v26 = vpop.f32.mrf.mxu1 }
 0xd3d   : > { %v2163_v28 = vadd.f32 %v5154_v9, %v2133_v26  ;;  %2749 = vmatpush.msrb.mxu0 %v3799_v11  ;;  %v3797_v11 = vld [vmem:[%s5635_s15 + $0x18] sm:$0xff] }
 0xd3f   : > { %v2444_v25 = vpop.f32.mrf.mxu2  ;;  %2750 = vmatpush.msrb.mxu0 %v3798_v12  ;;  %v2975_v12 = vld [vmem:[%s4826_s4 + $0x68] sm:$0xff] }
 0xd40   : > { %3778 = vmatmul.msk.f32.gmra.mxu0 %vm1082_vm9, %v2444_v25 }
 0xd44   : > { %v2136_v16 = vpop.f32.mrf.mxu1 }
 0xd45   : > { %v2166_v10 = vadd.f32 %v5158_v15, %v2136_v16  ;;  %v2518_v15 = vld [vmem:[%s4846_s25] sm:$0x7] }
 0xda5   : > { %v2315_v27 = vpop.f32.mrf.mxu1 }
 0xda6   : > { %v2321_v29 = vadd.f32 %v2315_v27, %v2163_v28  ;;  %v3808_v27 = vld [vmem:[%s4841_s19 + $0x40] sm:$0xff] }
 0xdad   : > { %v2318_v33 = vpop.f32.mrf.mxu1 }
 0xdae   : > { %v2322_v36 = vadd.f32 %v2318_v33, %v2166_v10 }
 0xdb5   : > { %v2470_v30 = vpop.f32.mrf.mxu0 }
 0xdb6   : > { %v2476_v31 = vadd.f32 %v2470_v30, %v2321_v29 }
 0xdb8   : > { %v2481_v32 = vadd.f32 %v4055_v58, %v2476_v31 }
 0xdba   : > { %v5227_v34 = vadd.f32 %v2481_v32, %v5053_v35 }
 0xdbc   : > { %v2851_v37 = vsel %vm948_vm1, %v5227_v34, 0.0 }
 0xdbd   : > { %2852 = vadd.xlane.f32.xlu1 %v2851_v37  ;;  %v2473_v39 = vpop.f32.mrf.mxu0 }
 0xdbe   : > { %v2477_v9 = vadd.f32 %v2473_v39, %v2322_v36 }
 0xdc0   : > { %v2482_v40 = vadd.f32 %v4055_v58, %v2477_v9 }
 0xdc2   : > { %v5232_v38 = vadd.f32 %v2482_v40, %v5058_v56  ;;  %v3784_v56 = vld [vmem:[%s4846_s25 + $0x8] sm:$0x7] }
 0xdc4   : > { %2509 = vmatpush.msrb.mxu1 %v5232_v38  ;;  %2536 = vmatpush.msrb.mxu3 %v5232_v38  ;;  %v2854_v35 = vsel %vm948_vm1, %v5232_v38, 0.0 }
 0xdc5   : > { %2561 = vmatpush.msrb.mxu2 %v5232_v38  ;;  %2855 = vadd.xlane.f32.xlu0 %v2854_v35 }
 0xdc6   : > { %2510 = vmatpush.msrb.mxu1 %v5227_v34  ;;  %2537 = vmatpush.msrb.mxu3 %v5227_v34 }
 0xdc7   : > { %2562 = vmatpush.msrb.mxu2 %v5227_v34  ;;  %3781 = vmatmul.msk.f32.vlgmr.msrb.gmra.mxu3 %vm1116_vm10, %v2518_v15 }
 0xdc8   : > { %2586 = vmatpush.msra.mxu3 %v5232_v38  ;;  %3779 = vmatmul.msk.f32.vlgmr.msrb.gmra.mxu1 %vm1116_vm10, %v2485_v41 }
 0xdc9   : > { %3783 = vmatmul.msk.f32.vlgmr.msrb.gmra.mxu2 %vm1116_vm10, %v3782_v42  ;;  %2642 = vmatpush.msra.mxu1 %v3790_v50 }
 0xdca   : > { %2587 = vmatpush.msra.mxu3 %v5227_v34  ;;  %2683 = vmatpush.msra.mxu2 %v2667_v1 }
 0xdcb   : > { %2643 = vmatpush.msra.mxu1 %v3789_v53 }
 0xdcc   : > { %2684 = vmatpush.msra.mxu2 %v2666_v4 }
 0xdcd   : > { %2644 = vmatpush.msra.mxu1 %v3788_v22  ;;  %v2908_v22 = vld [vmem:[%s4790_s12 + $0x78] sm:$0xff] }
 0xdce   : > { %2685 = vmatpush.msra.mxu2 %v2665_v48  ;;  %v2977_v48 = vld [vmem:[%s4826_s4 + $0x78] sm:$0xff] }
 0xdcf   : > { %3785 = vmatmul.msk.f32.vlgmr.msra.gmra.mxu3 %vm1116_vm10, %v3784_v56  ;;  %2645 = vmatpush.msra.mxu1 %v3787_v2  ;;  %v2907_v2 = vld [vmem:[%s4790_s12 + $0x30] sm:$0xff] }
 0xdd0   : > { %3780 = vmatmul.msk.f32.gmra.mxu1 %vm1116_vm10, %v2486_v49  ;;  %2686 = vmatpush.msra.mxu2 %v2664_v52  ;;  %v2910_v49 = vld [vmem:[%s4790_s12 + $0x108] sm:$0xff]  ;;  %v2976_v52 = vld [vmem:[%s4826_s4 + $0x70] sm:$0xff] }
 0xdd2   : > { %2809 = vmatpush.msrb.mxu2 %v3811_v21  ;;  %v2973_v21 = vld [vmem:[%s4826_s4 + $0x58] sm:$0xff] }
 0xdd4   : > { %2810 = vmatpush.msrb.mxu2 %v3810_v6  ;;  %v2972_v6 = vld [vmem:[%s4826_s4 + $0x50] sm:$0xff] }
 0xdd6   : > { %2811 = vmatpush.msrb.mxu2 %v3809_v51  ;;  %v4058_v51 = vld [vmem:[%s4797_s14 + $0x9] ss:$0 sm:$0xff] }
 0xdd8   : > { %2812 = vmatpush.msrb.mxu2 %v3808_v27  ;;  %v2969_v27 = vld [vmem:[%s4826_s4 + $0x38] sm:$0xff] }
 0xe30   : > { %v2853_v55 = vpop.xlane.xlu1 %2852 }
 0xe31   : > { %v2857_v24 = vmul.f32 %v2853_v55, %v4891_v17 }
 0xe33   : > { %v5280_v57 = vsub.f32 %v5227_v34, %v2857_v24 }
 0xe35   : > { %v2861_v18 = vmul.f32 %v5280_v57, %v5280_v57 }
 0xe37   : > { %v2863_v59 = vsel %vm948_vm1, %v2861_v18, 0.0  ;;  %v4056_v18 = vld [vmem:[%s4797_s14 + $0x7] ss:$0 sm:$0xff] }
 0xe38   : > { %2864 = vadd.xlane.f32.xlu2 %v2863_v59  ;;  %v2856_v60 = vpop.xlane.xlu0 %2855 }
 0xe39   : > { %v2858_v8 = vmul.f32 %v2856_v60, %v4891_v17 }
 0xe3b   : > { %v5287_v7 = vsub.f32 %v5232_v38, %v2858_v8 }
 0xe3d   : > { %v2862_v46 = vmul.f32 %v5287_v7, %v5287_v7 }
 0xe3f   : > { %v2866_v61 = vsel %vm948_vm1, %v2862_v46, 0.0  ;;  %v4057_v46 = vld [vmem:[%s4797_s14 + $0x8] ss:$0 sm:$0xff] }
 0xe40   : > { %2867 = vadd.xlane.f32.xlu1 %v2866_v61 }
 0xe45   : > { %v5294_v0 = vpop.f32.mrf.mxu1 }
 0xe4a   : > { %v2539_v62 = vpop.f32.mrf.mxu3 }
 0xe4b   : > { %3786 = vmatmul.msk.f32.vlgmr.msra.gmra.mxu0 %vm948_vm1, %v2539_v62 }
 0xe4c   : > { %v2564_v20 = vpop.f32.mrf.mxu2 }
 0xe4d   : > { %v5305_v19 = vpop.f32.mrf.mxu1  ;;  %v2593_v26 = vadd.f32 %v2592_v43, %v2564_v20  ;;  %v3806_v20 = vld [vmem:[%s5635_s15 + $0x20] sm:$0xff] }
 0xe52   : > { %v2589_v63 = vpop.f32.mrf.mxu3 }
 0xe53   : > { %3791 = vmatmul.msk.f32.vlgmr.msra.gmra.mxu1 %vm948_vm1, %v2589_v63 }
 0xeab   : > { %v2865_v13 = vpop.xlane.xlu2 %2864 }
 0xeac   : > { %v2869_v14 = vmul.f32 %v2865_v13, %v4891_v17  ;;  %v2974_v13 = vld [vmem:[%s4826_s4 + $0x60] sm:$0xff] }
 0xeae   : > { %v2871_v23 = vadd.f32 1e-05, %v2869_v14  ;;  %v2663_v14 = vld [vmem:[%s5635_s15 + $0x8] sm:$0xff] }
 0xeb0   : > { %4136 = vrsqrt.f32 %v2871_v23  ;;  %vm2879_vm10 = vweird.f32 %v2871_v23 }
 0xeb3   : > { %v2868_v25 = vpop.xlane.xlu1 %2867 }
 0xeb4   : > { %v2870_v28 = vmul.f32 %v2868_v25, %v4891_v17  ;;  %v2970_v25 = vld [vmem:[%s4826_s4 + $0x40] sm:$0xff] }
 0xeb6   : > { %v2872_v31 = vadd.f32 1e-05, %v2870_v28  ;;  %v4137_v33 = vpop.eup %4136 }
 0xeb7   : > { %v2874_v36 = vmul.f32 %v4137_v33, %v2871_v23  ;;  %vm2880_vm9 = vweird.f32 %v4137_v33  ;;  %v2971_v23 = vld [vmem:[%s4826_s4 + $0x48] sm:$0xff] }
 0xeb8   : > { %4138 = vrsqrt.f32 %v2872_v31  ;;  %vm2881_vm5 = vmor %vm2879_vm10, %vm2880_vm9  ;;  %vm2889_vm7 = vweird.f32 %v2872_v31 }
 0xeb9   : > { %v2875_v9 = vmul.f32 %v4137_v33, %v2874_v36  ;;  %v2965_v36 = vld [vmem:[%s4826_s4 + $0x18] sm:$0xff] }
 0xebb   : > { %v2876_v15 = vmul.f32 0.5, %v2875_v9  ;;  %v2964_v9 = vld [vmem:[%s4826_s4 + $0x10] sm:$0xff] }
 0xebd   : > { %v2877_v41 = vsub.f32 1.5, %v2876_v15  ;;  %v2963_v15 = vld [vmem:[%s4826_s4 + $0x8] sm:$0xff] }
 0xebe   : > { %v4139_v35 = vpop.eup %4138 }
 0xebf   : > { %v2884_v17 = vmul.f32 %v4139_v35, %v2872_v31  ;;  %v2878_v50 = vmul.f32 %v4137_v33, %v2877_v41  ;;  %vm2890_vm6 = vweird.f32 %v4139_v35 }
 0xec0   : > { %vm2891_vm8 = vmor %vm2889_vm7, %vm2890_vm6 }
 0xec1   : > { %v2885_v42 = vmul.f32 %v4139_v35, %v2884_v17  ;;  %v2882_v55 = vsel %vm2881_vm5, %v4137_v33, %v2878_v50 }
 0xec2   : > { %v2893_v59 = vmul.f32 %v2882_v55, %v5280_v57  ;;  %v3796_v57 = vld [vmem:[%s5634_s29 + $0x10] sm:$0xff] }
 0xec3   : > { %v2886_v53 = vmul.f32 0.5, %v2885_v42 }
 0xec4   : > { %v2899_v8 = vmul.f32 %v4056_v18, %v2893_v59 }
 0xec5   : > { %v2887_v24 = vsub.f32 1.5, %v2886_v53 }
 0xec6   : > { %v2905_v62 = vadd.f32 %v4057_v46, %v2899_v8 }
 0xec7   : > { %v2888_v60 = vmul.f32 %v4139_v35, %v2887_v24  ;;  %v2660_v24 = vld [vmem:[%s4831_s17 + $0x8] sm:$0xff] }
 0xec8   : > { %v2618_v16 = vpop.f32.mrf.mxu0 }
 0xec9   : > { %v2621_v29 = vadd.f32 %v2618_v16, %v2593_v26  ;;  %v2892_v61 = vsel %vm2891_vm8, %v4139_v35, %v2888_v60  ;;  %v3807_v26 = vld [vmem:[%s5635_s15 + $0x28] sm:$0xff] }
 0xeca   : > { %v2894_v63 = vmul.f32 %v2892_v61, %v5287_v7  ;;  %v2662_v7 = vld [vmem:[%s5635_s15] sm:$0xff]  ;;  %v2661_v61 = vld [vmem:[%s4831_s17 + $0x18] sm:$0xff] }
 0xecc   : > { %v2900_v1 = vmul.f32 %v4056_v18, %v2894_v63 }
 0xece   : > { %v2906_v3 = vadd.f32 %v4057_v46, %v2900_v1 }
 0xed0   : > { %v2647_v58 = vpop.f32.mrf.mxu1 }
 0xed1   : > { %v2650_v30 = vadd.f32 %v2647_v58, %v2621_v29  ;;  %v2968_v29 = vld [vmem:[%s4826_s4 + $0x30] sm:$0xff] }
 0xed3   : > { %v2652_v32 = vmul.f32 0.044715, %v2650_v30  ;;  %v2651_v44 = vmul.f32 0.5, %v2650_v30 }
 0xed5   : > { %v2653_v10 = vmul.f32 %v2652_v32, %v2650_v30  ;;  %v2966_v32 = vld [vmem:[%s4826_s4 + $0x20] sm:$0xff] }
 0xed7   : > { %v2654_v37 = vmul.f32 %v2653_v10, %v2650_v30 }
 0xed9   : > { %v2655_v39 = vadd.f32 %v2654_v37, %v2650_v30  ;;  %v2967_v30 = vld [vmem:[%s4826_s4 + $0x28] sm:$0xff] }
 0xedb   : > { %v2656_v40 = vmul.f32 0.7978846, %v2655_v39 }
 0xedd   : > { %4140 = vtanh.f32 %v2656_v40 }
 0xee3   : > { %v4141_v56 = vpop.eup %4140 }
 0xee4   : > { %v2658_v45 = vadd.f32 1.0, %v4141_v56  ;;  %v2962_v56 = vld [vmem:[%s4826_s4] sm:$0xff]  ;;  %s4458_s4 = smov 32  }
 0xee6   : > { %v2659_v47 = vmul.f32 %v2658_v45, %v2651_v44 }
 0xee8   : > { %3792 = vmatmul.msk.f32.vlgmr.msra.gmra.mxu2 %vm948_vm1, %v2659_v47  ;;  %3802 = vmatmul.msk.f32.vlgmr.msrb.gmra.mxu0 %vm948_vm1, %v2659_v47 }
 0xee9   : > { %2933 = vmatpush.msra.mxu2 %v2910_v49 }
 0xeeb   : > { %2934 = vmatpush.msra.mxu2 %v2909_v54 }
 0xeed   : > { %2935 = vmatpush.msra.mxu2 %v2908_v22 }
 0xeef   : > { %2936 = vmatpush.msra.mxu2 %v2907_v2 }
 0xef0   : > { %3812 = vmatmul.msk.f32.vlgmr.msrb.gmra.mxu2 %vm948_vm1, %v2659_v47 }
 0xef8   : > { %3816 = vmatmul.msk.f32.vlgmr.msra.gmra.mxu2 %vm948_vm1, %v2905_v62 }
 0xf00   : > { %3817 = vmatmul.msk.f32.gmra.mxu2 %vm948_vm1, %v2906_v3 }
 0xf65   : > { %v2752_v4 = vpop.f32.mrf.mxu0 }
 0xf66   : > { %3803 = vmatpush.msk.msrb.mxu1 %vm2698_vm11, %v2752_v4  ;;  %v3024_v4 = vld [vmem:[%s5636_s3 + $0x18] sm:$0xff] }
 0xf67   : > { %3804 = vmatmul.msk.f32.vlgmr.msrb.gmra.mxu1 %vm2691_vm12, %v3796_v57 }
 0xf68   : > { %3043 = vmatpush.msra.mxu1 %v3024_v4 }
 0xf6b   : > { %v2688_v5 = vpop.f32.mrf.mxu2 }
 0xf6c   : > { %3793 = vmatpush.msk.msrb.mxu3 %vm2698_vm11, %v2688_v5  ;;  %v3829_v5 = vld [vmem:[%s5636_s3 + $0x58] sm:$0xff] }
 0xf6d   : > { %3794 = vmatmul.msk.f32.vlgmr.msrb.gmra.mxu3 %vm2691_vm12, %v2662_v7  ;;  %v3823_v7 = vld [vmem:[%s5636_s3 + $0x38] sm:$0xff]  ;;  %3119 = vmatpush.msrb.mxu2 %v3829_v5 }
 0xf6e   : > { %2978 = vmatpush.msra.mxu3 %v2977_v48 }
 0xf6f   : > { %3805 = vmatmul.msk.f32.gmra.mxu1 %vm2691_vm12, %v3797_v11  ;;  %v4459_v11 = vmov 0.0  }
 0xf70   : > { %2979 = vmatpush.msra.mxu3 %v2976_v52  ;;  %3010 = vst.msk [vmem:[#allocation2] sm:$0x3] %vm3009_vm13, %v4459_v11  ;;  %v3023_v52 = vld [vmem:[%s5636_s3 + $0x10] sm:$0xff] }
 0xf71   : > { %3013 = vst.msk [vmem:[#allocation2 + $0x12] sm:$0x3] %vm3009_vm13, %v4459_v11  ;;  %3044 = vmatpush.msra.mxu1 %v3023_v52 }
 0xf72   : > { %2980 = vmatpush.msra.mxu3 %v2975_v12  ;;  %v3822_v12 = vld [vmem:[%s5636_s3 + $0x30] sm:$0xff] }
 0xf73   : > { %v2814_v43 = vpop.f32.mrf.mxu2 }
 0xf74   : > { %3813 = vmatpush.msk.msra.mxu0 %vm2698_vm11, %v2814_v43  ;;  %2981 = vmatpush.msra.mxu3 %v2974_v13  ;;  %v3828_v13 = vld [vmem:[%s5636_s3 + $0x50] sm:$0xff]  ;;  %v3827_v43 = vld [vmem:[%s5636_s3 + $0x48] sm:$0xff] }
 0xf75   : > { %3795 = vmatmul.msk.f32.gmra.mxu3 %vm2691_vm12, %v2663_v14  ;;  %3814 = vmatmul.msk.f32.vlgmr.msra.gmra.mxu0 %vm2691_vm12, %v3806_v20  ;;  %v3022_v14 = vld [vmem:[%s5636_s3 + $0x8] sm:$0xff] }
 0xf76   : > { %2982 = vmatpush.msra.mxu3 %v2973_v21  ;;  %3081 = vmatpush.msrb.mxu0 %v3823_v7  ;;  %v3821_v20 = vld [vmem:[%s5636_s3 + $0x28] sm:$0xff]  ;;  %v3021_v21 = vld [vmem:[%s5636_s3] sm:$0xff] }
 0xf77   : > { %3120 = vmatpush.msrb.mxu2 %v3828_v13  ;;  %3045 = vmatpush.msra.mxu1 %v3022_v14 }
 0xf78   : > { %2983 = vmatpush.msra.mxu3 %v2972_v6  ;;  %3082 = vmatpush.msrb.mxu0 %v3822_v12  ;;  %v3820_v6 = vld [vmem:[%s5636_s3 + $0x20] sm:$0xff] }
 0xf79   : > { %3121 = vmatpush.msrb.mxu2 %v3827_v43  ;;  %3046 = vmatpush.msra.mxu1 %v3021_v21 }
 0xf7a   : > { %2984 = vmatpush.msra.mxu3 %v2971_v23  ;;  %3083 = vmatpush.msrb.mxu0 %v3821_v20  ;;  %v3826_v23 = vld [vmem:[%s5636_s3 + $0x40] sm:$0xff] }
 0xf7b   : > { %v2938_v16 = vpop.f32.mrf.mxu2  ;;  %3122 = vmatpush.msrb.mxu2 %v3826_v23 }
 0xf7c   : > { %v2939_v28 = vadd.f32 %v4058_v51, %v2938_v16  ;;  %2985 = vmatpush.msra.mxu3 %v2970_v25  ;;  %3084 = vmatpush.msrb.mxu0 %v3820_v6  ;;  %v3841_v25 = vld [vmem:[%s5636_s3 + $0x98] sm:$0xff]  ;;  %v3834_v16 = vld [vmem:[%s5636_s3 + $0x70] sm:$0xff] }
 0xf7d   : > { %3815 = vmatmul.msk.f32.gmra.mxu0 %vm2691_vm12, %v3807_v26  ;;  %v3211_v26 = vld [vmem:[%s4790_s12 + $0x110] sm:$0xff] }
 0xf7e   : > { %v2946_v58 = vmul.f32 0.044715, %v2939_v28  ;;  %2986 = vmatpush.msra.mxu3 %v2969_v27  ;;  %v2944_v47 = vmul.f32 0.5, %v2939_v28  ;;  %3195 = vmatpush.msra.mxu0 %v3841_v25  ;;  %v3840_v27 = vld [vmem:[%s5636_s3 + $0x90] sm:$0xff] }
 0xf7f   : > { %3234 = vmatpush.msra.mxu2 %v3211_v26 }
 0xf80   : > { %v2948_v31 = vmul.f32 %v2946_v58, %v2939_v28  ;;  %2987 = vmatpush.msra.mxu3 %v2968_v29  ;;  %v3833_v29 = vld [vmem:[%s5636_s3 + $0x68] sm:$0xff]  ;;  %3196 = vmatpush.msra.mxu0 %v3840_v27 }
 0xf81   : > { %v3839_v58 = vld [vmem:[%s5636_s3 + $0x88] sm:$0xff] }
 0xf82   : > { %v2950_v33 = vmul.f32 %v2948_v31, %v2939_v28  ;;  %2988 = vmatpush.msra.mxu3 %v2967_v30  ;;  %v3209_v30 = vld [vmem:[%s4790_s12 + $0x80] sm:$0xff]  ;;  %v3832_v31 = vld [vmem:[%s5636_s3 + $0x60] sm:$0xff]  ;;  %3197 = vmatpush.msra.mxu0 %v3839_v58 }
 0xf83   : > { %v2941_v10 = vpop.f32.mrf.mxu2 }
 0xf84   : > { %v2942_v37 = vadd.f32 %v4058_v51, %v2941_v10  ;;  %2989 = vmatpush.msra.mxu3 %v2966_v32  ;;  %v2952_v39 = vadd.f32 %v2950_v33, %v2939_v28  ;;  %v3835_v51 = vld [vmem:[%s5636_s3 + $0x78] sm:$0xff]  ;;  %v3210_v28 = vld [vmem:[%s4790_s12 + $0xc8] sm:$0xff]  ;;  %v3208_v33 = vld [vmem:[%s4790_s12 + $0x38] sm:$0xff] }
 0xf85   : > { %3157 = vmatpush.msrb.mxu1 %v3835_v51  ;;  %3235 = vmatpush.msra.mxu2 %v3210_v28  ;;  %v3838_v32 = vld [vmem:[%s5636_s3 + $0x80] sm:$0xff]  ;;  %v4460_v51 = vmov 16.0  }
 0xf86   : > { %2990 = vmatpush.msra.mxu3 %v2965_v36  ;;  %v2954_v40 = vmul.f32 0.7978846, %v2952_v39  ;;  %v2947_v35 = vmul.f32 0.044715, %v2942_v37  ;;  %v2945_v54 = vmul.f32 0.5, %v2942_v37  ;;  %3198 = vmatpush.msra.mxu0 %v3838_v32 }
 0xf87   : > { %3158 = vmatpush.msrb.mxu1 %v3834_v16  ;;  %3236 = vmatpush.msra.mxu2 %v3209_v30  ;;  %v4059_v10 = vld [vmem:[%s4797_s14 + $0xa] ss:$0 sm:$0xff] }
 0xf88   : > { %2991 = vmatpush.msra.mxu3 %v2964_v9  ;;  %4142 = vtanh.f32 %v2954_v40  ;;  %v2949_v17 = vmul.f32 %v2947_v35, %v2942_v37 }
 0xf89   : > { %3159 = vmatpush.msrb.mxu1 %v3833_v29  ;;  %3237 = vmatpush.msra.mxu2 %v3208_v33 }
 0xf8a   : > { %2992 = vmatpush.msra.mxu3 %v2963_v15  ;;  %v2951_v41 = vmul.f32 %v2949_v17, %v2942_v37 }
 0xf8b   : > { %3160 = vmatpush.msrb.mxu1 %v3832_v31 }
 0xf8c   : > { %2993 = vmatpush.msra.mxu3 %v2962_v56  ;;  %v2953_v42 = vadd.f32 %v2951_v41, %v2942_v37 }
 0xf8e   : > { %v4143_v44 = vpop.eup %4142  ;;  %v2955_v45 = vmul.f32 0.7978846, %v2953_v42 }
 0xf8f   : > { %v2958_v49 = vadd.f32 1.0, %v4143_v44 }
 0xf90   : > { %4144 = vtanh.f32 %v2955_v45 }
 0xf91   : > { %v2960_v50 = vmul.f32 %v2958_v49, %v2944_v47 }
 0xf93   : > { %2994 = vmatmul.f32.vlgmr.msra.gmra.mxu3 %v2960_v50 }
 0xf96   : > { %v4145_v53 = vpop.eup %4144 }
 0xf97   : > { %v2959_v22 = vadd.f32 1.0, %v4145_v53 }
 0xf99   : > { %v2961_v55 = vmul.f32 %v2959_v22, %v2945_v54  ;;  %v4061_v54 = vld [vmem:[%s4797_s14 + $0xc] ss:$0 sm:$0xff] }
 0xf9b   : > { %2997 = vmatmul.f32.gmra.mxu3 %v2961_v55 }
 0xfe4   : > { %v2781_v2 = vpop.f32.mrf.mxu1 }
 0xfec   : > { %v2784_v63 = vpop.f32.mrf.mxu1 }
 0xff0   : > { %v2719_v18 = vpop.f32.mrf.mxu3 }
 0xff1   : > { %v2725_v59 = vadd.f32 %v2719_v18, %v2660_v24 }
 0xff2   : > { %v2843_v60 = vpop.f32.mrf.mxu0 }
 0xff3   : > { %v2787_v8 = vadd.f32 %v2781_v2, %v2725_v59 }
 0xff5   : > { %v2849_v46 = vadd.f32 %v2843_v60, %v2787_v8  ;;  %v3281_v60 = vld [vmem:[%s4790_s12 + $0x118] sm:$0xff]  ;;  %v3280_v8 = vld [vmem:[%s4790_s12 + $0xd0] sm:$0xff] }
 0xff6   : > { %3298 = vmatpush.msrb.mxu3 %v3281_v60 }
 0xff7   : > { %3311 = vrot.lane.b32.xlu0 %v2849_v46, %s4458_s4 }
 0xff8   : > { %v2722_v62 = vpop.f32.mrf.mxu3  ;;  %3299 = vmatpush.msrb.mxu3 %v3280_v8 }
 0xff9   : > { %v2726_v1 = vadd.f32 %v2722_v62, %v2661_v61  ;;  %v3279_v62 = vld [vmem:[%s4790_s12 + $0x88] sm:$0xff] }
 0xffa   : > { %v2846_v3 = vpop.f32.mrf.mxu0  ;;  %3300 = vmatpush.msrb.mxu3 %v3279_v62 }
 0xffb   : > { %v2788_v57 = vadd.f32 %v2784_v63, %v2726_v1  ;;  %v4060_v63 = vld [vmem:[%s4797_s14 + $0xb] ss:$0 sm:$0xff] }
 0xffd   : > { %v2850_v48 = vadd.f32 %v2846_v3, %v2788_v57  ;;  %v3278_v3 = vld [vmem:[%s4790_s12 + $0x40] sm:$0xff]  ;;  %s5637_s12 = sld [smem:[#allocation24_spill]] }
 0xffe   : > { %3301 = vmatpush.msrb.mxu3 %v3278_v3 }
 0xfff   : > { %3313 = vrot.lane.b32.xlu1 %v2850_v48, %s4458_s4 }
0x1003   : > { %s3858_s11 = sshll.u32 %s5637_s12, 4 }
0x1004   : > { %s3354_s30 = scalar_lea.hbm %s5640_s2, %s3858_s11 }
0x1005   : > { %s3357_s19 = sshll.u32 %s3354_s30, 4  ;;  %s3358_s19 = int_to_ptr.hbm [resolvable:$true] %s3357_s19 }
0x1006   : > { %s4320_s29 = sshra.s32 %s3358_s19, 4  ;;  %s4321_s29 = int_to_ptr.hbm [resolvable:$true] %s4320_s29 }
0x1007   : > { %s4322_s10 = scalar_lea.hbm %s4321_s29, 16  ;;  %p4327_p13 = scmp.lt.s32.totalorder %s4321_s29, %s5640_s2 }
0x1008   : > { %p4323_p7 = scmp.ne.s32.totalorder %s4321_s29, %s4322_s10  ;;  %p4328_p4 = scmp.lt.s32.totalorder %s4326_s16, %s4322_s10 }
0x100a   : > { %p4324_p10 = pnand %p4323_p7, %p4709_p1  ;;  %p4329_p9 = por %p4328_p4, %p4327_p13 }
0x100c   : > { %p4325_p11 = pneg %p4324_p10 }
0x100e   : > { %p4330_p2 = pnand %p4329_p9, %p4325_p11 }
0x1016   : > { %v2995_v36 = vpop.f32.mrf.mxu3 }
0x1017   : > { %v3001_v37 = vadd.f32 %v2995_v36, %v5227_v34 }
0x1019   : > { %v5398_v39 = vadd.f32 %v4059_v10, %v3001_v37 }
0x101b   : > { %3011 = vst.msk [vmem:[#allocation2 + $0x2] sm:$0xff] %vm948_vm1, %v5398_v39 }
0x101e   : > { %v2998_v9 = vpop.f32.mrf.mxu3 }
0x101f   : > { %v3002_v40 = vadd.f32 %v2998_v9, %v5232_v38 }
0x1021   : > { %v5403_v35 = vadd.f32 %v4059_v10, %v3002_v40 }
0x1022   : > { %v3019_v15 = vld [vmem:[#allocation2] sm:$0xff] }
0x1023   : > { %v3056_v17 = vld [vmem:[#allocation2 + $0x1] sm:$0xff]  ;;  %3012 = vst.msk [vmem:[#allocation2 + $0xa] sm:$0xff] %vm948_vm1, %v5403_v35  ;;  %3818 = vmatmul.msk.f32.vlgmr.msra.gmra.mxu1 %vm948_vm1, %v3019_v15 }
0x1024   : > { %v3094_v56 = vld [vmem:[#allocation2 + $0x2] sm:$0xff]  ;;  %3824 = vmatmul.msk.f32.vlgmr.msrb.gmra.mxu0 %vm948_vm1, %v3056_v17 }
0x1025   : > { %3830 = vmatmul.msk.f32.vlgmr.msrb.gmra.mxu2 %vm948_vm1, %v3094_v56 }
0x102a   : > { %v3020_v34 = vld [vmem:[#allocation2 + $0x8] sm:$0xff] }
0x102b   : > { %v3057_v41 = vld [vmem:[#allocation2 + $0x9] sm:$0xff]  ;;  %3819 = vmatmul.msk.f32.gmra.mxu1 %vm948_vm1, %v3020_v34 }
0x102c   : > { %v3095_v42 = vld [vmem:[#allocation2 + $0xa] sm:$0xff]  ;;  %3825 = vmatmul.msk.f32.gmra.mxu0 %vm948_vm1, %v3057_v41 }
0x102d   : > { %3831 = vmatmul.msk.f32.gmra.mxu2 %vm948_vm1, %v3095_v42  ;;  %v3132_v38 = vld [vmem:[#allocation2 + $0x3] sm:$0xff]  ;;  %v3133_v45 = vld [vmem:[#allocation2 + $0xb] sm:$0xff] }
0x102e   : > { %v3170_v44 = vld [vmem:[#allocation2 + $0x4] sm:$0xff]  ;;  %v3171_v47 = vld [vmem:[#allocation2 + $0xc] sm:$0xff] }
0x1033   : > { %3836 = vmatmul.msk.f32.vlgmr.msrb.gmra.mxu1 %vm948_vm1, %v3132_v38 }
0x1034   : > { %3842 = vmatmul.msk.f32.vlgmr.msra.gmra.mxu0 %vm948_vm1, %v3170_v44 }
0x1035   : > { %3844 = vmatmul.msk.f32.vlgmr.msra.gmra.mxu2 %vm948_vm1, %v5398_v39 }
0x103b   : > { %3837 = vmatmul.msk.f32.gmra.mxu1 %vm948_vm1, %v3133_v45 }
0x103c   : > { %3843 = vmatmul.msk.f32.gmra.mxu0 %vm948_vm1, %v3171_v47 }
0x103d   : > { %3845 = vmatmul.msk.f32.gmra.mxu2 %vm948_vm1, %v5403_v35 }
0x10a0   : > { %v3048_v50 = vpop.f32.mrf.mxu1 }
0x10a1   : > { %v3086_v22 = vpop.f32.mrf.mxu0  ;;  %v3054_v5 = vadd.f32 %v4060_v63, %v3048_v50 }
0x10a3   : > { %v3092_v52 = vadd.f32 %v3086_v22, %v3054_v5 }
0x10a8   : > { %v3124_v49 = vpop.f32.mrf.mxu2  ;;  %v3051_v2 = vpop.f32.mrf.mxu1 }
0x10a9   : > { %v3089_v46 = vpop.f32.mrf.mxu0  ;;  %v3055_v12 = vadd.f32 %v4060_v63, %v3051_v2  ;;  %v3130_v14 = vadd.f32 %v3124_v49, %v3092_v52 }
0x10ab   : > { %v3093_v43 = vadd.f32 %v3089_v46, %v3055_v12 }
0x10b0   : > { %v3127_v53 = vpop.f32.mrf.mxu2  ;;  %v3162_v4 = vpop.f32.mrf.mxu1 }
0x10b1   : > { %v3200_v13 = vpop.f32.mrf.mxu0  ;;  %v3168_v21 = vadd.f32 %v3162_v4, %v3130_v14  ;;  %v3131_v25 = vadd.f32 %v3127_v53, %v3093_v43 }
0x10b3   : > { %v3206_v16 = vadd.f32 %v3200_v13, %v3168_v21 }
0x10b8   : > { %v3239_v55 = vpop.f32.mrf.mxu2  ;;  %v3165_v6 = vpop.f32.mrf.mxu1 }
0x10b9   : > { %v3240_v24 = vadd.f32 %v4061_v54, %v3239_v55  ;;  %v3169_v27 = vadd.f32 %v3165_v6, %v3131_v25  ;;  %v3203_v58 = vpop.f32.mrf.mxu0 }
0x10bb   : > { %v3245_v18 = vsub.f32 0.0, %v3240_v24  ;;  %v3207_v30 = vadd.f32 %v3203_v58, %v3169_v27 }
0x10bd   : > { %v3247_v59 = vmul.f32 1.442695, %v3245_v18 }
0x10bf   : > { %4146 = vpow2.f32 %v3247_v59 }
0x10c0   : > { %v3242_v61 = vpop.f32.mrf.mxu2 }
0x10c1   : > { %v3243_v1 = vadd.f32 %v4061_v54, %v3242_v61 }
0x10c3   : > { %v3246_v57 = vsub.f32 0.0, %v3243_v1 }
0x10c5   : > { %v4147_v7 = vpop.eup %4146  ;;  %v3249_v48 = vmul.f32 1.442695, %v3246_v57 }
0x10c6   : > { %v3251_v11 = vadd.f32 1.0, %v4147_v7 }
0x10c7   : > { %4148 = vpow2.f32 %v3249_v48 }
0x10c8   : > { %4150 = vrcp.f32 %v3251_v11 }
0x10c9   : > { %4152 = vrcp.f32 %v4460_v51 }
0x10cd   : > { %v4149_v20 = vpop.eup %4148 }
0x10ce   : > { %v3252_v23 = vadd.f32 1.0, %v4149_v20  ;;  %v4151_v26 = vpop.eup %4150 }
0x10cf   : > { %v3255_v28 = vmul.f32 %v4151_v26, %v3206_v16  ;;  %v4153_v29 = vpop.eup %4152 }
0x10d0   : > { %4154 = vrcp.f32 %v3252_v23  ;;  %v3269_v10 = vmul.f32 16.0, %v4153_v29  ;;  %vm3273_vm14 = vweird.f32 %v4153_v29 }
0x10d1   : > { %v3257_v32 = vadd.f32 %v3255_v28, %v5398_v39 }
0x10d2   : > { %v3270_v40 = vsub.f32 1.0, %v3269_v10 }
0x10d3   : > { %v3259_v37 = vsel %vm948_vm1, %v3257_v32, 0.0 }
0x10d4   : > { %v3271_v56 = vmul.f32 %v4153_v29, %v3270_v40 }
0x10d6   : > { %v4155_v31 = vpop.eup %4154  ;;  %v3272_v42 = vadd.f32 %v4153_v29, %v3271_v56 }
0x10d7   : > { %v3256_v33 = vmul.f32 %v4155_v31, %v3207_v30 }
0x10d9   : > { %v3258_v36 = vadd.f32 %v3256_v33, %v5403_v35  ;;  %v3274_v35 = vsel %vm3273_vm14, %v4153_v29, %v3272_v42 }
0x10db   : > { %v3260_v9 = vsel %vm948_vm1, %v3258_v36, 0.0 }
0x10dc   : > { %v3261_v15 = vadd.f32 %v3260_v9, %v3259_v37 }
0x10de   : > { %v3262_v17 = vrot.slane %v3261_v15, 4 }
0x10e0   : > { %v3263_v34 = vadd.f32 %v3262_v17, %v3261_v15 }
0x10e2   : > { %v3264_v41 = vrot.slane %v3263_v34, 2 }
0x10e4   : > { %v3265_v39 = vadd.f32 %v3264_v41, %v3263_v34 }
0x10e6   : > { %v3266_v38 = vrot.slane %v3265_v39, 1 }
0x10e8   : > { %v3267_v44 = vadd.f32 %v3266_v38, %v3265_v39 }
0x10ea   : > { %v3275_v45 = vmul.f32 %v3274_v35, %v3267_v44 }
0x10ec   : > { %3846 = vmatmul.msk.f32.vlgmr.msrb.gmra.mxu3 %vm948_vm1, %v3275_v45  ;;  %v3276_v47 = vsub.f32 %v3257_v32, %v3275_v45  ;;  %v3277_v49 = vsub.f32 %v3258_v36, %v3275_v45 }
0x10ee   : > { %3306 = vst.msk [vmem:[%s4862_s23] sm:$0xff] %vm948_vm1, %v3276_v47 }
0x10ef   : > { %3307 = vst.msk [vmem:[%s4862_s23 + $0x8] sm:$0xff] %vm948_vm1, %v3277_v49 }
0x10f0   : > { %4333 = shalt.err (!%p4330_p2)
}
0x10f1   : > { %s4461_s23 = smov 128   ;;  %s4462_s24 = smov 8   ;;  %v3282_v50 = vld [vmem:[%s4797_s14 + $0xd] sm:$0x1]  ;;  %v3312_v2 = vpop.permute.xlu0 %3311  ;;  %v3314_v18 = vpop.permute.xlu1 %3313  ;;  %vm3323_vm15 = vcmask 449536   ;;  %vm3328_vm0 = vcmask 711680  }
0x10f2   : > { %3878 = dma.vmem_to_hbm [thread:$0]  (%p4709_p1), %s3356_s28, 256, %s3358_s19, %s3334_s20, %s4461_s23, %s4461_s23, %s4462_s24  }
0x10f3   : > { %v2487_v55 = vld [vmem:[%s4831_s17] sm:$0xff]  ;;  %v2488_v24 = vld [vmem:[%s4831_s17 + $0x10] sm:$0xff] }
0x10f4   : > { %v2513_v59 = vadd.f32 %v5294_v0, %v2487_v55  ;;  %v2516_v60 = vadd.f32 %v5305_v19, %v2488_v24 }
0x10f6   : > { %v3321_v8 = vsel %vm948_vm1, %v2513_v59, %v3312_v2  ;;  %v3322_v46 = vsel %vm948_vm1, %v2516_v60, %v3314_v18 }
0x10f7   : > { %v3324_v61 = vsel %vm3323_vm15, %v3321_v8, 0.0  ;;  %v3325_v62 = vsel %vm3323_vm15, %v3322_v46, 0.0 }
0x116f   : > { %v3303_v53 = vpop.f32.mrf.mxu3 }
0x1170   : > { %v3304_v54 = vadd.f32 %v3303_v53, %v3282_v50 }
0x1172   : > { %v3308_v22 = vperm.slane %v3304_v54, 0 }
0x1174   : > { %3318 = vrot.lane.b32.xlu2 %v3308_v22, %s4448_s1 }
0x11ce   : > { %v3319_v63 = vpop.permute.xlu2 %3318 }
0x11cf   : > { %v3326_v1 = vsel %vm1831_vm2, %v3324_v61, %v3319_v63  ;;  %v3327_v3 = vsel %vm1831_vm2, %v3325_v62, %v3319_v63 }
0x11d0   : > { %v3329_v57 = vsel %vm3328_vm0, %v3326_v1, 0.0  ;;  %v3330_v4 = vsel %vm3328_vm0, %v3327_v3, 0.0 }
0x11d1   : > { %3331 = vst [vmem:[%s4857_s5] sm:$0xff] %v3329_v57 }
0x11d2   : > { %3332 = vst [vmem:[%s4857_s5 + $0x8] sm:$0xff] %v3330_v4 }
0x11d3 PF: > { %s5641_s14 = sld [smem:[#allocation27_spill]] }
0x11d4   : > { %s5642_s17 = sld [smem:[#allocation20_spill]] }
0x11d5   : > { %s5643_s1 = sld [smem:[#allocation28_spill]] }
0x11d9   : > { %p3901_p12 = scmp.ge.s32.totalorder %s5641_s14, 2 }
0x11da   : > { %s3375_s9 = sand.u32 1, %s5642_s17  }
0x11db   : > { %p5644_p1 = scmp.ne.s32.totalorder %s5643_s1, 0  ;;  %s3376_s21 = scalar_lea.sflag [#allocation5], %s3375_s9 }
0x11dd   : > { %p3897_p3 = pnand %p3901_p12, %p5644_p1 }
0x11df   : > { %p3898_p8 = pneg %p3897_p3 }
0x11e1   : > { %4395 = dma.done.wait (%p3898_p8), %s3376_s21, 256  }
0x11e2   : > { %4397 = vsyncadd (%p3898_p8), %s3376_s21, 4294967040  ;;  %s40_s1 = sadd.s32 1, %s5641_s14   ;;  %s5645_s24 = sld [smem:[#allocation18_spill]] }
0x11e3   : > { %p37_p5 = scmp.ge.s32.totalorder %s40_s1, 6   ;;  %s5646_s25 = sld [smem:[#allocation19_spill]] }
0x11e4   : > { %s5647_s26 = sld [smem:[#allocation31_spill]] }
0x11e5   : > { %s5648_s27 = sld [smem:[#allocation21_spill]] }
0x11e6   : > { %s5649_s28 = sld [smem:[#allocation22_spill]] }
0x11e7   : > { %s5650_s29 = sld [smem:[#allocation34_spill]]  ;;  %39 = sbr.rel (!%p37_p5) target bundleno = 32 (0x20), region = 231 }
0x11e8   : > { %s5651_s0 = sld [smem:[#allocation25_spill]] }
0x11e9   : > { %s5652_s30 = sld [smem:[#allocation26_spill]] }
0x11ea   : > { %s5653_s18 = sld [smem:[#allocation29_spill]] }
0x11eb   : > { %s5654_s19 = sld [smem:[#allocation30_spill]] }
0x11ec   :  { %3394 = vsyncpa [#allocation4], 1 }
0x11ed   :  { %3396 = vsyncpa [#allocation4 + $0x1], 1 }
0x11ee   :  { %3397 = vsyncpa [#allocation7], 1 }
0x11ef   :  { %3399 = vsyncpa [#allocation7 + $0x1], 1 }
0x11f0   :  { %3400 = vsyncpa [#allocation10], 1 }
0x11f1   :  { %3402 = vsyncpa [#allocation10 + $0x1], 1 }
0x11f2   :  { %3403 = vsyncpa [#allocation5], 1 }
0x11f3   :  { %3405 = vsyncpa [#allocation5 + $0x1], 1 }

</bundles_post_ra>
